<compile_context>
chip_gen: v7x
topology: tpu7x:2x2x1
jax: 0.10.0
libtpu: 0.0.40
codegen_flags: <defaults>
</compile_context>

<pallas_src>
import numpy as np
import jax
import jax.numpy as jnp
from jax import lax
from jax.experimental import pallas as pl
from jax.experimental.pallas import tpu as pltpu

# -----------------------------------------------------------------------------
# VIN hyper-parameters (small demo sizes consistent with the module's forward)
# -----------------------------------------------------------------------------
B    = 2      # batch
CH_I = 4      # arg.ch_i
CH_H = 16     # arg.ch_h
CH_Q = 8      # arg.ch_q
K    = 5      # arg.k
SB   = 4      # arg.statebatchsize
H = W = 16    # grid-world spatial size
N_ACT = 8     # w_o: (8, ch_q)

L   = B * H * W          # 512 — flattened (batch, y, x), lives on the lane axis
BSB = B * SB             # 8   — rows of the final output

_HIGH = jax.lax.Precision.HIGHEST

# Lane offset of each of the 9 conv taps.  The per-tap validity mask zeroes
# positions whose neighbour falls outside the HxW grid, which also prevents any
# cross-batch leakage in the fused (b, y, x) lane layout.
DELTAS = tuple((ky - 1) * W + (kx - 1) for ky in range(3) for kx in range(3))


def _make_tap_mask():
    pos = np.arange(L)
    y = (pos % (H * W)) // W
    x = pos % W
    rows = []
    for ky in range(3):
        for kx in range(3):
            dy, dx = ky - 1, kx - 1
            ok = (y + dy >= 0) & (y + dy < H) & (x + dx >= 0) & (x + dx < W)
            rows.append(ok.astype(np.float32))
    return np.stack(rows, axis=0)            # (9, L)


_TAP_MASK = _make_tap_mask()


def vin_kernel(xcol_ref,   # (9*CH_I, L)   im2col'd, zero-padded input
               weff_ref,   # (1, 9*CH_I)   w1 ∘ w0 folded weights
               beff_ref,   # (1, 1)        w1 ∘ bias folded bias
               wqm_ref,    # (9*CH_Q, L)   mask-baked wq taps   (row = t*CH_Q + c)
               wfbm_ref,   # (9*CH_Q, L)   mask-baked w_fb taps (row = t*CH_Q + c)
               wo_ref,     # (CH_Q, N_ACT)
               flat_ref,   # (BSB, 1) i32  flattened b*H*W + s1*W + s2 indices
               out_ref,    # (BSB, N_ACT)
               pred_ref):  # (BSB, N_ACT)

    # ---- r = conv1x1(conv3x3(X) + bias), folded: one (1,36)@(36,L) matmul ----
    r = jnp.dot(weff_ref[...], xcol_ref[...],
                preferred_element_type=jnp.float32,
                precision=_HIGH) + beff_ref[...]                  # (1, L)

    def conv_taps(row, wm_ref, acc=None):
        # row (1, L) -> 3x3 conv with zero padding expressed as 9 lane-rolls of
        # the sublane-broadcast row, accumulated against the precomputed
        # mask-baked weights: 1 vmul + 1 vadd per vreg per tap, all in vregs.
        row8 = jnp.broadcast_to(row, (CH_Q, L))   # hoisted: one broadcast/call
        for t, d in enumerate(DELTAS):
            s = (-d) % L                          # shifted[p] = row[p + d]
            sh = row8 if s == 0 else pltpu.roll(row8, s, 1)
            term = wm_ref[t * CH_Q:(t + 1) * CH_Q, :] * sh
            acc = term if acc is None else acc + term
        return acc                                # (CH_Q, L)

    # ---- value iteration: q_r = conv(r, w) is loop-invariant ------------------
    q_r = conv_taps(r, wqm_ref)                   # (CH_Q, L)
    v = jnp.max(q_r, axis=0, keepdims=True)       # (1, L)
    for _ in range(K - 1):
        q = conv_taps(v, wfbm_ref, acc=q_r)       # q_r seeds the accumulator
        v = jnp.max(q, axis=0, keepdims=True)
    q = conv_taps(v, wfbm_ref, acc=q_r)           # final q: (CH_Q, L)

    # ---- gather q at the B*SB requested states via a one-hot matmul -----------
    cols = lax.broadcasted_iota(jnp.int32, (BSB, L), 1)
    onehot = (cols == flat_ref[...]).astype(jnp.float32)            # (BSB, L)
    fq = lax.dot_general(onehot, q, (((1,), (1,)), ((), ())),
                         preferred_element_type=jnp.float32,
                         precision=_HIGH)                           # (BSB, CH_Q)

    # ---- linear (w_o) + softmax -----------------------------------------------
    logits = jnp.dot(fq, wo_ref[...],
                     preferred_element_type=jnp.float32, precision=_HIGH)
    out_ref[...] = logits
    m = jnp.max(logits, axis=1, keepdims=True)
    e = jnp.exp(logits - m)
    pred_ref[...] = e / jnp.sum(e, axis=1, keepdims=True)


@jax.jit
def vin_forward(X, S1, S2, params):
    """X: (B, CH_I, H, W) NCHW float; S1, S2: (B, SB) int indices into (H, W)."""
    w0, bias, w1, w, w_fb, w_o = (params[n] for n in
                                  ("w0", "bias", "w1", "w", "w_fb", "w_o"))

    # im2col the zero-padded input once in the wrapper: (9*CH_I, B*H*W)
    xp = jnp.pad(X.astype(jnp.float32), ((0, 0), (0, 0), (1, 1), (1, 1)))
    taps = [xp[:, :, ky:ky + H, kx:kx + W].reshape(B, CH_I, H * W)
            for ky in range(3) for kx in range(3)]
    xcol = jnp.concatenate(taps, axis=1)                         # (B, 36, H*W)
    xcol = jnp.transpose(xcol, (1, 0, 2)).reshape(9 * CH_I, L)   # (36, L)

    # Fold the 1x1 conv (w1) and its bias path into the 3x3 front conv weights.
    w0m   = jnp.transpose(w0, (0, 2, 3, 1)).reshape(CH_H, 9 * CH_I)  # (16, 36)
    w1m   = w1.reshape(1, CH_H)                                      # (1, 16)
    w_eff = w1m @ w0m                                                # (1, 36)
    b_eff = w1m @ bias.reshape(CH_H, 1)                              # (1, 1)

    # Precompute mask-baked tap weights (exact: mask is 0/1), row = t*CH_Q + c.
    mask = jnp.asarray(_TAP_MASK)                                    # (9, L)
    wqm  = (w.reshape(CH_Q, 9).T[:, :, None] *
            mask[:, None, :]).reshape(9 * CH_Q, L)                   # (72, L)
    wfbm = (w_fb.reshape(CH_Q, 9).T[:, :, None] *
            mask[:, None, :]).reshape(9 * CH_Q, L)                   # (72, L)

    wot = w_o.T                                                      # (CH_Q, 8)

    # flattened gather indices, batch-major (same order as the torch loop)
    flat = (jnp.repeat(jnp.arange(B, dtype=jnp.int32), SB) * (H * W)
            + S1.reshape(-1).astype(jnp.int32) * W
            + S2.reshape(-1).astype(jnp.int32)).reshape(BSB, 1)

    out, pred = pl.pallas_call(
        vin_kernel,
        out_shape=(jax.ShapeDtypeStruct((BSB, N_ACT), jnp.float32),
                   jax.ShapeDtypeStruct((BSB, N_ACT), jnp.float32)),
    )(xcol, w_eff, b_eff, wqm, wfbm, wot, flat)
    return out, pred


def ref_forward(X, S1, S2, params, k=K):
    """Pure-JAX reference mirroring the PyTorch forward (NCHW convs)."""
    dn = ('NCHW', 'OIHW', 'NCHW')

    def conv(x, w, pad):
        return lax.conv_general_dilated(x, w, (1, 1), pad,
                                        dimension_numbers=dn, precision=_HIGH)

    p1, p0 = ((1, 1), (1, 1)), ((0, 0), (0, 0))
    h = conv(X, params['w0'], p1) + params['bias'][None, :, None, None]
    r = conv(h, params['w1'], p0)
    q = conv(r, params['w'], p1)
    v = jnp.max(q, axis=1, keepdims=True)
    wwfb = jnp.concatenate([params['w'], params['w_fb']], axis=1)
    for _ in range(k - 1):
        rv = jnp.concatenate([r, v], axis=1)
        q = conv(rv, wwfb, p1)
        v = jnp.max(q, axis=1, keepdims=True)
    q = conv(jnp.concatenate([r, v], axis=1), wwfb, p1)
    bs = q.shape[0]
    bidx = jnp.repeat(jnp.arange(bs), SB)
    s1 = S1.reshape(-1)
    s2 = S2.reshape(-1)
    fq = q[bidx, :, s1, s2]                    # (B*SB, CH_Q)
    out = fq @ params['w_o'].T
    return out, jax.nn.softmax(out, axis=1)


if __name__ == "__main__":
    key = jax.random.PRNGKey(0)
    kx, k1, k2, kwb, kw0, kw1, kww, kwf, kwo = jax.random.split(key, 9)

    X = jax.random.normal(kx, (B, CH_I, H, W), jnp.float32)
    S1 = jax.random.randint(k1, (B, SB), 0, H)
    S2 = jax.random.randint(k2, (B, SB), 0, W)

    # Deterministic synthetic parameters (same shapes as the torch module).
    # Note: torch's zeros().random_(0, 1) * 0.01 is identically zero; we use
    # small deterministic random values instead so the kernel is non-trivial.
    u = lambda kk, shape: jax.random.uniform(kk, shape, jnp.float32) * 0.1
    params = {
        'bias': u(kwb, (CH_H,)),
        'w0':   u(kw0, (CH_H, CH_I, 3, 3)),
        'w1':   u(kw1, (1, CH_H, 1, 1)),
        'w':    u(kww, (CH_Q, 1, 3, 3)),
        'w_fb': u(kwf, (CH_Q, 1, 3, 3)),
        'w_o':  u(kwo, (N_ACT, CH_Q)),
    }

    out, pred = vin_forward(X, S1, S2, params)
    out, pred = jax.block_until_ready((out, pred))

    ref_out, ref_pred = ref_forward(X, S1, S2, params)
    np.testing.assert_allclose(np.asarray(out), np.asarray(ref_out),
                               rtol=2e-3, atol=1e-5)
    np.testing.assert_allclose(np.asarray(pred), np.asarray(ref_pred),
                               rtol=2e-3, atol=1e-5)
    print("KERNEL_OK")
</pallas_src>

<mosaic_0001>
module attributes {stable_mosaic.version = 11 : i64} {
  func.func @vin_kernel(%arg0: memref<36x512xf32, #tpu.memory_space<vmem>>, %arg1: memref<1x36xf32, #tpu.memory_space<vmem>>, %arg2: memref<1x1xf32, #tpu.memory_space<vmem>>, %arg3: memref<72x512xf32, #tpu.memory_space<vmem>>, %arg4: memref<72x512xf32, #tpu.memory_space<vmem>>, %arg5: memref<8x8xf32, #tpu.memory_space<vmem>>, %arg6: memref<8x1xi32, #tpu.memory_space<vmem>>, %arg7: memref<8x8xf32, #tpu.memory_space<vmem>>, %arg8: memref<8x8xf32, #tpu.memory_space<vmem>>) attributes {dimension_semantics = [], scalar_prefetch = 0 : i64, scratch_operands = 0 : i64, tpu.core_type = #tpu.core_type<tc>} {
    %c0 = arith.constant 0 : index
    %c0_0 = arith.constant 0 : index
    %0 = vector.load %arg1[%c0, %c0_0] : memref<1x36xf32, #tpu.memory_space<vmem>>, vector<1x36xf32>
    %c0_1 = arith.constant 0 : index
    %c0_2 = arith.constant 0 : index
    %1 = vector.load %arg0[%c0_1, %c0_2] : memref<36x512xf32, #tpu.memory_space<vmem>>, vector<36x512xf32>
    %cst = arith.constant dense<0.000000e+00> : vector<1x512xf32>
    %2 = tpu.matmul %0, %1, %cst {dimension_numbers = #tpu.dot_dimension_numbers<[1], [0], [0], [1], [0, 0, 1, 1], [], []>, precision = #tpu.contract_precision<fp32>} : vector<1x36xf32>, vector<36x512xf32>, vector<1x512xf32> -> vector<1x512xf32>
    %c0_3 = arith.constant 0 : index
    %c0_4 = arith.constant 0 : index
    %3 = vector.load %arg2[%c0_3, %c0_4] : memref<1x1xf32, #tpu.memory_space<vmem>>, vector<1x1xf32>
    %4 = vector.broadcast %3 : vector<1x1xf32> to vector<1x512xf32>
    %5 = arith.addf %2, %4 : vector<1x512xf32>
    %6 = vector.shape_cast %5 : vector<1x512xf32> to vector<1x512xf32>
    %7 = vector.broadcast %6 : vector<1x512xf32> to vector<8x512xf32>
    %c17_i32 = arith.constant 17 : i32
    %8 = tpu.dynamic_rotate %7 by %c17_i32 dim 1 : vector<8x512xf32>, i32 -> vector<8x512xf32>
    %c0_5 = arith.constant 0 : index
    %c0_6 = arith.constant 0 : index
    %9 = vector.load %arg3[%c0_5, %c0_6] : memref<72x512xf32, #tpu.memory_space<vmem>>, vector<8x512xf32>
    %10 = arith.mulf %9, %8 : vector<8x512xf32>
    %c16_i32 = arith.constant 16 : i32
    %11 = tpu.dynamic_rotate %7 by %c16_i32 dim 1 : vector<8x512xf32>, i32 -> vector<8x512xf32>
    %c8 = arith.constant 8 : index
    %c0_7 = arith.constant 0 : index
    %12 = vector.load %arg3[%c8, %c0_7] : memref<72x512xf32, #tpu.memory_space<vmem>>, vector<8x512xf32>
    %13 = arith.mulf %12, %11 : vector<8x512xf32>
    %14 = arith.addf %10, %13 : vector<8x512xf32>
    %c15_i32 = arith.constant 15 : i32
    %15 = tpu.dynamic_rotate %7 by %c15_i32 dim 1 : vector<8x512xf32>, i32 -> vector<8x512xf32>
    %c16 = arith.constant 16 : index
    %c0_8 = arith.constant 0 : index
    %16 = vector.load %arg3[%c16, %c0_8] : memref<72x512xf32, #tpu.memory_space<vmem>>, vector<8x512xf32>
    %17 = arith.mulf %16, %15 : vector<8x512xf32>
    %18 = arith.addf %14, %17 : vector<8x512xf32>
    %c1_i32 = arith.constant 1 : i32
    %19 = tpu.dynamic_rotate %7 by %c1_i32 dim 1 : vector<8x512xf32>, i32 -> vector<8x512xf32>
    %c24 = arith.constant 24 : index
    %c0_9 = arith.constant 0 : index
    %20 = vector.load %arg3[%c24, %c0_9] : memref<72x512xf32, #tpu.memory_space<vmem>>, vector<8x512xf32>
    %21 = arith.mulf %20, %19 : vector<8x512xf32>
    %22 = arith.addf %18, %21 : vector<8x512xf32>
    %c32 = arith.constant 32 : index
    %c0_10 = arith.constant 0 : index
    %23 = vector.load %arg3[%c32, %c0_10] : memref<72x512xf32, #tpu.memory_space<vmem>>, vector<8x512xf32>
    %24 = arith.mulf %23, %7 : vector<8x512xf32>
    %25 = arith.addf %22, %24 : vector<8x512xf32>
    %c511_i32 = arith.constant 511 : i32
    %26 = tpu.dynamic_rotate %7 by %c511_i32 dim 1 : vector<8x512xf32>, i32 -> vector<8x512xf32>
    %c40 = arith.constant 40 : index
    %c0_11 = arith.constant 0 : index
    %27 = vector.load %arg3[%c40, %c0_11] : memref<72x512xf32, #tpu.memory_space<vmem>>, vector<8x512xf32>
    %28 = arith.mulf %27, %26 : vector<8x512xf32>
    %29 = arith.addf %25, %28 : vector<8x512xf32>
    %c497_i32 = arith.constant 497 : i32
    %30 = tpu.dynamic_rotate %7 by %c497_i32 dim 1 : vector<8x512xf32>, i32 -> vector<8x512xf32>
    %c48 = arith.constant 48 : index
    %c0_12 = arith.constant 0 : index
    %31 = vector.load %arg3[%c48, %c0_12] : memref<72x512xf32, #tpu.memory_space<vmem>>, vector<8x512xf32>
    %32 = arith.mulf %31, %30 : vector<8x512xf32>
    %33 = arith.addf %29, %32 : vector<8x512xf32>
    %c496_i32 = arith.constant 496 : i32
    %34 = tpu.dynamic_rotate %7 by %c496_i32 dim 1 : vector<8x512xf32>, i32 -> vector<8x512xf32>
    %c56 = arith.constant 56 : index
    %c0_13 = arith.constant 0 : index
    %35 = vector.load %arg3[%c56, %c0_13] : memref<72x512xf32, #tpu.memory_space<vmem>>, vector<8x512xf32>
    %36 = arith.mulf %35, %34 : vector<8x512xf32>
    %37 = arith.addf %33, %36 : vector<8x512xf32>
    %c495_i32 = arith.constant 495 : i32
    %38 = tpu.dynamic_rotate %7 by %c495_i32 dim 1 : vector<8x512xf32>, i32 -> vector<8x512xf32>
    %c64 = arith.constant 64 : index
    %c0_14 = arith.constant 0 : index
    %39 = vector.load %arg3[%c64, %c0_14] : memref<72x512xf32, #tpu.memory_space<vmem>>, vector<8x512xf32>
    %40 = arith.mulf %39, %38 : vector<8x512xf32>
    %41 = arith.addf %37, %40 : vector<8x512xf32>
    %cst_15 = arith.constant dense<0xFF800000> : vector<512xf32>
    %42 = vector.multi_reduction <maximumf>, %41, %cst_15 [0] : vector<8x512xf32> to vector<512xf32>
    %43 = vector.shape_cast %42 : vector<512xf32> to vector<1x512xf32>
    %44 = vector.shape_cast %43 : vector<1x512xf32> to vector<1x512xf32>
    %45 = vector.broadcast %44 : vector<1x512xf32> to vector<8x512xf32>
    %c17_i32_16 = arith.constant 17 : i32
    %46 = tpu.dynamic_rotate %45 by %c17_i32_16 dim 1 : vector<8x512xf32>, i32 -> vector<8x512xf32>
    %c0_17 = arith.constant 0 : index
    %c0_18 = arith.constant 0 : index
    %47 = vector.load %arg4[%c0_17, %c0_18] : memref<72x512xf32, #tpu.memory_space<vmem>>, vector<8x512xf32>
    %48 = arith.mulf %47, %46 : vector<8x512xf32>
    %49 = arith.addf %41, %48 : vector<8x512xf32>
    %c16_i32_19 = arith.constant 16 : i32
    %50 = tpu.dynamic_rotate %45 by %c16_i32_19 dim 1 : vector<8x512xf32>, i32 -> vector<8x512xf32>
    %c8_20 = arith.constant 8 : index
    %c0_21 = arith.constant 0 : index
    %51 = vector.load %arg4[%c8_20, %c0_21] : memref<72x512xf32, #tpu.memory_space<vmem>>, vector<8x512xf32>
    %52 = arith.mulf %51, %50 : vector<8x512xf32>
    %53 = arith.addf %49, %52 : vector<8x512xf32>
    %c15_i32_22 = arith.constant 15 : i32
    %54 = tpu.dynamic_rotate %45 by %c15_i32_22 dim 1 : vector<8x512xf32>, i32 -> vector<8x512xf32>
    %c16_23 = arith.constant 16 : index
    %c0_24 = arith.constant 0 : index
    %55 = vector.load %arg4[%c16_23, %c0_24] : memref<72x512xf32, #tpu.memory_space<vmem>>, vector<8x512xf32>
    %56 = arith.mulf %55, %54 : vector<8x512xf32>
    %57 = arith.addf %53, %56 : vector<8x512xf32>
    %c1_i32_25 = arith.constant 1 : i32
    %58 = tpu.dynamic_rotate %45 by %c1_i32_25 dim 1 : vector<8x512xf32>, i32 -> vector<8x512xf32>
    %c24_26 = arith.constant 24 : index
    %c0_27 = arith.constant 0 : index
    %59 = vector.load %arg4[%c24_26, %c0_27] : memref<72x512xf32, #tpu.memory_space<vmem>>, vector<8x512xf32>
    %60 = arith.mulf %59, %58 : vector<8x512xf32>
    %61 = arith.addf %57, %60 : vector<8x512xf32>
    %c32_28 = arith.constant 32 : index
    %c0_29 = arith.constant 0 : index
    %62 = vector.load %arg4[%c32_28, %c0_29] : memref<72x512xf32, #tpu.memory_space<vmem>>, vector<8x512xf32>
    %63 = arith.mulf %62, %45 : vector<8x512xf32>
    %64 = arith.addf %61, %63 : vector<8x512xf32>
    %c511_i32_30 = arith.constant 511 : i32
    %65 = tpu.dynamic_rotate %45 by %c511_i32_30 dim 1 : vector<8x512xf32>, i32 -> vector<8x512xf32>
    %c40_31 = arith.constant 40 : index
    %c0_32 = arith.constant 0 : index
    %66 = vector.load %arg4[%c40_31, %c0_32] : memref<72x512xf32, #tpu.memory_space<vmem>>, vector<8x512xf32>
    %67 = arith.mulf %66, %65 : vector<8x512xf32>
    %68 = arith.addf %64, %67 : vector<8x512xf32>
    %c497_i32_33 = arith.constant 497 : i32
    %69 = tpu.dynamic_rotate %45 by %c497_i32_33 dim 1 : vector<8x512xf32>, i32 -> vector<8x512xf32>
    %c48_34 = arith.constant 48 : index
    %c0_35 = arith.constant 0 : index
    %70 = vector.load %arg4[%c48_34, %c0_35] : memref<72x512xf32, #tpu.memory_space<vmem>>, vector<8x512xf32>
    %71 = arith.mulf %70, %69 : vector<8x512xf32>
    %72 = arith.addf %68, %71 : vector<8x512xf32>
    %c496_i32_36 = arith.constant 496 : i32
    %73 = tpu.dynamic_rotate %45 by %c496_i32_36 dim 1 : vector<8x512xf32>, i32 -> vector<8x512xf32>
    %c56_37 = arith.constant 56 : index
    %c0_38 = arith.constant 0 : index
    %74 = vector.load %arg4[%c56_37, %c0_38] : memref<72x512xf32, #tpu.memory_space<vmem>>, vector<8x512xf32>
    %75 = arith.mulf %74, %73 : vector<8x512xf32>
    %76 = arith.addf %72, %75 : vector<8x512xf32>
    %c495_i32_39 = arith.constant 495 : i32
    %77 = tpu.dynamic_rotate %45 by %c495_i32_39 dim 1 : vector<8x512xf32>, i32 -> vector<8x512xf32>
    %c64_40 = arith.constant 64 : index
    %c0_41 = arith.constant 0 : index
    %78 = vector.load %arg4[%c64_40, %c0_41] : memref<72x512xf32, #tpu.memory_space<vmem>>, vector<8x512xf32>
    %79 = arith.mulf %78, %77 : vector<8x512xf32>
    %80 = arith.addf %76, %79 : vector<8x512xf32>
    %cst_42 = arith.constant dense<0xFF800000> : vector<512xf32>
    %81 = vector.multi_reduction <maximumf>, %80, %cst_42 [0] : vector<8x512xf32> to vector<512xf32>
    %82 = vector.shape_cast %81 : vector<512xf32> to vector<1x512xf32>
    %83 = vector.shape_cast %82 : vector<1x512xf32> to vector<1x512xf32>
    %84 = vector.broadcast %83 : vector<1x512xf32> to vector<8x512xf32>
    %c17_i32_43 = arith.constant 17 : i32
    %85 = tpu.dynamic_rotate %84 by %c17_i32_43 dim 1 : vector<8x512xf32>, i32 -> vector<8x512xf32>
    %c0_44 = arith.constant 0 : index
    %c0_45 = arith.constant 0 : index
    %86 = vector.load %arg4[%c0_44, %c0_45] : memref<72x512xf32, #tpu.memory_space<vmem>>, vector<8x512xf32>
    %87 = arith.mulf %86, %85 : vector<8x512xf32>
    %88 = arith.addf %41, %87 : vector<8x512xf32>
    %c16_i32_46 = arith.constant 16 : i32
    %89 = tpu.dynamic_rotate %84 by %c16_i32_46 dim 1 : vector<8x512xf32>, i32 -> vector<8x512xf32>
    %c8_47 = arith.constant 8 : index
    %c0_48 = arith.constant 0 : index
    %90 = vector.load %arg4[%c8_47, %c0_48] : memref<72x512xf32, #tpu.memory_space<vmem>>, vector<8x512xf32>
    %91 = arith.mulf %90, %89 : vector<8x512xf32>
    %92 = arith.addf %88, %91 : vector<8x512xf32>
    %c15_i32_49 = arith.constant 15 : i32
    %93 = tpu.dynamic_rotate %84 by %c15_i32_49 dim 1 : vector<8x512xf32>, i32 -> vector<8x512xf32>
    %c16_50 = arith.constant 16 : index
    %c0_51 = arith.constant 0 : index
    %94 = vector.load %arg4[%c16_50, %c0_51] : memref<72x512xf32, #tpu.memory_space<vmem>>, vector<8x512xf32>
    %95 = arith.mulf %94, %93 : vector<8x512xf32>
    %96 = arith.addf %92, %95 : vector<8x512xf32>
    %c1_i32_52 = arith.constant 1 : i32
    %97 = tpu.dynamic_rotate %84 by %c1_i32_52 dim 1 : vector<8x512xf32>, i32 -> vector<8x512xf32>
    %c24_53 = arith.constant 24 : index
    %c0_54 = arith.constant 0 : index
    %98 = vector.load %arg4[%c24_53, %c0_54] : memref<72x512xf32, #tpu.memory_space<vmem>>, vector<8x512xf32>
    %99 = arith.mulf %98, %97 : vector<8x512xf32>
    %100 = arith.addf %96, %99 : vector<8x512xf32>
    %c32_55 = arith.constant 32 : index
    %c0_56 = arith.constant 0 : index
    %101 = vector.load %arg4[%c32_55, %c0_56] : memref<72x512xf32, #tpu.memory_space<vmem>>, vector<8x512xf32>
    %102 = arith.mulf %101, %84 : vector<8x512xf32>
    %103 = arith.addf %100, %102 : vector<8x512xf32>
    %c511_i32_57 = arith.constant 511 : i32
    %104 = tpu.dynamic_rotate %84 by %c511_i32_57 dim 1 : vector<8x512xf32>, i32 -> vector<8x512xf32>
    %c40_58 = arith.constant 40 : index
    %c0_59 = arith.constant 0 : index
    %105 = vector.load %arg4[%c40_58, %c0_59] : memref<72x512xf32, #tpu.memory_space<vmem>>, vector<8x512xf32>
    %106 = arith.mulf %105, %104 : vector<8x512xf32>
    %107 = arith.addf %103, %106 : vector<8x512xf32>
    %c497_i32_60 = arith.constant 497 : i32
    %108 = tpu.dynamic_rotate %84 by %c497_i32_60 dim 1 : vector<8x512xf32>, i32 -> vector<8x512xf32>
    %c48_61 = arith.constant 48 : index
    %c0_62 = arith.constant 0 : index
    %109 = vector.load %arg4[%c48_61, %c0_62] : memref<72x512xf32, #tpu.memory_space<vmem>>, vector<8x512xf32>
    %110 = arith.mulf %109, %108 : vector<8x512xf32>
    %111 = arith.addf %107, %110 : vector<8x512xf32>
    %c496_i32_63 = arith.constant 496 : i32
    %112 = tpu.dynamic_rotate %84 by %c496_i32_63 dim 1 : vector<8x512xf32>, i32 -> vector<8x512xf32>
    %c56_64 = arith.constant 56 : index
    %c0_65 = arith.constant 0 : index
    %113 = vector.load %arg4[%c56_64, %c0_65] : memref<72x512xf32, #tpu.memory_space<vmem>>, vector<8x512xf32>
    %114 = arith.mulf %113, %112 : vector<8x512xf32>
    %115 = arith.addf %111, %114 : vector<8x512xf32>
    %c495_i32_66 = arith.constant 495 : i32
    %116 = tpu.dynamic_rotate %84 by %c495_i32_66 dim 1 : vector<8x512xf32>, i32 -> vector<8x512xf32>
    %c64_67 = arith.constant 64 : index
    %c0_68 = arith.constant 0 : index
    %117 = vector.load %arg4[%c64_67, %c0_68] : memref<72x512xf32, #tpu.memory_space<vmem>>, vector<8x512xf32>
    %118 = arith.mulf %117, %116 : vector<8x512xf32>
    %119 = arith.addf %115, %118 : vector<8x512xf32>
    %cst_69 = arith.constant dense<0xFF800000> : vector<512xf32>
    %120 = vector.multi_reduction <maximumf>, %119, %cst_69 [0] : vector<8x512xf32> to vector<512xf32>
    %121 = vector.shape_cast %120 : vector<512xf32> to vector<1x512xf32>
    %122 = vector.shape_cast %121 : vector<1x512xf32> to vector<1x512xf32>
    %123 = vector.broadcast %122 : vector<1x512xf32> to vector<8x512xf32>
    %c17_i32_70 = arith.constant 17 : i32
    %124 = tpu.dynamic_rotate %123 by %c17_i32_70 dim 1 : vector<8x512xf32>, i32 -> vector<8x512xf32>
    %c0_71 = arith.constant 0 : index
    %c0_72 = arith.constant 0 : index
    %125 = vector.load %arg4[%c0_71, %c0_72] : memref<72x512xf32, #tpu.memory_space<vmem>>, vector<8x512xf32>
    %126 = arith.mulf %125, %124 : vector<8x512xf32>
    %127 = arith.addf %41, %126 : vector<8x512xf32>
    %c16_i32_73 = arith.constant 16 : i32
    %128 = tpu.dynamic_rotate %123 by %c16_i32_73 dim 1 : vector<8x512xf32>, i32 -> vector<8x512xf32>
    %c8_74 = arith.constant 8 : index
    %c0_75 = arith.constant 0 : index
    %129 = vector.load %arg4[%c8_74, %c0_75] : memref<72x512xf32, #tpu.memory_space<vmem>>, vector<8x512xf32>
    %130 = arith.mulf %129, %128 : vector<8x512xf32>
    %131 = arith.addf %127, %130 : vector<8x512xf32>
    %c15_i32_76 = arith.constant 15 : i32
    %132 = tpu.dynamic_rotate %123 by %c15_i32_76 dim 1 : vector<8x512xf32>, i32 -> vector<8x512xf32>
    %c16_77 = arith.constant 16 : index
    %c0_78 = arith.constant 0 : index
    %133 = vector.load %arg4[%c16_77, %c0_78] : memref<72x512xf32, #tpu.memory_space<vmem>>, vector<8x512xf32>
    %134 = arith.mulf %133, %132 : vector<8x512xf32>
    %135 = arith.addf %131, %134 : vector<8x512xf32>
    %c1_i32_79 = arith.constant 1 : i32
    %136 = tpu.dynamic_rotate %123 by %c1_i32_79 dim 1 : vector<8x512xf32>, i32 -> vector<8x512xf32>
    %c24_80 = arith.constant 24 : index
    %c0_81 = arith.constant 0 : index
    %137 = vector.load %arg4[%c24_80, %c0_81] : memref<72x512xf32, #tpu.memory_space<vmem>>, vector<8x512xf32>
    %138 = arith.mulf %137, %136 : vector<8x512xf32>
    %139 = arith.addf %135, %138 : vector<8x512xf32>
    %c32_82 = arith.constant 32 : index
    %c0_83 = arith.constant 0 : index
    %140 = vector.load %arg4[%c32_82, %c0_83] : memref<72x512xf32, #tpu.memory_space<vmem>>, vector<8x512xf32>
    %141 = arith.mulf %140, %123 : vector<8x512xf32>
    %142 = arith.addf %139, %141 : vector<8x512xf32>
    %c511_i32_84 = arith.constant 511 : i32
    %143 = tpu.dynamic_rotate %123 by %c511_i32_84 dim 1 : vector<8x512xf32>, i32 -> vector<8x512xf32>
    %c40_85 = arith.constant 40 : index
    %c0_86 = arith.constant 0 : index
    %144 = vector.load %arg4[%c40_85, %c0_86] : memref<72x512xf32, #tpu.memory_space<vmem>>, vector<8x512xf32>
    %145 = arith.mulf %144, %143 : vector<8x512xf32>
    %146 = arith.addf %142, %145 : vector<8x512xf32>
    %c497_i32_87 = arith.constant 497 : i32
    %147 = tpu.dynamic_rotate %123 by %c497_i32_87 dim 1 : vector<8x512xf32>, i32 -> vector<8x512xf32>
    %c48_88 = arith.constant 48 : index
    %c0_89 = arith.constant 0 : index
    %148 = vector.load %arg4[%c48_88, %c0_89] : memref<72x512xf32, #tpu.memory_space<vmem>>, vector<8x512xf32>
    %149 = arith.mulf %148, %147 : vector<8x512xf32>
    %150 = arith.addf %146, %149 : vector<8x512xf32>
    %c496_i32_90 = arith.constant 496 : i32
    %151 = tpu.dynamic_rotate %123 by %c496_i32_90 dim 1 : vector<8x512xf32>, i32 -> vector<8x512xf32>
    %c56_91 = arith.constant 56 : index
    %c0_92 = arith.constant 0 : index
    %152 = vector.load %arg4[%c56_91, %c0_92] : memref<72x512xf32, #tpu.memory_space<vmem>>, vector<8x512xf32>
    %153 = arith.mulf %152, %151 : vector<8x512xf32>
    %154 = arith.addf %150, %153 : vector<8x512xf32>
    %c495_i32_93 = arith.constant 495 : i32
    %155 = tpu.dynamic_rotate %123 by %c495_i32_93 dim 1 : vector<8x512xf32>, i32 -> vector<8x512xf32>
    %c64_94 = arith.constant 64 : index
    %c0_95 = arith.constant 0 : index
    %156 = vector.load %arg4[%c64_94, %c0_95] : memref<72x512xf32, #tpu.memory_space<vmem>>, vector<8x512xf32>
    %157 = arith.mulf %156, %155 : vector<8x512xf32>
    %158 = arith.addf %154, %157 : vector<8x512xf32>
    %cst_96 = arith.constant dense<0xFF800000> : vector<512xf32>
    %159 = vector.multi_reduction <maximumf>, %158, %cst_96 [0] : vector<8x512xf32> to vector<512xf32>
    %160 = vector.shape_cast %159 : vector<512xf32> to vector<1x512xf32>
    %161 = vector.shape_cast %160 : vector<1x512xf32> to vector<1x512xf32>
    %162 = vector.broadcast %161 : vector<1x512xf32> to vector<8x512xf32>
    %c17_i32_97 = arith.constant 17 : i32
    %163 = tpu.dynamic_rotate %162 by %c17_i32_97 dim 1 : vector<8x512xf32>, i32 -> vector<8x512xf32>
    %c0_98 = arith.constant 0 : index
    %c0_99 = arith.constant 0 : index
    %164 = vector.load %arg4[%c0_98, %c0_99] : memref<72x512xf32, #tpu.memory_space<vmem>>, vector<8x512xf32>
    %165 = arith.mulf %164, %163 : vector<8x512xf32>
    %166 = arith.addf %41, %165 : vector<8x512xf32>
    %c16_i32_100 = arith.constant 16 : i32
    %167 = tpu.dynamic_rotate %162 by %c16_i32_100 dim 1 : vector<8x512xf32>, i32 -> vector<8x512xf32>
    %c8_101 = arith.constant 8 : index
    %c0_102 = arith.constant 0 : index
    %168 = vector.load %arg4[%c8_101, %c0_102] : memref<72x512xf32, #tpu.memory_space<vmem>>, vector<8x512xf32>
    %169 = arith.mulf %168, %167 : vector<8x512xf32>
    %170 = arith.addf %166, %169 : vector<8x512xf32>
    %c15_i32_103 = arith.constant 15 : i32
    %171 = tpu.dynamic_rotate %162 by %c15_i32_103 dim 1 : vector<8x512xf32>, i32 -> vector<8x512xf32>
    %c16_104 = arith.constant 16 : index
    %c0_105 = arith.constant 0 : index
    %172 = vector.load %arg4[%c16_104, %c0_105] : memref<72x512xf32, #tpu.memory_space<vmem>>, vector<8x512xf32>
    %173 = arith.mulf %172, %171 : vector<8x512xf32>
    %174 = arith.addf %170, %173 : vector<8x512xf32>
    %c1_i32_106 = arith.constant 1 : i32
    %175 = tpu.dynamic_rotate %162 by %c1_i32_106 dim 1 : vector<8x512xf32>, i32 -> vector<8x512xf32>
    %c24_107 = arith.constant 24 : index
    %c0_108 = arith.constant 0 : index
    %176 = vector.load %arg4[%c24_107, %c0_108] : memref<72x512xf32, #tpu.memory_space<vmem>>, vector<8x512xf32>
    %177 = arith.mulf %176, %175 : vector<8x512xf32>
    %178 = arith.addf %174, %177 : vector<8x512xf32>
    %c32_109 = arith.constant 32 : index
    %c0_110 = arith.constant 0 : index
    %179 = vector.load %arg4[%c32_109, %c0_110] : memref<72x512xf32, #tpu.memory_space<vmem>>, vector<8x512xf32>
    %180 = arith.mulf %179, %162 : vector<8x512xf32>
    %181 = arith.addf %178, %180 : vector<8x512xf32>
    %c511_i32_111 = arith.constant 511 : i32
    %182 = tpu.dynamic_rotate %162 by %c511_i32_111 dim 1 : vector<8x512xf32>, i32 -> vector<8x512xf32>
    %c40_112 = arith.constant 40 : index
    %c0_113 = arith.constant 0 : index
    %183 = vector.load %arg4[%c40_112, %c0_113] : memref<72x512xf32, #tpu.memory_space<vmem>>, vector<8x512xf32>
    %184 = arith.mulf %183, %182 : vector<8x512xf32>
    %185 = arith.addf %181, %184 : vector<8x512xf32>
    %c497_i32_114 = arith.constant 497 : i32
    %186 = tpu.dynamic_rotate %162 by %c497_i32_114 dim 1 : vector<8x512xf32>, i32 -> vector<8x512xf32>
    %c48_115 = arith.constant 48 : index
    %c0_116 = arith.constant 0 : index
    %187 = vector.load %arg4[%c48_115, %c0_116] : memref<72x512xf32, #tpu.memory_space<vmem>>, vector<8x512xf32>
    %188 = arith.mulf %187, %186 : vector<8x512xf32>
    %189 = arith.addf %185, %188 : vector<8x512xf32>
    %c496_i32_117 = arith.constant 496 : i32
    %190 = tpu.dynamic_rotate %162 by %c496_i32_117 dim 1 : vector<8x512xf32>, i32 -> vector<8x512xf32>
    %c56_118 = arith.constant 56 : index
    %c0_119 = arith.constant 0 : index
    %191 = vector.load %arg4[%c56_118, %c0_119] : memref<72x512xf32, #tpu.memory_space<vmem>>, vector<8x512xf32>
    %192 = arith.mulf %191, %190 : vector<8x512xf32>
    %193 = arith.addf %189, %192 : vector<8x512xf32>
    %c495_i32_120 = arith.constant 495 : i32
    %194 = tpu.dynamic_rotate %162 by %c495_i32_120 dim 1 : vector<8x512xf32>, i32 -> vector<8x512xf32>
    %c64_121 = arith.constant 64 : index
    %c0_122 = arith.constant 0 : index
    %195 = vector.load %arg4[%c64_121, %c0_122] : memref<72x512xf32, #tpu.memory_space<vmem>>, vector<8x512xf32>
    %196 = arith.mulf %195, %194 : vector<8x512xf32>
    %197 = arith.addf %193, %196 : vector<8x512xf32>
    %cst_123 = arith.constant dense<0xFF800000> : vector<512xf32>
    %198 = vector.multi_reduction <maximumf>, %197, %cst_123 [0] : vector<8x512xf32> to vector<512xf32>
    %199 = vector.shape_cast %198 : vector<512xf32> to vector<1x512xf32>
    %200 = vector.shape_cast %199 : vector<1x512xf32> to vector<1x512xf32>
    %201 = vector.broadcast %200 : vector<1x512xf32> to vector<8x512xf32>
    %c17_i32_124 = arith.constant 17 : i32
    %202 = tpu.dynamic_rotate %201 by %c17_i32_124 dim 1 : vector<8x512xf32>, i32 -> vector<8x512xf32>
    %c0_125 = arith.constant 0 : index
    %c0_126 = arith.constant 0 : index
    %203 = vector.load %arg4[%c0_125, %c0_126] : memref<72x512xf32, #tpu.memory_space<vmem>>, vector<8x512xf32>
    %204 = arith.mulf %203, %202 : vector<8x512xf32>
    %205 = arith.addf %41, %204 : vector<8x512xf32>
    %c16_i32_127 = arith.constant 16 : i32
    %206 = tpu.dynamic_rotate %201 by %c16_i32_127 dim 1 : vector<8x512xf32>, i32 -> vector<8x512xf32>
    %c8_128 = arith.constant 8 : index
    %c0_129 = arith.constant 0 : index
    %207 = vector.load %arg4[%c8_128, %c0_129] : memref<72x512xf32, #tpu.memory_space<vmem>>, vector<8x512xf32>
    %208 = arith.mulf %207, %206 : vector<8x512xf32>
    %209 = arith.addf %205, %208 : vector<8x512xf32>
    %c15_i32_130 = arith.constant 15 : i32
    %210 = tpu.dynamic_rotate %201 by %c15_i32_130 dim 1 : vector<8x512xf32>, i32 -> vector<8x512xf32>
    %c16_131 = arith.constant 16 : index
    %c0_132 = arith.constant 0 : index
    %211 = vector.load %arg4[%c16_131, %c0_132] : memref<72x512xf32, #tpu.memory_space<vmem>>, vector<8x512xf32>
    %212 = arith.mulf %211, %210 : vector<8x512xf32>
    %213 = arith.addf %209, %212 : vector<8x512xf32>
    %c1_i32_133 = arith.constant 1 : i32
    %214 = tpu.dynamic_rotate %201 by %c1_i32_133 dim 1 : vector<8x512xf32>, i32 -> vector<8x512xf32>
    %c24_134 = arith.constant 24 : index
    %c0_135 = arith.constant 0 : index
    %215 = vector.load %arg4[%c24_134, %c0_135] : memref<72x512xf32, #tpu.memory_space<vmem>>, vector<8x512xf32>
    %216 = arith.mulf %215, %214 : vector<8x512xf32>
    %217 = arith.addf %213, %216 : vector<8x512xf32>
    %c32_136 = arith.constant 32 : index
    %c0_137 = arith.constant 0 : index
    %218 = vector.load %arg4[%c32_136, %c0_137] : memref<72x512xf32, #tpu.memory_space<vmem>>, vector<8x512xf32>
    %219 = arith.mulf %218, %201 : vector<8x512xf32>
    %220 = arith.addf %217, %219 : vector<8x512xf32>
    %c511_i32_138 = arith.constant 511 : i32
    %221 = tpu.dynamic_rotate %201 by %c511_i32_138 dim 1 : vector<8x512xf32>, i32 -> vector<8x512xf32>
    %c40_139 = arith.constant 40 : index
    %c0_140 = arith.constant 0 : index
    %222 = vector.load %arg4[%c40_139, %c0_140] : memref<72x512xf32, #tpu.memory_space<vmem>>, vector<8x512xf32>
    %223 = arith.mulf %222, %221 : vector<8x512xf32>
    %224 = arith.addf %220, %223 : vector<8x512xf32>
    %c497_i32_141 = arith.constant 497 : i32
    %225 = tpu.dynamic_rotate %201 by %c497_i32_141 dim 1 : vector<8x512xf32>, i32 -> vector<8x512xf32>
    %c48_142 = arith.constant 48 : index
    %c0_143 = arith.constant 0 : index
    %226 = vector.load %arg4[%c48_142, %c0_143] : memref<72x512xf32, #tpu.memory_space<vmem>>, vector<8x512xf32>
    %227 = arith.mulf %226, %225 : vector<8x512xf32>
    %228 = arith.addf %224, %227 : vector<8x512xf32>
    %c496_i32_144 = arith.constant 496 : i32
    %229 = tpu.dynamic_rotate %201 by %c496_i32_144 dim 1 : vector<8x512xf32>, i32 -> vector<8x512xf32>
    %c56_145 = arith.constant 56 : index
    %c0_146 = arith.constant 0 : index
    %230 = vector.load %arg4[%c56_145, %c0_146] : memref<72x512xf32, #tpu.memory_space<vmem>>, vector<8x512xf32>
    %231 = arith.mulf %230, %229 : vector<8x512xf32>
    %232 = arith.addf %228, %231 : vector<8x512xf32>
    %c495_i32_147 = arith.constant 495 : i32
    %233 = tpu.dynamic_rotate %201 by %c495_i32_147 dim 1 : vector<8x512xf32>, i32 -> vector<8x512xf32>
    %c64_148 = arith.constant 64 : index
    %c0_149 = arith.constant 0 : index
    %234 = vector.load %arg4[%c64_148, %c0_149] : memref<72x512xf32, #tpu.memory_space<vmem>>, vector<8x512xf32>
    %235 = arith.mulf %234, %233 : vector<8x512xf32>
    %236 = arith.addf %232, %235 : vector<8x512xf32>
    %237 = tpu.iota {dimensions = array<i32: 1>} : vector<8x512xi32>
    %c0_150 = arith.constant 0 : index
    %c0_151 = arith.constant 0 : index
    %238 = vector.load %arg6[%c0_150, %c0_151] : memref<8x1xi32, #tpu.memory_space<vmem>>, vector<8x1xi32>
    %239 = vector.broadcast %238 : vector<8x1xi32> to vector<8x512xi32>
    %240 = arith.cmpi eq, %237, %239 : vector<8x512xi32>
    %241 = arith.extui %240 : vector<8x512xi1> to vector<8x512xi32>
    %242 = arith.sitofp %241 : vector<8x512xi32> to vector<8x512xf32>
    %cst_152 = arith.constant dense<0.000000e+00> : vector<8x8xf32>
    %243 = tpu.matmul %242, %236, %cst_152 {dimension_numbers = #tpu.dot_dimension_numbers<[1], [1], [0], [0], [0, 0, 1, 0], [], []>, precision = #tpu.contract_precision<fp32>} : vector<8x512xf32>, vector<8x512xf32>, vector<8x8xf32> -> vector<8x8xf32>
    %c0_153 = arith.constant 0 : index
    %c0_154 = arith.constant 0 : index
    %244 = vector.load %arg5[%c0_153, %c0_154] : memref<8x8xf32, #tpu.memory_space<vmem>>, vector<8x8xf32>
    %cst_155 = arith.constant dense<0.000000e+00> : vector<8x8xf32>
    %245 = tpu.matmul %243, %244, %cst_155 {dimension_numbers = #tpu.dot_dimension_numbers<[1], [0], [0], [1], [0, 0, 1, 1], [], []>, precision = #tpu.contract_precision<fp32>} : vector<8x8xf32>, vector<8x8xf32>, vector<8x8xf32> -> vector<8x8xf32>
    %c0_156 = arith.constant 0 : index
    %c0_157 = arith.constant 0 : index
    %246 = vector.load %arg7[%c0_156, %c0_157] : memref<8x8xf32, #tpu.memory_space<vmem>>, vector<8x8xf32>
    tpu.vector_store %arg7[%c0_156, %c0_157], %245 {strides = array<i32>} : memref<8x8xf32, #tpu.memory_space<vmem>>, vector<8x8xf32>,
    %cst_158 = arith.constant dense<0xFF800000> : vector<8xf32>
    %247 = vector.multi_reduction <maximumf>, %245, %cst_158 [1] : vector<8x8xf32> to vector<8xf32>
    %248 = vector.shape_cast %247 : vector<8xf32> to vector<8x1xf32>
    %249 = vector.broadcast %248 : vector<8x1xf32> to vector<8x8xf32>
    %250 = arith.subf %245, %249 : vector<8x8xf32>
    %251 = math.exp %250 : vector<8x8xf32>
    %cst_159 = arith.constant dense<0.000000e+00> : vector<8xf32>
    %252 = vector.multi_reduction <add>, %251, %cst_159 [1] : vector<8x8xf32> to vector<8xf32>
    %253 = vector.shape_cast %252 : vector<8xf32> to vector<8x1xf32>
    %254 = vector.broadcast %253 : vector<8x1xf32> to vector<8x8xf32>
    %255 = arith.divf %251, %254 : vector<8x8xf32>
    %c0_160 = arith.constant 0 : index
    %c0_161 = arith.constant 0 : index
    %256 = vector.load %arg8[%c0_160, %c0_161] : memref<8x8xf32, #tpu.memory_space<vmem>>, vector<8x8xf32>
    tpu.vector_store %arg8[%c0_160, %c0_161], %255 {strides = array<i32>} : memref<8x8xf32, #tpu.memory_space<vmem>>, vector<8x8xf32>,
    return
  }
}

</mosaic_0001>

<bundles_post_ra>
// kernel: vin_forward.1
= control target key start
LH: loop header
LB: loop body
LE: loop exit
PB: predicated region body
PF: predicated region fallthrough
CT: control target
= control target key end

     0   :  { %s6583_s0 = inlined_call_operand.vmem [shape: f32[36,512], index: 0, kind: input, shape index: {}]   ;;  %s6584_s1 = inlined_call_operand.vmem [shape: f32[1,36], index: 1, kind: input, shape index: {}]   ;;  %s6585_s2 = inlined_call_operand.<no memory space> [shape: f32[1,1], index: 2, kind: input, shape index: {}]   ;;  %s6586_s3 = inlined_call_operand.vmem [shape: f32[72,512], index: 3, kind: input, shape index: {}]   ;;  %s6587_s4 = inlined_call_operand.vmem [shape: f32[72,512], index: 4, kind: input, shape index: {}]   ;;  %s6588_s5 = inlined_call_operand.vmem [shape: f32[8,8], index: 5, kind: input, shape index: {}]   ;;  %s6589_s6 = inlined_call_operand.vmem [shape: s32[8,1], index: 6, kind: input, shape index: {}]   ;;  %s6590_s7 = inlined_call_operand.hbm [shape: f32[8,8], index: 7, kind: output, shape index: {0}]   ;;  %s6591_s8 = inlined_call_operand.hbm [shape: f32[8,8], index: 8, kind: output, shape index: {1}]  }
   0x1   :  { %v14_v0 = vstv %s6585_s2 }
   0x2   :  { %15 = vst [vmem:[#allocation2] sm:$0x1] %v14_v0 }
   0x3   :  { %16 = vsyncpa [#allocation4], 0  ;;  %v34_v1 = vld [vmem:[%s6583_s0 + $0x8] sm:$0xff]  ;;  %v33_v3 = vld [vmem:[%s6583_s0] sm:$0xff]  ;;  %v6600_v10 = vmov 0.0   ;;  %vm67_vm0 = vcmask 1043456  }
   0x4   :  { %v38_v2 = vld [vmem:[%s6583_s0 + $0x28] sm:$0xff]  ;;  %v80_v4 = vand.u32 4294901760, %v34_v1  ;;  %v37_v6 = vld [vmem:[%s6583_s0 + $0x20] sm:$0xff]  ;;  %v82_v7 = vand.u32 4294901760, %v33_v3  ;;  %154 = vmatprep.mubr.f32.mxu1 %v6600_v10  ;;  %280 = vmatprep.mubr.f32.mxu0 %v6600_v10  ;;  %vm63_vm1 = vcmask 293888   ;;  %v36_v29 = vld [vmem:[%s6583_s0 + $0x18] sm:$0xff] }
   0x5   :  { %v84_v5 = vand.u32 4294901760, %v38_v2  ;;  %v42_v8 = vld [vmem:[%s6583_s0 + $0x48] sm:$0xff]  ;;  %v86_v11 = vand.u32 4294901760, %v37_v6  ;;  %v41_v14 = vld [vmem:[%s6583_s0 + $0x40] sm:$0xff]  ;;  %v40_v30 = vld [vmem:[%s6583_s0 + $0x38] sm:$0xff]  ;;  %v649_v43 = vand.u32 4294901760, %v36_v29 }
   0x6   :  { %v46_v9 = vld [vmem:[%s6583_s0 + $0x68] sm:$0xff]  ;;  %v88_v12 = vand.u32 4294901760, %v42_v8  ;;  %v45_v15 = vld [vmem:[%s6583_s0 + $0x60] sm:$0xff]  ;;  %v4299_v17 = vsub.f32 %v33_v3, %v82_v7  ;;  %v90_v18 = vand.u32 4294901760, %v41_v14  ;;  %v4332_v32 = vsub.f32 %v34_v1, %v80_v4  ;;  %v35_v40 = vld [vmem:[%s6583_s0 + $0x10] sm:$0xff] }
   0x7   :  { %v92_v13 = vand.u32 4294901760, %v46_v9  ;;  %v4297_v16 = vpack.c.bf16 %v84_v5, %v80_v4  ;;  %v94_v19 = vand.u32 4294901760, %v45_v15  ;;  %v50_v20 = vld [vmem:[%s6583_s0 + $0x88] sm:$0xf]  ;;  %v49_v21 = vld [vmem:[%s6583_s0 + $0x80] sm:$0xf]  ;;  %v4307_v22 = vpack.c.bf16 %v86_v11, %v82_v7 }
   0x8   :  { %v4309_v23 = vsub.f32 %v37_v6, %v86_v11  ;;  %v4314_v25 = vsub.f32 %v42_v8, %v88_v12  ;;  %v4320_v28 = vsub.f32 %v41_v14, %v90_v18  ;;  %v4330_v31 = vsel %vm67_vm0, %v50_v20, 0  ;;  %v32_v35 = vld [vmem:[%s6584_s1] sm:$0x1]  ;;  %v39_v49 = vld [vmem:[%s6583_s0 + $0x30] sm:$0xff] }
   0x9   :  { %v4311_v24 = vpack.c.bf16 %v92_v13, %v88_v12  ;;  %3954 = vmatprep.subr.bf16.mxu1 %v4297_v16  ;;  %v4316_v26 = vsub.f32 %v46_v9, %v92_v13  ;;  %v4318_v27 = vpack.c.bf16 %v94_v19, %v90_v18  ;;  %v4334_v33 = vsub.f32 %v38_v2, %v84_v5 }
   0xa   :  { %3956 = vmatpush1.bf16.msra.mxu1 %v4307_v22  ;;  %v4337_v34 = vsel %vm67_vm0, %v49_v21, 0  ;;  %v4343_v36 = vsub.f32 %v45_v15, %v94_v19  ;;  %v4346_v37 = vand.u32 4294901760, %v4330_v31  ;;  %v174_v38 = vand.u32 4294901760, %v4299_v17 }
   0xb   :  { %3958 = vmatprep.subr.bf16.mxu1 %v4311_v24  ;;  %v186_v39 = vand.u32 4294901760, %v4309_v23  ;;  %v168_v41 = vand.u32 4294901760, %v4332_v32  ;;  %v180_v42 = vand.u32 4294901760, %v4334_v33  ;;  %v653_v44 = vand.u32 4294901760, %v40_v30 }
   0xc   :  { %v4356_v45 = vand.u32 4294901760, %v4337_v34  ;;  %v175_v46 = vsub.f32 %v4299_v17, %v174_v38  ;;  %v65_v48 = vsel %vm63_vm1, %v32_v35, 0 }
   0xd   :  { %v187_v47 = vsub.f32 %v4309_v23, %v186_v39 }
   0xe   :  { %17 = vsyncpa [#allocation6], 0  ;;  %3960 = vmatpush1.bf16.msra.mxu1 %v4318_v27  ;;  %v169_v50 = vsub.f32 %v4332_v32, %v168_v41  ;;  %v181_v51 = vsub.f32 %v4334_v33, %v180_v42  ;;  %v4375_v52 = vpack.c.bf16 %v653_v44, %v649_v43  ;;  %v651_v53 = vand.u32 4294901760, %v35_v40  ;;  %v44_v2 = vld [vmem:[%s6583_s0 + $0x58] sm:$0xff]  ;;  %v43_v4 = vld [vmem:[%s6583_s0 + $0x50] sm:$0xff]  ;;  %s4212_s24 = smov 17  }
   0xf   :  { %97 = vmatprep.subr.mxu1 %v4346_v37  ;;  %v176_v54 = vand.u32 4294901760, %v175_v46  ;;  %v188_v55 = vand.u32 4294901760, %v187_v47  ;;  %v4378_v56 = vsub.f32 %v36_v29, %v649_v43  ;;  %v4380_v57 = vand.u32 4294901760, %v65_v48  ;;  %v48_v3 = vld [vmem:[%s6583_s0 + $0x78] sm:$0xff]  ;;  %v47_v19 = vld [vmem:[%s6583_s0 + $0x70] sm:$0xff]  ;;  %s4213_s25 = smov 15  }
  0x10   :  { %v170_v58 = vand.u32 4294901760, %v169_v50  ;;  %v182_v59 = vand.u32 4294901760, %v181_v51  ;;  %v4382_v60 = vsub.f32 %v40_v30, %v653_v44  ;;  %v655_v61 = vand.u32 4294901760, %v39_v49  ;;  %v52_v47 = vld [vmem:[%s6583_s0 + $0x98] sm:$0xf]  ;;  %s4214_s26 = smov 1  }
  0x11   :  { %v3963_v62 = vpack.c.bf16 %v188_v55, %v176_v54  ;;  %v4385_v63 = vsub.f32 %v65_v48, %v4380_v57  ;;  %v192_v0 = vand.u32 4294901760, %v4314_v25  ;;  %v204_v1 = vand.u32 4294901760, %v4316_v26  ;;  %s4215_s27 = smov 127   ;;  %s4216_s28 = smov 113  }
  0x12   :  { %v3961_v5 = vpack.c.bf16 %v182_v59, %v170_v58  ;;  %99 = vmatpush1.msra.mxu1 %v4356_v45  ;;  %v4399_v6 = vpack.c.bf16 %v655_v61, %v651_v53  ;;  %v4401_v7 = vsub.f32 %v35_v40, %v651_v53  ;;  %v198_v8 = vand.u32 4294901760, %v4320_v28  ;;  %v51_v59 = vld [vmem:[%s6583_s0 + $0x90] sm:$0xf]  ;;  %s4211_s0 = smov 16   ;;  %s4217_s29 = smov 112  }
  0x13   :  { %4002 = vmatprep.subr.bf16.mxu1 %v4375_v52  ;;  %v4406_v9 = vand.u32 4294901760, %v4385_v63  ;;  %v193_v11 = vsub.f32 %v4314_v25, %v192_v0  ;;  %v205_v12 = vsub.f32 %v4316_v26, %v204_v1  ;;  %v210_v13 = vand.u32 4294901760, %v4343_v36  ;;  %s4218_s30 = smov 111  }
  0x14   :  { %3962 = vmatprep.subr.bf16.mxu0 %v3961_v5  ;;  %v199_v14 = vsub.f32 %v4320_v28, %v198_v8  ;;  %v657_v15 = vand.u32 4294901760, %v44_v2  ;;  %v661_v18 = vand.u32 4294901760, %v48_v3  ;;  %v659_v20 = vand.u32 4294901760, %v43_v4 }
  0x15   :  { %3964 = vmatpush1.bf16.msra.mxu0 %v3963_v62  ;;  %v158_v21 = vsub.f32 %v4385_v63, %v4406_v9  ;;  %v194_v29 = vand.u32 4294901760, %v193_v11  ;;  %v206_v30 = vand.u32 4294901760, %v205_v12  ;;  %v211_v35 = vsub.f32 %v4343_v36, %v210_v13 }
  0x16   :  { %v4426_v40 = vsub.f32 %v39_v49, %v655_v61  ;;  %v200_v43 = vand.u32 4294901760, %v199_v14  ;;  %v4428_v44 = vpack.c.bf16 %v661_v18, %v657_v15  ;;  %v4430_v46 = vsub.f32 %v44_v2, %v657_v15 }
  0x17   :  { %v4435_v48 = vand.u32 4294901760, %v158_v21  ;;  %v3965_v50 = vpack.c.bf16 %v206_v30, %v194_v29  ;;  %v212_v51 = vand.u32 4294901760, %v211_v35  ;;  %v663_v53 = vand.u32 4294901760, %v47_v19 }
  0x18   :  { %v4437_v54 = vsub.f32 %v48_v3, %v661_v18  ;;  %v4439_v55 = vsub.f32 %v43_v4, %v659_v20  ;;  %v4443_v49 = vsub.f32 %v4330_v31, %v4346_v37  ;;  %v4447_v58 = vsub.f32 %v4337_v34, %v4356_v45 }
  0x19   :  { %160 = vmatmul.mubr.f32.vlgmr.msra.gmra.mrb[0].mxu1 %v4435_v48  ;;  %3966 = vmatprep.subr.bf16.mxu0 %v3965_v50  ;;  %v3967_v61 = vpack.c.bf16 %v212_v51, %v200_v43  ;;  %v4453_v62 = vpack.c.bf16 %v663_v53, %v659_v20  ;;  %v3969_v2 = vpack.c.bf16 %v4334_v33, %v4332_v32  ;;  %v78_v31 = vsel %vm67_vm0, %v52_v47, 0 }
  0x1a   :  { %4004 = vmatpush1.bf16.msra.mxu1 %v4399_v6  ;;  %v4459_v3 = vsub.f32 %v47_v19, %v663_v53  ;;  %v6597_v34 = vand.u32 4294901760, %v4443_v49  ;;  %v6592_v4 = vand.u32 4294901760, %v4447_v58  ;;  %v4463_v5 = vand.u32 4294901760, %v78_v31  ;;  %723 = vmatprep.mubr.f32.mxu1 %v6600_v10 }
  0x1b   :  { %3968 = vmatpush1.bf16.msra.mxu0 %v3967_v61  ;;  %4006 = vmatprep.subr.bf16.mxu1 %v4428_v44  ;;  %v75_v11 = vsel %vm67_vm0, %v51_v59, 0  ;;  %v6595_v12 = vand.u32 4294901760, %v4378_v56  ;;  %v6593_v14 = vand.u32 4294901760, %v4382_v60  ;;  %v6594_v15 = vand.u32 4294901760, %v4401_v7 }
  0x1c   :  { %v217_v18 = vsub.f32 %v4443_v49, %v6597_v34  ;;  %v223_v19 = vsub.f32 %v4447_v58, %v6592_v4  ;;  %v4477_v20 = vand.u32 4294901760, %v75_v11  ;;  %v6596_v21 = vand.u32 4294901760, %v4426_v40 }
  0x1d   :  { %v3971_v29 = vpack.c.bf16 %v4309_v23, %v4299_v17  ;;  %v738_v30 = vsub.f32 %v4378_v56, %v6595_v12  ;;  %v750_v35 = vsub.f32 %v4382_v60, %v6593_v14  ;;  %v744_v43 = vsub.f32 %v4401_v7, %v6594_v15 }
  0x1e   :  { %4008 = vmatpush1.bf16.msra.mxu1 %v4453_v62  ;;  %v218_v47 = vand.u32 4294901760, %v217_v18  ;;  %v224_v50 = vand.u32 4294901760, %v223_v19  ;;  %v4493_v51 = vsub.f32 %v75_v11, %v4477_v20  ;;  %v756_v53 = vsub.f32 %v4426_v40, %v6596_v21 }
  0x1f   :  { %666 = vmatprep.subr.mxu1 %v4463_v5  ;;  %v739_v59 = vand.u32 4294901760, %v738_v30  ;;  %v751_v61 = vand.u32 4294901760, %v750_v35  ;;  %v745_v4 = vand.u32 4294901760, %v744_v43  ;;  %v3973_v14 = vpack.c.bf16 %v4316_v26, %v4314_v25 }
  0x20   :  { %219 = vmatprep.subr.mxu0 %v218_v47  ;;  %v757_v15 = vand.u32 4294901760, %v756_v53  ;;  %v761_v18 = vand.u32 4294901760, %v4430_v46  ;;  %v773_v19 = vand.u32 4294901760, %v4437_v54  ;;  %v6598_v11 = vand.u32 4294901760, %v4439_v55 }
  0x21   :  { %225 = vmatpush1.msra.mxu0 %v224_v50  ;;  %v4009_v12 = vpack.c.bf16 %v751_v61, %v739_v59  ;;  %v6599_v21 = vand.u32 4294901760, %v4459_v3  ;;  %v4506_v34 = vsub.f32 %v78_v31, %v4463_v5  ;;  %v791_v30 = vand.u32 4294901760, %v4493_v51 }
  0x22   :  { %3970 = vmatprep.subr.bf16.mxu0 %v3969_v2  ;;  %282 = vmatmul.mubr.f32.vlgmr.msra.gmra.mrb[0].mxu0 %v4380_v57  ;;  %v4011_v35 = vpack.c.bf16 %v757_v15, %v745_v4  ;;  %v762_v43 = vsub.f32 %v4430_v46, %v761_v18  ;;  %v774_v47 = vsub.f32 %v4437_v54, %v773_v19  ;;  %v6646_v23 = vand.u32 4294901760, %v4443_v49 }
  0x23   :  { %3972 = vmatpush1.bf16.msra.mxu0 %v3971_v29  ;;  %668 = vmatpush1.msra.mxu1 %v4477_v20  ;;  %v3975_v31 = vpack.c.bf16 %v4343_v36, %v4320_v28  ;;  %v768_v2 = vsub.f32 %v4439_v55, %v6598_v11  ;;  %v780_v4 = vsub.f32 %v4459_v3, %v6599_v21  ;;  %v785_v15 = vand.u32 4294901760, %v4506_v34 }
  0x24   :  { %4010 = vmatprep.subr.bf16.mxu1 %v4009_v12  ;;  %729 = vmatmul.mubr.f32.vlgmr.msra.gmra.mrb[2].mxu1 %v4435_v48  ;;  %v763_v50 = vand.u32 4294901760, %v762_v43  ;;  %v775_v29 = vand.u32 4294901760, %v774_v47  ;;  %v792_v11 = vsub.f32 %v4493_v51, %v791_v30  ;;  %v53_v48 = vld [vmem:[#allocation2] sm:$0x1]  ;;  %v4017_v47 = vpack.c.bf16 %v4382_v60, %v4378_v56 }
  0x25   :  { %4012 = vmatpush1.bf16.msra.mxu1 %v4011_v35  ;;  %3974 = vmatprep.subr.bf16.mxu0 %v3973_v14  ;;  %v769_v53 = vand.u32 4294901760, %v768_v2  ;;  %v781_v59 = vand.u32 4294901760, %v780_v4  ;;  %v786_v61 = vsub.f32 %v4506_v34, %v785_v15  ;;  %v4210_v14 = vmov 0  }
  0x26   :  { %v4013_v21 = vpack.c.bf16 %v775_v29, %v763_v50  ;;  %372 = vmatprep.mubr.f32.mxu0 %v6600_v10  ;;  %849 = vmatprep.mubr.f32.mxu1 %v6600_v10  ;;  %v793_v43 = vand.u32 4294901760, %v792_v11  ;;  %v4023_v11 = vpack.c.bf16 %v4459_v3, %v4439_v55  ;;  %v3985_v2 = vpack.c.bf16 %v180_v42, %v168_v41 }
  0x27   :  { %3976 = vmatpush1.bf16.msra.mxu0 %v3975_v31  ;;  %v4015_v12 = vpack.c.bf16 %v781_v59, %v769_v53  ;;  %v787_v35 = vand.u32 4294901760, %v786_v61  ;;  %4119 = vset.pattern.permute.xlu0 %v4210_v14  ;;  %v4019_v31 = vpack.c.bf16 %v4426_v40, %v4401_v7  ;;  %v3987_v4 = vpack.c.bf16 %v186_v39, %v174_v38 }
  0x28   :  { %4014 = vmatprep.subr.bf16.mxu1 %v4013_v21  ;;  %314 = vmatprep.subr.mxu0 %v4443_v49  ;;  %v4021_v21 = vpack.c.bf16 %v4437_v54, %v4430_v46  ;;  %v3989_v50 = vpack.c.bf16 %v204_v1, %v192_v0  ;;  %v3991_v17 = vpack.c.bf16 %v210_v13, %v198_v8  ;;  %v6647_v25 = vand.u32 4294901760, %v4378_v56 }
  0x29   :  { %4016 = vmatpush1.bf16.msra.mxu1 %v4015_v12  ;;  %56 = vperm.xlu0 %4119, %v53_v48   ;;  %v6648_v26 = vand.u32 4294901760, %v4382_v60  ;;  %v6649_v32 = vand.u32 4294901760, %v4447_v58  ;;  %v6650_v33 = vand.u32 4294901760, %v4401_v7  ;;  %v6651_v36 = vand.u32 4294901760, %v4426_v40 }
  0x2a   :  { %788 = vmatprep.subr.mxu1 %v787_v35  ;;  %4120 = vset.pattern.permute.xlu1 %v4210_v14  ;;  %v4037_v39 = vpack.c.bf16 %v773_v19, %v761_v18  ;;  %v6652_v41 = vand.u32 4294901760, %v4439_v55  ;;  %vm4220_vm14 = vmmov 0   ;;  %vm3404_vm15 = vcmask 64512  }
  0x2b   :  { %317 = vmatpush1.msra.mxu0 %v4447_v58  ;;  %v4033_v28 = vpack.c.bf16 %v6648_v26, %v6647_v25  ;;  %v4035_v38 = vpack.c.bf16 %v6651_v36, %v6650_v33  ;;  %v1297_v26 = vld [vmem:[%s6586_s3 + $0x50] sm:$0xff]  ;;  %v1296_v36 = vld [vmem:[%s6586_s3 + $0x48] sm:$0xff] }
  0x2c   :  { %3978 = vmatprep.subr.bf16.mxu0 %v4297_v16  ;;  %375 = vmatmul.mubr.f32.vlgmr.msra.gmra.mrb[0].mxu0 %v4385_v63 }
  0x2d   :  { %3980 = vmatpush1.bf16.msra.mxu0 %v4307_v22  ;;  %794 = vmatpush1.msra.mxu1 %v793_v43  ;;  %v1250_v43 = vld [vmem:[%s6586_s3 + $0x8] sm:$0xff] }
  0x2e   :  { %4018 = vmatprep.subr.bf16.mxu1 %v4017_v47  ;;  %851 = vmatmul.mubr.f32.vlgmr.msra.gmra.mrb[2].mxu1 %v4380_v57 }
  0x2f   :  { %4020 = vmatpush1.bf16.msra.mxu1 %v4019_v31  ;;  %3982 = vmatprep.subr.bf16.mxu0 %v4311_v24  ;;  %v1271_v31 = vld [vmem:[%s6586_s3 + $0x28] sm:$0xff] }
  0x30   :  { %4022 = vmatprep.subr.bf16.mxu1 %v4021_v21  ;;  %455 = vmatprep.mubr.f32.mxu0 %v6600_v10 }
  0x31   :  { %3984 = vmatpush1.bf16.msra.mxu0 %v4318_v27  ;;  %941 = vmatprep.mubr.f32.mxu1 %v6600_v10 }
  0x32   :  { %398 = vmatprep.subr.mxu0 %v4346_v37 }
  0x33   :  { %4024 = vmatpush1.bf16.msra.mxu1 %v4023_v11  ;;  %v1272_v11 = vld [vmem:[%s6586_s3 + $0x30] sm:$0xff] }
  0x34   :  { %883 = vmatprep.subr.mxu1 %v4506_v34 }
  0x35   :  { %400 = vmatpush1.msra.mxu0 %v4356_v45 }
  0x36   :  { %3986 = vmatprep.subr.bf16.mxu0 %v3985_v2  ;;  %459 = vmatmul.mubr.f32.vlgmr.msra.gmra.mrb[0].mxu0 %v4406_v9 }
  0x37   :  { %3988 = vmatpush1.bf16.msra.mxu0 %v3987_v4  ;;  %886 = vmatpush1.msra.mxu1 %v4493_v51 }
  0x38   :  { %4026 = vmatprep.subr.bf16.mxu1 %v4375_v52  ;;  %944 = vmatmul.mubr.f32.vlgmr.msra.gmra.mrb[2].mxu1 %v4385_v63 }
  0x39   :  { %4028 = vmatpush1.bf16.msra.mxu1 %v4399_v6  ;;  %3990 = vmatprep.subr.bf16.mxu0 %v3989_v50 }
  0x3a   :  { %4030 = vmatprep.subr.bf16.mxu1 %v4428_v44  ;;  %559 = vmatprep.mubr.f32.mxu0 %v6600_v10 }
  0x3b   :  { %3992 = vmatpush1.bf16.msra.mxu0 %v3991_v17  ;;  %1024 = vmatprep.mubr.f32.mxu1 %v6600_v10 }
  0x3c   :  { %500 = vmatprep.subr.mxu0 %v6646_v23  ;;  %v1251_v23 = vld [vmem:[%s6586_s3 + $0x10] sm:$0xff] }
  0x3d   :  { %4032 = vmatpush1.bf16.msra.mxu1 %v4453_v62 }
  0x3e   :  { %967 = vmatprep.subr.mxu1 %v4463_v5 }
  0x3f   :  { %504 = vmatpush1.msra.mxu0 %v6649_v32 }
  0x40   :  { %3994 = vmatprep.subr.bf16.mxu0 %v4297_v16  ;;  %561 = vmatmul.mubr.f32.vlgmr.msra.gmra.mrb[0].mxu0 %v4380_v57  ;;  %v6653_v16 = vand.u32 4294901760, %v4459_v3 }
  0x41   :  { %3996 = vmatpush1.bf16.msra.mxu0 %v4307_v22  ;;  %969 = vmatpush1.msra.mxu1 %v4477_v20 }
  0x42   :  { %4034 = vmatprep.subr.bf16.mxu1 %v4033_v28  ;;  %1028 = vmatmul.mubr.f32.vlgmr.msra.gmra.mrb[2].mxu1 %v4406_v9  ;;  %v4039_v42 = vpack.c.bf16 %v6653_v16, %v6652_v41 }
  0x43   :  { %4036 = vmatpush1.bf16.msra.mxu1 %v4035_v38  ;;  %3998 = vmatprep.subr.bf16.mxu0 %v4311_v24 }
  0x44   :  { %4038 = vmatprep.subr.bf16.mxu1 %v4037_v39  ;;  %641 = vmatprep.mubr.f32.mxu0 %v6600_v10  ;;  %v1322_v39 = vld [vmem:[%s6586_s3 + $0x70] sm:$0xff] }
  0x45   :  { %4000 = vmatpush1.bf16.msra.mxu0 %v4318_v27  ;;  %1128 = vmatprep.mubr.f32.mxu1 %v6600_v10  ;;  %v59_v27 = vlaneseq }
  0x46   :  { %584 = vmatprep.subr.mxu0 %v4346_v37 }
  0x47   :  { %4040 = vmatpush1.bf16.msra.mxu1 %v4039_v42  ;;  %v60_v37 = vshrl.u32 %v59_v27, 7  ;;  %v4722_v61 = vand.u32 127, %v59_v27 }
  0x48   :  { %1069 = vmatprep.subr.mxu1 %v785_v15 }
  0x49   :  { %586 = vmatpush1.msra.mxu0 %v4356_v45  ;;  %v61_v45 = vsub.s32 0, %v60_v37  ;;  %vm1244_vm2 = vcmp.lt.s32.totalorder %v4722_v61, 17  ;;  %vm1265_vm3 = vcmp.lt.s32.totalorder %v4722_v61, 16  ;;  %vm1290_vm4 = vcmp.lt.s32.totalorder %v4722_v61, 15 }
  0x4a   :  { %643 = vmatmul.mubr.f32.vlgmr.msra.gmra.mrb[0].mxu0 %v4380_v57  ;;  %vm1315_vm5 = vcmp.lt.s32.totalorder %v4722_v61, 1  ;;  %vm1352_vm6 = vcmp.lt.s32.totalorder %v4722_v61, 127  ;;  %vm1377_vm7 = vcmp.lt.s32.totalorder %v4722_v61, 113  ;;  %vm1402_vm8 = vcmp.lt.s32.totalorder %v4722_v61, 112 }
  0x4b   :  { %1073 = vmatpush1.msra.mxu1 %v791_v30  ;;  %vm1427_vm9 = vcmp.lt.s32.totalorder %v4722_v61, 111 }
  0x4c   :  { %4042 = vmatprep.subr.bf16.mxu1 %v4375_v52  ;;  %1130 = vmatmul.mubr.f32.vlgmr.msra.gmra.mrb[2].mxu1 %v4380_v57 }
  0x4d   :  { %4044 = vmatpush1.bf16.msra.mxu1 %v4399_v6  ;;  %1210 = vmatprep.mubr.f32.mxu1 %v6600_v10 }
  0x4e   :  { %4046 = vmatprep.subr.bf16.mxu1 %v4428_v44 }
  0x51   :  { %4048 = vmatpush1.bf16.msra.mxu1 %v4453_v62 }
  0x52   :  { %1153 = vmatprep.subr.mxu1 %v4463_v5 }
  0x55   :  { %1155 = vmatpush1.msra.mxu1 %v4477_v20 }
  0x56   :  { %1212 = vmatmul.mubr.f32.vlgmr.msra.gmra.mrb[2].mxu1 %v4380_v57  ;;  %3923 = vmatprep.subr.mxu1 %v6600_v10 }
  0xa8   :  { %v57_v52 = vpop.permute.xlu0 %56 }
  0xa9   :  { %v62_v56 = vrot.slane %v57_v52, %v61_v45 }
  0xec   :  { %v161_v22 = vpop.f32.mrb[0].mxu1 }
  0xed   :  { %v163_v24 = vpop.f32.mrb[1].mxu1  ;;  %v162_v60 = vadd.f32 %v161_v22, %v62_v56 }
  0xee   :  { %v164_v63 = vadd.f32 %v163_v24, %v62_v56 }
 0x11d   :  { %v644_v0 = vpop.f32.mrb[0].mxu0 }
 0x11e   :  { %v4050_v1 = vadd.f32 %v644_v0, %v162_v60  ;;  %v646_v6 = vpop.f32.mrb[1].mxu0  ;;  %v1270_v0 = vld [vmem:[%s6586_s3 + $0x20] sm:$0xff] }
 0x11f   :  { %v4052_v7 = vadd.f32 %v646_v6, %v164_v63 }
 0x120   :  { %v4629_v8 = vrot.slane %v4050_v1, %v61_v45 }
 0x121   :  { %v4635_v57 = vrot.slane %v4052_v7, %v61_v45 }
 0x122   :  { %1257 = vrot.lane.b32.xlu1 %v4629_v8, %s4211_s0  ;;  %1234 = vrot.lane.b32.xlu0 %v4629_v8, %s4212_s24 }
 0x126   :  { %1282 = vrot.lane.b32.xlu1 %v4629_v8, %s4213_s25  ;;  %1259 = vrot.lane.b32.xlu0 %v4635_v57, %s4211_s0 }
 0x129   :  { %v1213_v9 = vpop.f32.mrb[2].mxu1 }
 0x12a   :  { %v1215_v13 = vpop.f32.mrb[3].mxu1  ;;  %1307 = vrot.lane.b32.xlu1 %v4629_v8, %s4214_s26  ;;  %1284 = vrot.lane.b32.xlu0 %v4635_v57, %s4213_s25  ;;  %v4053_v40 = vadd.f32 %v1213_v9, %v62_v56 }
 0x12b   :  { %v4054_v44 = vadd.f32 %v1215_v13, %v62_v56  ;;  %v1321_v56 = vld [vmem:[%s6586_s3 + $0x68] sm:$0xff]  ;;  %v1249_v13 = vld [vmem:[%s6586_s3] sm:$0xff] }
 0x12c   :  { %v4665_v46 = vrot.slane %v4053_v40, %v61_v45 }
 0x12d   :  { %v4667_v54 = vrot.slane %v4054_v44, %v61_v45  ;;  %v1334_v44 = vld [vmem:[%s6586_s3 + $0x90] sm:$0xff] }
 0x12e   :  { %1344 = vrot.lane.b32.xlu1 %v4629_v8, %s4215_s27  ;;  %1309 = vrot.lane.b32.xlu0 %v4635_v57, %s4214_s26 }
 0x132   :  { %1369 = vrot.lane.b32.xlu1 %v4629_v8, %s4216_s28  ;;  %1346 = vrot.lane.b32.xlu0 %v4635_v57, %s4215_s27 }
 0x136   :  { %1394 = vrot.lane.b32.xlu1 %v4629_v8, %s4217_s29  ;;  %1371 = vrot.lane.b32.xlu0 %v4635_v57, %s4216_s28 }
 0x13a   :  { %1419 = vrot.lane.b32.xlu1 %v4629_v8, %s4218_s30  ;;  %1396 = vrot.lane.b32.xlu0 %v4635_v57, %s4217_s29 }
 0x13e   :  { %1236 = vrot.lane.b32.xlu1 %v4635_v57, %s4212_s24  ;;  %1421 = vrot.lane.b32.xlu0 %v4635_v57, %s4218_s30 }
 0x142   :  { %1238 = vrot.lane.b32.xlu1 %v4665_v46, %s4212_s24  ;;  %1240 = vrot.lane.b32.xlu0 %v4667_v54, %s4212_s24 }
 0x146   :  { %1261 = vrot.lane.b32.xlu1 %v4665_v46, %s4211_s0  ;;  %1263 = vrot.lane.b32.xlu0 %v4667_v54, %s4211_s0 }
 0x14a   :  { %1286 = vrot.lane.b32.xlu1 %v4665_v46, %s4213_s25  ;;  %1288 = vrot.lane.b32.xlu0 %v4667_v54, %s4213_s25 }
 0x14e   :  { %1311 = vrot.lane.b32.xlu1 %v4665_v46, %s4214_s26  ;;  %1313 = vrot.lane.b32.xlu0 %v4667_v54, %s4214_s26 }
 0x152   :  { %1348 = vrot.lane.b32.xlu1 %v4665_v46, %s4215_s27  ;;  %1350 = vrot.lane.b32.xlu0 %v4667_v54, %s4215_s27 }
 0x156   :  { %1373 = vrot.lane.b32.xlu1 %v4665_v46, %s4216_s28  ;;  %1375 = vrot.lane.b32.xlu0 %v4667_v54, %s4216_s28 }
 0x15a   :  { %1398 = vrot.lane.b32.xlu1 %v4665_v46, %s4217_s29  ;;  %1400 = vrot.lane.b32.xlu0 %v4667_v54, %s4217_s29 }
 0x15e   :  { %1423 = vrot.lane.b32.xlu1 %v4665_v46, %s4218_s30  ;;  %1425 = vrot.lane.b32.xlu0 %v4667_v54, %s4218_s30 }
 0x194   :  { %v1258_v55 = vpop.permute.xlu1 %1257  ;;  %v1235_v49 = vpop.permute.xlu0 %1234 }
 0x198   :  { %v4701_v58 = vpop.permute.xlu1 %1282  ;;  %v1260_v62 = vpop.permute.xlu0 %1259 }
 0x199   :  { %v1268_v21 = vsel %vm1265_vm3, %v1258_v55, %v1260_v62 }
 0x19a   :  { %v1275_v32 = vmul.f32 %v1271_v31, %v1268_v21  ;;  %v1359_v31 = vld [vmem:[%s6586_s3 + $0xb0] sm:$0xff] }
 0x19c   :  { %v4703_v3 = vpop.permute.xlu1 %1307  ;;  %v1285_v34 = vpop.permute.xlu0 %1284 }
 0x19d   :  { %v1293_v38 = vsel %vm1290_vm4, %v4701_v58, %v1285_v34 }
 0x19e   :  { %v1300_v37 = vmul.f32 %v1296_v36, %v1293_v38 }
 0x1a0   :  { %v4705_v5 = vpop.permute.xlu1 %1344  ;;  %v1310_v20 = vpop.permute.xlu0 %1309 }
 0x1a1   :  { %v1318_v60 = vsel %vm1315_vm5, %v4703_v3, %v1310_v20 }
 0x1a4   :  { %v4707_v51 = vpop.permute.xlu1 %1369  ;;  %v4709_v18 = vpop.permute.xlu0 %1346 }
 0x1a8   :  { %v4711_v19 = vpop.permute.xlu1 %1394  ;;  %v4713_v30 = vpop.permute.xlu0 %1371 }
 0x1ac   :  { %v4715_v15 = vpop.permute.xlu1 %1419  ;;  %v4717_v29 = vpop.permute.xlu0 %1396 }
 0x1b0   :  { %v1237_v53 = vpop.permute.xlu1 %1236  ;;  %v4719_v59 = vpop.permute.xlu0 %1421 }
 0x1b1   :  { %v1247_v47 = vsel %vm1244_vm2, %v1235_v49, %v1237_v53 }
 0x1b2   :  { %v1254_v4 = vmul.f32 %v1250_v43, %v1247_v47  ;;  %v1358_v43 = vld [vmem:[%s6586_s3 + $0xa8] sm:$0xff] }
 0x1b4   :  { %v4724_v48 = vpop.permute.xlu1 %1238  ;;  %v4726_v12 = vpop.permute.xlu0 %1240  ;;  %v1279_v41 = vadd.f32 %v1275_v32, %v1254_v4  ;;  %v1383_v32 = vld [vmem:[%s6586_s3 + $0xc8] sm:$0xff] }
 0x1b5   :  { %v1246_v25 = vsel %vm1244_vm2, %v1237_v53, %v4724_v48  ;;  %v1248_v40 = vsel %vm1244_vm2, %v4726_v12, %v1235_v49  ;;  %v1333_v49 = vld [vmem:[%s6586_s3 + $0x88] sm:$0xff] }
 0x1b6   :  { %v1255_v16 = vmul.f32 %v1251_v23, %v1246_v25  ;;  %v1304_v63 = vadd.f32 %v1300_v37, %v1279_v41  ;;  %v1253_v21 = vmul.f32 %v1249_v13, %v1248_v40  ;;  %v1337_v38 = vmul.f32 %v1333_v49, %v4635_v57  ;;  %v1332_v37 = vld [vmem:[%s6586_s3 + $0x80] sm:$0xff]  ;;  %v1273_v13 = vld [vmem:[%s6586_s3 + $0x38] sm:$0xff] }
 0x1b7   :  { %v1245_v49 = vsel %vm1244_vm2, %v4724_v48, %v4726_v12  ;;  %v1357_v12 = vld [vmem:[%s6586_s3 + $0xa0] sm:$0xff] }
 0x1b8   :  { %v4730_v35 = vpop.permute.xlu1 %1261  ;;  %v4732_v14 = vpop.permute.xlu0 %1263 }
 0x1b9   :  { %v1267_v2 = vsel %vm1265_vm3, %v1260_v62, %v4730_v35  ;;  %v1269_v1 = vsel %vm1265_vm3, %v4732_v14, %v1258_v55  ;;  %v1325_v62 = vmul.f32 %v1321_v56, %v1318_v60  ;;  %v1295_v55 = vld [vmem:[%s6586_s3 + $0x40] sm:$0xff] }
 0x1ba   :  { %v1276_v33 = vmul.f32 %v1272_v11, %v1267_v2  ;;  %v1274_v53 = vmul.f32 %v1270_v0, %v1269_v1  ;;  %v1338_v2 = vmul.f32 %v1334_v44, %v4665_v46  ;;  %v1266_v0 = vsel %vm1265_vm3, %v4730_v35, %v4732_v14 }
 0x1bb   :  { %v1329_v11 = vadd.f32 %v1325_v62, %v1304_v63  ;;  %v1355_v35 = vsel %vm1352_vm6, %v4705_v5, %v4709_v18  ;;  %v1336_v14 = vmul.f32 %v1332_v37, %v4629_v8 }
 0x1bc   :  { %v4751_v50 = vpop.permute.xlu1 %1286  ;;  %v4753_v17 = vpop.permute.xlu0 %1288  ;;  %v1280_v45 = vadd.f32 %v1276_v33, %v1255_v16  ;;  %v1384_v33 = vld [vmem:[%s6586_s3 + $0xd0] sm:$0xff]  ;;  %v1278_v16 = vadd.f32 %v1274_v53, %v1253_v21  ;;  %v1252_v53 = vld [vmem:[%s6586_s3 + $0x18] sm:$0xff] }
 0x1bd   :  { %v1292_v28 = vsel %vm1290_vm4, %v1285_v34, %v4751_v50  ;;  %v1294_v34 = vsel %vm1290_vm4, %v4753_v17, %v4701_v58  ;;  %v1341_v57 = vadd.f32 %v1337_v38, %v1329_v11  ;;  %v1298_v21 = vld [vmem:[%s6586_s3 + $0x58] sm:$0xff]  ;;  %v1291_v11 = vsel %vm1290_vm4, %v4751_v50, %v4753_v17 }
 0x1be   :  { %v1301_v42 = vmul.f32 %v1297_v26, %v1292_v28  ;;  %v1299_v25 = vmul.f32 %v1295_v55, %v1294_v34  ;;  %v1320_v26 = vld [vmem:[%s6586_s3 + $0x60] sm:$0xff]  ;;  %v1433_v34 = vld [vmem:[%s6586_s3 + $0x108] sm:$0xff]  ;;  %v1323_v50 = vld [vmem:[%s6586_s3 + $0x78] sm:$0xff] }
 0x1c0   :  { %v4777_v22 = vpop.permute.xlu1 %1311  ;;  %v4779_v24 = vpop.permute.xlu0 %1313  ;;  %v1305_v6 = vadd.f32 %v1301_v42, %v1280_v45  ;;  %v1408_v42 = vld [vmem:[%s6586_s3 + $0xe8] sm:$0xff]  ;;  %v1303_v1 = vadd.f32 %v1299_v25, %v1278_v16 }
 0x1c1   :  { %v1317_v27 = vsel %vm1315_vm5, %v1310_v20, %v4777_v22  ;;  %v1319_v28 = vsel %vm1315_vm5, %v4779_v24, %v4703_v3  ;;  %v1316_v17 = vsel %vm1315_vm5, %v4777_v22, %v4779_v24 }
 0x1c2   :  { %v1326_v52 = vmul.f32 %v1322_v39, %v1317_v27  ;;  %v1409_v27 = vld [vmem:[%s6586_s3 + $0xf0] sm:$0xff]  ;;  %v1324_v45 = vmul.f32 %v1320_v26, %v1319_v28 }
 0x1c4   :  { %v1349_v7 = vpop.permute.xlu1 %1348  ;;  %v4796_v9 = vpop.permute.xlu0 %1350  ;;  %v1330_v20 = vadd.f32 %v1326_v52, %v1305_v6 }
 0x1c5   :  { %v1354_v47 = vsel %vm1352_vm6, %v4709_v18, %v1349_v7  ;;  %v1353_v58 = vsel %vm1352_vm6, %v1349_v7, %v4796_v9  ;;  %v1328_v18 = vadd.f32 %v1324_v45, %v1303_v1 }
 0x1c6   :  { %v1362_v39 = vmul.f32 %v1358_v43, %v1354_v47  ;;  %v1342_v3 = vadd.f32 %v1338_v2, %v1330_v20  ;;  %v1363_v41 = vmul.f32 %v1359_v31, %v1353_v58  ;;  %v1434_v20 = vld [vmem:[%s6586_s3 + $0x110] sm:$0xff]  ;;  %v1277_v58 = vmul.f32 %v1273_v13, %v1266_v0 }
 0x1c7   :  { %v1356_v13 = vsel %vm1352_vm6, %v4796_v9, %v4705_v5  ;;  %v1430_v5 = vsel %vm1427_vm9, %v4715_v15, %v4719_v59  ;;  %v1410_v9 = vld [vmem:[%s6586_s3 + $0xf8] sm:$0xff] }
 0x1c8   :  { %v1374_v4 = vpop.permute.xlu1 %1373  ;;  %v4832_v23 = vpop.permute.xlu0 %1375  ;;  %v1366_v40 = vadd.f32 %v1362_v39, %v1341_v57  ;;  %v1367_v44 = vadd.f32 %v1363_v41, %v1342_v3  ;;  %v1361_v39 = vmul.f32 %v1357_v12, %v1355_v35  ;;  %v1380_v3 = vsel %vm1377_vm7, %v4707_v51, %v4713_v30  ;;  %v1382_v41 = vld [vmem:[%s6586_s3 + $0xc0] sm:$0xff] }
 0x1c9   :  { %v1379_v46 = vsel %vm1377_vm7, %v4713_v30, %v1374_v4  ;;  %v1378_v36 = vsel %vm1377_vm7, %v1374_v4, %v4832_v23  ;;  %v1335_v30 = vld [vmem:[%s6586_s3 + $0x98] sm:$0xff] }
 0x1ca   :  { %v1387_v52 = vmul.f32 %v1383_v32, %v1379_v46  ;;  %v1388_v56 = vmul.f32 %v1384_v33, %v1378_v36  ;;  %v1256_v32 = vmul.f32 %v1252_v53, %v1245_v49  ;;  %v1302_v46 = vmul.f32 %v1298_v21, %v1291_v11 }
 0x1cb   :  { %v1340_v33 = vadd.f32 %v1336_v14, %v1328_v18  ;;  %v1381_v14 = vsel %vm1377_vm7, %v4832_v23, %v4707_v51 }
 0x1cc   :  { %v1399_v60 = vpop.permute.xlu1 %1398  ;;  %v4864_v63 = vpop.permute.xlu0 %1400  ;;  %v1391_v43 = vadd.f32 %v1387_v52, %v1366_v40  ;;  %v1392_v8 = vadd.f32 %v1388_v56, %v1367_v44  ;;  %v1281_v16 = vadd.f32 %v1277_v58, %v1256_v32  ;;  %v1386_v52 = vmul.f32 %v1382_v41, %v1380_v3  ;;  %v1407_v56 = vld [vmem:[%s6586_s3 + $0xe0] sm:$0xff] }
 0x1cd   :  { %v1404_v6 = vsel %vm1402_vm8, %v4717_v29, %v1399_v60  ;;  %v1403_v7 = vsel %vm1402_vm8, %v1399_v60, %v4864_v63  ;;  %v1365_v37 = vadd.f32 %v1361_v39, %v1340_v33  ;;  %v1405_v60 = vsel %vm1402_vm8, %v4711_v19, %v4717_v29  ;;  %v1385_v29 = vld [vmem:[%s6586_s3 + $0xd8] sm:$0xff] }
 0x1ce   :  { %v1412_v62 = vmul.f32 %v1408_v42, %v1404_v6  ;;  %v1413_v55 = vmul.f32 %v1409_v27, %v1403_v7  ;;  %v1327_v42 = vmul.f32 %v1323_v50, %v1316_v17  ;;  %v1306_v27 = vadd.f32 %v1302_v46, %v1281_v16  ;;  %v1360_v7 = vld [vmem:[%s6586_s3 + $0xb8] sm:$0xff] }
 0x1cf   :  { %v1390_v40 = vadd.f32 %v1386_v52, %v1365_v37  ;;  %v1339_v44 = vmul.f32 %v1335_v30, %v4667_v54  ;;  %v1411_v35 = vmul.f32 %v1407_v56, %v1405_v60  ;;  %v1432_v54 = vld [vmem:[%s6586_s3 + $0x100] sm:$0xff]  ;;  %v1406_v51 = vsel %vm1402_vm8, %v4864_v63, %v4711_v19 }
 0x1d0   :  { %v1424_v47 = vpop.permute.xlu1 %1423  ;;  %v1426_v31 = vpop.permute.xlu0 %1425  ;;  %v1416_v4 = vadd.f32 %v1412_v62, %v1391_v43  ;;  %v1417_v25 = vadd.f32 %v1413_v55, %v1392_v8  ;;  %v1331_v0 = vadd.f32 %v1327_v42, %v1306_v27  ;;  %v1389_v18 = vmul.f32 %v1385_v29, %v1381_v14 }
 0x1d1   :  { %v1429_v2 = vsel %vm1427_vm9, %v4719_v59, %v1424_v47  ;;  %v1428_v48 = vsel %vm1427_vm9, %v1424_v47, %v1426_v31  ;;  %v1415_v23 = vadd.f32 %v1411_v35, %v1390_v40  ;;  %v1435_v47 = vld [vmem:[%s6586_s3 + $0x118] sm:$0xff]  ;;  %v1431_v59 = vsel %vm1427_vm9, %v1426_v31, %v4715_v15  ;;  %v5095_v35 = vld [vmem:[%s6587_s4 + $0x48] sm:$0xff] }
 0x1d2   :  { %v1437_v26 = vmul.f32 %v1433_v34, %v1429_v2  ;;  %v1438_v28 = vmul.f32 %v1434_v20, %v1428_v48  ;;  %v1343_v34 = vadd.f32 %v1339_v44, %v1331_v0  ;;  %v1364_v20 = vmul.f32 %v1360_v7, %v1356_v13  ;;  %v5086_v44 = vld [vmem:[%s6587_s4 + $0x28] sm:$0xff]  ;;  %6658 = vst [vmem:[#allocation13_spill] sm:$0xff] %v5095_v35 }
 0x1d3   :  { %v1436_v58 = vmul.f32 %v1432_v54, %v1430_v5  ;;  %v1414_v11 = vmul.f32 %v1410_v9, %v1406_v51  ;;  %v1439_v2 = vmul.f32 %v1435_v47, %v1431_v59  ;;  %6657 = vst [vmem:[#allocation12_spill] sm:$0xff] %v5086_v44  ;;  %v5113_v54 = vld [vmem:[%s6587_s4 + $0x10] sm:$0xff]  ;;  %v5129_v47 = vld [vmem:[%s6587_s4 + $0x68] sm:$0xff] }
 0x1d4   :  { %v4920_v36 = vadd.f32 %v1437_v26, %v1416_v4  ;;  %v4922_v38 = vadd.f32 %v1438_v28, %v1417_v25  ;;  %v1368_v21 = vadd.f32 %v1364_v20, %v1343_v34  ;;  %v5103_v20 = vld [vmem:[%s6587_s4 + $0x18] sm:$0xff]  ;;  %6659 = vst [vmem:[#allocation14_spill] sm:$0xff] %v5113_v54  ;;  %v5134_v59 = vld [vmem:[%s6587_s4 + $0x30] sm:$0xff] }
 0x1d5   :  { %v4988_v19 = vadd.f32 %v1436_v58, %v1415_v23  ;;  %v5122_v23 = vld [vmem:[%s6587_s4 + $0x38] sm:$0xff] }
 0x1d6   :  { %6654 = vst [vmem:[#allocation9_spill] sm:$0xff] %v4920_v36  ;;  %6655 = vst [vmem:[#allocation10_spill] sm:$0xff] %v4922_v38  ;;  %v1450_v22 = vrot.slane %v4920_v36, 4  ;;  %v1456_v24 = vrot.slane %v4922_v38, 4  ;;  %v1393_v63 = vadd.f32 %v1389_v18, %v1368_v21 }
 0x1d7   :  { %v1444_v15 = vrot.slane %v4988_v19, 4  ;;  %6660 = vst [vmem:[#allocation15_spill] sm:$0xff] %v5122_v23 }
 0x1d8   :  { %v1451_v45 = vmax.f32 %v4920_v36, %v1450_v22  ;;  %v1457_v57 = vmax.f32 %v4922_v38, %v1456_v24  ;;  %v1418_v48 = vadd.f32 %v1414_v11, %v1393_v63 }
 0x1d9   :  { %v1445_v12 = vmax.f32 %v4988_v19, %v1444_v15  ;;  %v5145_v15 = vld [vmem:[%s6587_s4 + $0x58] sm:$0xff] }
 0x1da   :  { %v1452_v1 = vrot.slane %v1451_v45, 2  ;;  %v1458_v6 = vrot.slane %v1457_v57, 2  ;;  %v4995_v31 = vadd.f32 %v1439_v2, %v1418_v48 }
 0x1db   :  { %v1446_v25 = vrot.slane %v1445_v12, 2 }
 0x1dc   :  { %v1453_v62 = vmax.f32 %v1451_v45, %v1452_v1  ;;  %v1459_v55 = vmax.f32 %v1457_v57, %v1458_v6  ;;  %6656 = vst [vmem:[#allocation11_spill] sm:$0xff] %v4995_v31  ;;  %v1462_v4 = vrot.slane %v4995_v31, 4  ;;  %v5077_v6 = vld [vmem:[%s6587_s4 + $0x8] sm:$0xff] }
 0x1dd   :  { %v1447_v32 = vmax.f32 %v1445_v12, %v1446_v25  ;;  %v5155_v25 = vld [vmem:[%s6587_s4 + $0x50] sm:$0xff] }
 0x1de   :  { %v1454_v53 = vrot.slane %v1453_v62, 1  ;;  %v1460_v49 = vrot.slane %v1459_v55, 1  ;;  %v1463_v26 = vmax.f32 %v4995_v31, %v1462_v4  ;;  %6661 = vst [vmem:[#allocation16_spill] sm:$0xff] %v5155_v25 }
 0x1df   :  { %v1448_v17 = vrot.slane %v1447_v32, 1 }
 0x1e0   :  { %v4974_v43 = vmax.f32 %v1453_v62, %v1454_v53  ;;  %v4976_v8 = vmax.f32 %v1459_v55, %v1460_v49  ;;  %v1464_v28 = vrot.slane %v1463_v26, 2 }
 0x1e1   :  { %v5020_v33 = vmax.f32 %v1447_v32, %v1448_v17 }
 0x1e2   :  { %1470 = vrot.lane.b32.xlu0 %v4974_v43, %s4212_s24  ;;  %1472 = vrot.lane.b32.xlu1 %v4976_v8, %s4212_s24  ;;  %v1465_v50 = vmax.f32 %v1463_v26, %v1464_v28 }
 0x1e4   :  { %v1466_v46 = vrot.slane %v1465_v50, 1 }
 0x1e6   :  { %1494 = vrot.lane.b32.xlu0 %v4974_v43, %s4211_s0  ;;  %1496 = vrot.lane.b32.xlu1 %v4976_v8, %s4211_s0  ;;  %v5026_v39 = vmax.f32 %v1465_v50, %v1466_v46  ;;  %v5165_v46 = vld [vmem:[%s6587_s4 + $0x88] sm:$0xff] }
 0x1ea   :  { %1518 = vrot.lane.b32.xlu0 %v4974_v43, %s4213_s25  ;;  %1520 = vrot.lane.b32.xlu1 %v4976_v8, %s4213_s25 }
 0x1ee   :  { %1542 = vrot.lane.b32.xlu0 %v4974_v43, %s4214_s26  ;;  %1544 = vrot.lane.b32.xlu1 %v4976_v8, %s4214_s26 }
 0x1f2   :  { %1578 = vrot.lane.b32.xlu0 %v4974_v43, %s4215_s27  ;;  %1580 = vrot.lane.b32.xlu1 %v4976_v8, %s4215_s27 }
 0x1f6   :  { %1602 = vrot.lane.b32.xlu0 %v4974_v43, %s4216_s28  ;;  %1604 = vrot.lane.b32.xlu1 %v4976_v8, %s4216_s28 }
 0x1fa   :  { %1626 = vrot.lane.b32.xlu0 %v4974_v43, %s4217_s29  ;;  %1628 = vrot.lane.b32.xlu1 %v4976_v8, %s4217_s29 }
 0x1fe   :  { %1650 = vrot.lane.b32.xlu0 %v4974_v43, %s4218_s30  ;;  %1468 = vrot.lane.b32.xlu1 %v5020_v33, %s4212_s24 }
 0x202   :  { %1474 = vrot.lane.b32.xlu0 %v5026_v39, %s4212_s24  ;;  %1492 = vrot.lane.b32.xlu1 %v5020_v33, %s4211_s0 }
 0x206   :  { %1498 = vrot.lane.b32.xlu0 %v5026_v39, %s4211_s0  ;;  %1516 = vrot.lane.b32.xlu1 %v5020_v33, %s4213_s25 }
 0x20a   :  { %1522 = vrot.lane.b32.xlu0 %v5026_v39, %s4213_s25  ;;  %1540 = vrot.lane.b32.xlu1 %v5020_v33, %s4214_s26 }
 0x20e   :  { %1546 = vrot.lane.b32.xlu0 %v5026_v39, %s4214_s26  ;;  %1576 = vrot.lane.b32.xlu1 %v5020_v33, %s4215_s27 }
 0x212   :  { %1582 = vrot.lane.b32.xlu0 %v5026_v39, %s4215_s27  ;;  %1600 = vrot.lane.b32.xlu1 %v5020_v33, %s4216_s28 }
 0x216   :  { %1606 = vrot.lane.b32.xlu0 %v5026_v39, %s4216_s28  ;;  %1624 = vrot.lane.b32.xlu1 %v5020_v33, %s4217_s29 }
 0x21a   :  { %1630 = vrot.lane.b32.xlu0 %v5026_v39, %s4217_s29  ;;  %1648 = vrot.lane.b32.xlu1 %v5020_v33, %s4218_s30 }
 0x21e   :  { %1654 = vrot.lane.b32.xlu0 %v5026_v39, %s4218_s30  ;;  %1652 = vrot.lane.b32.xlu1 %v4976_v8, %s4218_s30 }
 0x254   :  { %v1473_v3 = vpop.permute.xlu1 %1472  ;;  %v1471_v41 = vpop.permute.xlu0 %1470 }
 0x255   :  { %v1477_v5 = vsel %vm1244_vm2, %v1471_v41, %v1473_v3 }
 0x256   :  { %v1486_v48 = vmul.f32 %v5113_v54, %v1477_v5  ;;  %v1569_v5 = vmul.f32 %v5165_v46, %v4974_v43 }
 0x258   :  { %v1497_v16 = vpop.permute.xlu1 %1496  ;;  %v1495_v42 = vpop.permute.xlu0 %1494 }
 0x259   :  { %v1501_v58 = vsel %vm1265_vm3, %v1495_v42, %v1497_v16 }
 0x25a   :  { %v1510_v17 = vmul.f32 %v5134_v59, %v1501_v58  ;;  %v5199_v58 = vld [vmem:[%s6587_s4 + $0xa8] sm:$0xff] }
 0x25c   :  { %v1521_v22 = vpop.permute.xlu1 %1520  ;;  %v1519_v24 = vpop.permute.xlu0 %1518 }
 0x25d   :  { %v1525_v26 = vsel %vm1290_vm4, %v1519_v24, %v1521_v22 }
 0x260   :  { %v1545_v27 = vpop.permute.xlu1 %1544  ;;  %v1543_v37 = vpop.permute.xlu0 %1542 }
 0x264   :  { %v5060_v45 = vpop.permute.xlu1 %1580  ;;  %v5062_v57 = vpop.permute.xlu0 %1578 }
 0x265   :  { %v1585_v43 = vsel %vm1352_vm6, %v5062_v57, %v5060_v45 }
 0x268   :  { %v5064_v52 = vpop.permute.xlu1 %1604  ;;  %v5066_v30 = vpop.permute.xlu0 %1602 }
 0x26c   :  { %v5068_v56 = vpop.permute.xlu1 %1628  ;;  %v5070_v60 = vpop.permute.xlu0 %1626 }
 0x270   :  { %v5072_v0 = vpop.permute.xlu0 %1650  ;;  %v1469_v1 = vpop.permute.xlu1 %1468 }
 0x271   :  { %v1478_v7 = vsel %vm1244_vm2, %v1469_v1, %v1471_v41  ;;  %v5175_v41 = vld [vmem:[%s6587_s4 + $0x70] sm:$0xff] }
 0x272   :  { %v1485_v55 = vmul.f32 %v5077_v6, %v1478_v7 }
 0x274   :  { %v1475_v13 = vpop.permute.xlu0 %1474  ;;  %v5081_v40 = vpop.permute.xlu1 %1492  ;;  %v1489_v9 = vadd.f32 %v1485_v55, %v4920_v36  ;;  %v1490_v55 = vadd.f32 %v1486_v48, %v4922_v38 }
 0x275   :  { %v1502_v62 = vsel %vm1265_vm3, %v5081_v40, %v1495_v42  ;;  %v1476_v53 = vsel %vm1244_vm2, %v1473_v3, %v1475_v13  ;;  %v5170_v3 = vld [vmem:[%s6587_s4 + $0x78] sm:$0xff] }
 0x276   :  { %v1509_v29 = vmul.f32 %v5086_v44, %v1502_v62  ;;  %v1487_v21 = vmul.f32 %v5103_v20, %v1476_v53 }
 0x278   :  { %v1499_v14 = vpop.permute.xlu0 %1498  ;;  %v5098_v34 = vpop.permute.xlu1 %1516  ;;  %v1513_v11 = vadd.f32 %v1509_v29, %v1489_v9  ;;  %v1491_v42 = vadd.f32 %v1487_v21, %v4995_v31  ;;  %v1534_v29 = vmul.f32 %v5155_v25, %v1525_v26  ;;  %v5193_v9 = vld [vmem:[%s6587_s4 + $0x90] sm:$0xff]  ;;  %v1479_v21 = vsel %vm1244_vm2, %v1475_v13, %v1469_v1  ;;  %v5231_v13 = vld [vmem:[%s6587_s4 + $0x20] sm:$0xff] }
 0x279   :  { %v1526_v49 = vsel %vm1290_vm4, %v5098_v34, %v1519_v24  ;;  %v1500_v18 = vsel %vm1265_vm3, %v1497_v16, %v1499_v14  ;;  %v1549_v16 = vsel %vm1315_vm5, %v1543_v37, %v1545_v27  ;;  %v1609_v1 = vsel %vm1377_vm7, %v5066_v30, %v5064_v52 }
 0x27a   :  { %v1533_v51 = vmul.f32 %v5095_v35, %v1526_v49  ;;  %v1511_v28 = vmul.f32 %v5122_v23, %v1500_v18  ;;  %v1558_v18 = vmul.f32 %v5175_v41, %v1549_v16  ;;  %v1593_v16 = vmul.f32 %v5199_v58, %v1585_v43 }
 0x27c   :  { %v1523_v63 = vpop.permute.xlu0 %1522  ;;  %v5139_v2 = vpop.permute.xlu1 %1540  ;;  %v1537_v32 = vadd.f32 %v1533_v51, %v1513_v11  ;;  %v1515_v49 = vadd.f32 %v1511_v28, %v1491_v42  ;;  %v1514_v51 = vadd.f32 %v1510_v17, %v1490_v55  ;;  %v1570_v17 = vmul.f32 %v5193_v9, %v4976_v8 }
 0x27d   :  { %v1524_v12 = vsel %vm1290_vm4, %v1521_v22, %v1523_v63  ;;  %v1550_v4 = vsel %vm1315_vm5, %v5139_v2, %v1543_v37  ;;  %v1527_v8 = vsel %vm1290_vm4, %v1523_v63, %v5098_v34 }
 0x27e   :  { %v1557_v50 = vmul.f32 %v5129_v47, %v1550_v4  ;;  %v1535_v22 = vmul.f32 %v5145_v15, %v1524_v12  ;;  %v5215_v12 = vld [vmem:[%s6587_s4 + $0x98] sm:$0xff]  ;;  %v1538_v28 = vadd.f32 %v1534_v29, %v1514_v51 }
 0x280   :  { %v1561_v24 = vadd.f32 %v1557_v50, %v1537_v32  ;;  %v1547_v7 = vpop.permute.xlu0 %1546  ;;  %v5181_v62 = vpop.permute.xlu1 %1576  ;;  %v1539_v11 = vadd.f32 %v1535_v22, %v1515_v49  ;;  %v5222_v32 = vld [vmem:[%s6587_s4 + $0xc8] sm:$0xff]  ;;  %v1503_v50 = vsel %vm1265_vm3, %v1499_v14, %v5081_v40  ;;  %v1562_v29 = vadd.f32 %v1558_v18, %v1538_v28  ;;  %v5251_v40 = vld [vmem:[%s6587_s4 + $0x40] sm:$0xff] }
 0x281   :  { %v1548_v53 = vsel %vm1315_vm5, %v1545_v27, %v1547_v7  ;;  %v5208_v27 = vld [vmem:[%s6587_s4] sm:$0xff]  ;;  %v1571_v14 = vmul.f32 %v5215_v12, %v5026_v39  ;;  %v1617_v49 = vmul.f32 %v5222_v32, %v1609_v1  ;;  %v1508_v34 = vmul.f32 %v5231_v13, %v1503_v50  ;;  %v5275_v39 = vld [vmem:[%s6587_s4 + $0xd0] sm:$0xff]  ;;  %v5302_v28 = vld [vmem:[%s6587_s4 + $0xe8] sm:$0xff] }
 0x282   :  { %v1559_v37 = vmul.f32 %v5170_v3, %v1548_v53  ;;  %v1573_v48 = vadd.f32 %v1569_v5, %v1561_v24  ;;  %v1484_v42 = vmul.f32 %v5208_v27, %v1479_v21  ;;  %v5243_v24 = vld [vmem:[%s6587_s4 + $0xb0] sm:$0xff]  ;;  %v5261_v53 = vld [vmem:[%s6587_s4 + $0xb8] sm:$0xff]  ;;  %v1633_v5 = vsel %vm1402_vm8, %v5070_v60, %v5068_v56  ;;  %6663 = vst [vmem:[#allocation18_spill] sm:$0xff] %v5275_v39  ;;  %v5282_v18 = vld [vmem:[%s6587_s4 + $0x60] sm:$0xff] }
 0x283   :  { %6662 = vst [vmem:[#allocation17_spill] sm:$0xff] %v5261_v53  ;;  %v1551_v43 = vsel %vm1315_vm5, %v1547_v7, %v5139_v2  ;;  %6665 = vst [vmem:[#allocation20_spill] sm:$0xff] %v5302_v28  ;;  %v1532_v7 = vmul.f32 %v5251_v40, %v1527_v8 }
 0x284   :  { %v1583_v4 = vpop.permute.xlu0 %1582  ;;  %v5217_v26 = vpop.permute.xlu1 %1600  ;;  %v1563_v22 = vadd.f32 %v1559_v37, %v1539_v11  ;;  %v1597_v63 = vadd.f32 %v1593_v16, %v1573_v48  ;;  %v5291_v11 = vld [vmem:[%s6587_s4 + $0xd8] sm:$0xff]  ;;  %v1488_v2 = vadd.f32 %v1484_v42, %v4988_v19  ;;  %v1574_v16 = vadd.f32 %v1570_v17, %v1562_v29 }
 0x285   :  { %v1584_v55 = vsel %vm1352_vm6, %v5060_v45, %v1583_v4  ;;  %v1587_v45 = vsel %vm1352_vm6, %v1583_v4, %v5181_v62  ;;  %6664 = vst [vmem:[#allocation19_spill] sm:$0xff] %v5291_v11  ;;  %v1556_v42 = vmul.f32 %v5282_v18, %v1551_v43  ;;  %v1641_v29 = vmul.f32 %v5302_v28, %v1633_v5 }
 0x286   :  { %v1594_v21 = vmul.f32 %v5243_v24, %v1584_v55  ;;  %v1575_v1 = vadd.f32 %v1571_v14, %v1563_v22  ;;  %v1595_v50 = vmul.f32 %v5261_v53, %v1587_v45  ;;  %v1512_v10 = vadd.f32 %v1508_v34, %v1488_v2 }
 0x287   :  { %v1621_v17 = vadd.f32 %v1617_v49, %v1597_v63  ;;  %v5332_v49 = vld [vmem:[%s6587_s4 + $0x118] sm:$0xff] }
 0x288   :  { %v1607_v37 = vpop.permute.xlu0 %1606  ;;  %v5277_v51 = vpop.permute.xlu1 %1624  ;;  %v1598_v45 = vadd.f32 %v1594_v21, %v1574_v16  ;;  %v1536_v53 = vadd.f32 %v1532_v7, %v1512_v10  ;;  %v1599_v34 = vadd.f32 %v1595_v50, %v1575_v1  ;;  %6668 = vst [vmem:[#allocation23_spill] sm:$0xff] %v5332_v49  ;;  %v5342_v10 = vld [vmem:[%s6587_s4 + $0x110] sm:$0xff]  ;;  %v5347_v1 = vld [vmem:[%s6587_s4 + $0x80] sm:$0xff] }
 0x289   :  { %v1608_v48 = vsel %vm1377_vm7, %v5064_v52, %v1607_v37  ;;  %v1611_v4 = vsel %vm1377_vm7, %v1607_v37, %v5217_v26  ;;  %v5311_v52 = vld [vmem:[%s6587_s4 + $0xf0] sm:$0xff]  ;;  %v5316_v37 = vld [vmem:[%s6587_s4 + $0xf8] sm:$0xff]  ;;  %6670 = vst [vmem:[#allocation25_spill] sm:$0xff] %v5342_v10 }
 0x28a   :  { %v1618_v55 = vmul.f32 %v5275_v39, %v1608_v48  ;;  %6666 = vst [vmem:[#allocation21_spill] sm:$0xff] %v5311_v52  ;;  %6667 = vst [vmem:[#allocation22_spill] sm:$0xff] %v5316_v37  ;;  %v1619_v22 = vmul.f32 %v5291_v11, %v1611_v4  ;;  %v1560_v5 = vadd.f32 %v1556_v42, %v1536_v53 }
 0x28c   :  { %v1631_v8 = vpop.permute.xlu0 %1630  ;;  %v1649_v14 = vpop.permute.xlu1 %1648  ;;  %v1622_v2 = vadd.f32 %v1618_v55, %v1598_v45  ;;  %v1623_v63 = vadd.f32 %v1619_v22, %v1599_v34 }
 0x28d   :  { %v1632_v48 = vsel %vm1402_vm8, %v5068_v56, %v1631_v8  ;;  %v1635_v39 = vsel %vm1402_vm8, %v1631_v8, %v5277_v51  ;;  %v5337_v56 = vld [vmem:[%s6587_s4 + $0x108] sm:$0xff] }
 0x28e   :  { %v1642_v43 = vmul.f32 %v5311_v52, %v1632_v48  ;;  %v1643_v4 = vmul.f32 %v5316_v37, %v1635_v39  ;;  %6669 = vst [vmem:[#allocation24_spill] sm:$0xff] %v5337_v56  ;;  %v1645_v39 = vadd.f32 %v1641_v29, %v1621_v17  ;;  %v1568_v29 = vmul.f32 %v5347_v1, %v5020_v33 }
 0x290   :  { %v1655_v21 = vpop.permute.xlu0 %1654  ;;  %v1653_v7 = vpop.permute.xlu1 %1652  ;;  %v1646_v50 = vadd.f32 %v1642_v43, %v1622_v2  ;;  %v1647_v42 = vadd.f32 %v1643_v4, %v1623_v63  ;;  %v5364_v43 = vld [vmem:[%s6587_s4 + $0xa0] sm:$0xff]  ;;  %v1586_v4 = vsel %vm1352_vm6, %v5181_v62, %v5062_v57  ;;  %v1572_v2 = vadd.f32 %v1568_v29, %v1560_v5 }
 0x291   :  { %v1659_v16 = vsel %vm1427_vm9, %v1655_v21, %v1649_v14  ;;  %v1656_v55 = vsel %vm1427_vm9, %v1653_v7, %v1655_v21  ;;  %v1657_v53 = vsel %vm1427_vm9, %v5072_v0, %v1653_v7 }
 0x292   :  { %v1667_v22 = vmul.f32 %v5332_v49, %v1659_v16  ;;  %v1665_v8 = vmul.f32 %v5337_v56, %v1657_v53  ;;  %v1666_v17 = vmul.f32 %v5342_v10, %v1656_v55  ;;  %v1592_v16 = vmul.f32 %v5364_v43, %v1586_v4 }
 0x293   :  { %v1610_v53 = vsel %vm1377_vm7, %v5217_v26, %v5066_v30  ;;  %v5393_v30 = vld [vmem:[%s6587_s4 + $0x100] sm:$0xff]  ;;  %v1658_v26 = vsel %vm1427_vm9, %v1649_v14, %v5072_v0 }
 0x294   :  { %v1671_v45 = vadd.f32 %v1667_v22, %v1647_v42  ;;  %v1669_v48 = vadd.f32 %v1665_v8, %v1645_v39  ;;  %v1670_v34 = vadd.f32 %v1666_v17, %v1646_v50  ;;  %v5374_v50 = vld [vmem:[%s6587_s4 + $0xc0] sm:$0xff]  ;;  %v1596_v57 = vadd.f32 %v1592_v16, %v1572_v2  ;;  %6671 = vst [vmem:[#allocation26_spill] sm:$0xff] %v5393_v30 }
 0x295   :  { %v5383_v22 = vld [vmem:[%s6587_s4 + $0xe0] sm:$0xff]  ;;  %v1634_v8 = vsel %vm1402_vm8, %v5277_v51, %v5070_v60  ;;  %v1616_v17 = vmul.f32 %v5374_v50, %v1610_v53  ;;  %v1664_v60 = vmul.f32 %v5393_v30, %v1658_v26 }
 0x296   :  { %v1690_v63 = vrot.slane %v1671_v45, 4  ;;  %v1678_v21 = vrot.slane %v1669_v48, 4  ;;  %v1684_v7 = vrot.slane %v1670_v34, 4  ;;  %v1640_v4 = vmul.f32 %v5383_v22, %v1634_v8 }
 0x298   :  { %v1691_v33 = vmax.f32 %v1671_v45, %v1690_v63  ;;  %v1679_v55 = vmax.f32 %v1669_v48, %v1678_v21  ;;  %v1685_v39 = vmax.f32 %v1670_v34, %v1684_v7  ;;  %v1620_v34 = vadd.f32 %v1616_v17, %v1596_v57 }
 0x29a   :  { %v1692_v62 = vrot.slane %v1691_v33, 2  ;;  %v1680_v5 = vrot.slane %v1679_v55, 2  ;;  %v1686_v42 = vrot.slane %v1685_v39, 2  ;;  %v1644_v16 = vadd.f32 %v1640_v4, %v1620_v34 }
 0x29c   :  { %v1693_v29 = vmax.f32 %v1691_v33, %v1692_v62  ;;  %v1681_v45 = vmax.f32 %v1679_v55, %v1680_v5  ;;  %v1687_v48 = vmax.f32 %v1685_v39, %v1686_v42  ;;  %v1668_v0 = vadd.f32 %v1664_v60, %v1644_v16 }
 0x29e   :  { %v1682_v2 = vrot.slane %v1681_v45, 1  ;;  %v1688_v63 = vrot.slane %v1687_v48, 1  ;;  %v1694_v51 = vrot.slane %v1693_v29, 1  ;;  %v1672_v33 = vrot.slane %v1668_v0, 4 }
 0x2a0   :  { %v5400_v21 = vmax.f32 %v1681_v45, %v1682_v2  ;;  %v5402_v7 = vmax.f32 %v1687_v48, %v1688_v63  ;;  %v5408_v14 = vmax.f32 %v1693_v29, %v1694_v51  ;;  %v1673_v55 = vmax.f32 %v1668_v0, %v1672_v33 }
 0x2a2   :  { %1698 = vrot.lane.b32.xlu0 %v5400_v21, %s4212_s24  ;;  %1700 = vrot.lane.b32.xlu1 %v5402_v7, %s4212_s24  ;;  %v1674_v39 = vrot.slane %v1673_v55, 2 }
 0x2a4   :  { %v1675_v53 = vmax.f32 %v1673_v55, %v1674_v39 }
 0x2a6   :  { %1702 = vrot.lane.b32.xlu0 %v5408_v14, %s4212_s24  ;;  %1720 = vrot.lane.b32.xlu1 %v5402_v7, %s4211_s0  ;;  %v1676_v57 = vrot.slane %v1675_v53, 1 }
 0x2a8   :  { %v5434_v62 = vmax.f32 %v1675_v53, %v1676_v57 }
 0x2aa   :  { %1718 = vrot.lane.b32.xlu0 %v5400_v21, %s4211_s0  ;;  %1740 = vrot.lane.b32.xlu1 %v5402_v7, %s4213_s25 }
 0x2ae   :  { %1722 = vrot.lane.b32.xlu0 %v5408_v14, %s4211_s0  ;;  %1760 = vrot.lane.b32.xlu1 %v5402_v7, %s4214_s26 }
 0x2b2   :  { %1738 = vrot.lane.b32.xlu0 %v5400_v21, %s4213_s25  ;;  %1788 = vrot.lane.b32.xlu1 %v5402_v7, %s4215_s27 }
 0x2b6   :  { %1742 = vrot.lane.b32.xlu0 %v5408_v14, %s4213_s25  ;;  %1808 = vrot.lane.b32.xlu1 %v5402_v7, %s4216_s28 }
 0x2ba   :  { %1758 = vrot.lane.b32.xlu0 %v5400_v21, %s4214_s26  ;;  %1828 = vrot.lane.b32.xlu1 %v5402_v7, %s4217_s29 }
 0x2be   :  { %1762 = vrot.lane.b32.xlu0 %v5408_v14, %s4214_s26  ;;  %1696 = vrot.lane.b32.xlu1 %v5434_v62, %s4212_s24 }
 0x2c2   :  { %1786 = vrot.lane.b32.xlu0 %v5400_v21, %s4215_s27  ;;  %1716 = vrot.lane.b32.xlu1 %v5434_v62, %s4211_s0 }
 0x2c6   :  { %1790 = vrot.lane.b32.xlu0 %v5408_v14, %s4215_s27  ;;  %1736 = vrot.lane.b32.xlu1 %v5434_v62, %s4213_s25 }
 0x2ca   :  { %1806 = vrot.lane.b32.xlu0 %v5400_v21, %s4216_s28  ;;  %1756 = vrot.lane.b32.xlu1 %v5434_v62, %s4214_s26 }
 0x2ce   :  { %1810 = vrot.lane.b32.xlu0 %v5408_v14, %s4216_s28  ;;  %1784 = vrot.lane.b32.xlu1 %v5434_v62, %s4215_s27 }
 0x2d2   :  { %1826 = vrot.lane.b32.xlu0 %v5400_v21, %s4217_s29  ;;  %1804 = vrot.lane.b32.xlu1 %v5434_v62, %s4216_s28 }
 0x2d6   :  { %1830 = vrot.lane.b32.xlu0 %v5408_v14, %s4217_s29  ;;  %1824 = vrot.lane.b32.xlu1 %v5434_v62, %s4217_s29 }
 0x2da   :  { %1846 = vrot.lane.b32.xlu0 %v5400_v21, %s4218_s30  ;;  %1844 = vrot.lane.b32.xlu1 %v5434_v62, %s4218_s30 }
 0x2de   :  { %1850 = vrot.lane.b32.xlu0 %v5408_v14, %s4218_s30  ;;  %1848 = vrot.lane.b32.xlu1 %v5402_v7, %s4218_s30 }
 0x314   :  { %v1699_v5 = vpop.permute.xlu0 %1698  ;;  %v1701_v42 = vpop.permute.xlu1 %1700 }
 0x315   :  { %v1705_v55 = vsel %vm1244_vm2, %v1699_v5, %v1701_v42 }
 0x316   :  { %v1710_v49 = vmul.f32 %v1705_v55, %v5113_v54 }
 0x318   :  { %v1703_v8 = vpop.permute.xlu0 %1702  ;;  %v1721_v17 = vpop.permute.xlu1 %1720 }
 0x319   :  { %v1704_v30 = vsel %vm1244_vm2, %v1701_v42, %v1703_v8 }
 0x31c   :  { %v1719_v29 = vpop.permute.xlu0 %1718  ;;  %v1741_v45 = vpop.permute.xlu1 %1740 }
 0x320   :  { %v1723_v48 = vpop.permute.xlu0 %1722  ;;  %v1761_v26 = vpop.permute.xlu1 %1760 }
 0x321   :  { %v1724_v52 = vsel %vm1265_vm3, %v1721_v17, %v1723_v48 }
 0x324   :  { %v1739_v34 = vpop.permute.xlu0 %1738  ;;  %v5472_v4 = vpop.permute.xlu1 %1788 }
 0x328   :  { %v1743_v2 = vpop.permute.xlu0 %1742  ;;  %v5474_v63 = vpop.permute.xlu1 %1808 }
 0x32c   :  { %v1759_v60 = vpop.permute.xlu0 %1758  ;;  %v5476_v51 = vpop.permute.xlu1 %1828 }
 0x330   :  { %v1763_v16 = vpop.permute.xlu0 %1762  ;;  %v1697_v0 = vpop.permute.xlu1 %1696 }
 0x331   :  { %v1706_v33 = vsel %vm1244_vm2, %v1697_v0, %v1699_v5  ;;  %v1707_v57 = vsel %vm1244_vm2, %v1703_v8, %v1697_v0  ;;  %v1725_v5 = vsel %vm1265_vm3, %v1719_v29, %v1721_v17  ;;  %v1745_v8 = vsel %vm1290_vm4, %v1739_v34, %v1741_v45 }
 0x332   :  { %v1709_v56 = vmul.f32 %v1706_v33, %v5077_v6  ;;  %v1708_v0 = vmul.f32 %v1707_v57, %v5208_v27  ;;  %v1730_v57 = vmul.f32 %v1725_v5, %v5134_v59 }
 0x334   :  { %v1787_v39 = vpop.permute.xlu0 %1786  ;;  %v1717_v53 = vpop.permute.xlu1 %1716  ;;  %v1712_v54 = vadd.f32 %v1708_v0, %v4988_v19 }
 0x335   :  { %v1726_v10 = vsel %vm1265_vm3, %v1717_v53, %v1719_v29  ;;  %v1727_v37 = vsel %vm1265_vm3, %v1723_v48, %v1717_v53  ;;  %v1713_v29 = vadd.f32 %v1709_v56, %v4920_v36  ;;  %v1714_v48 = vadd.f32 %v1710_v49, %v4922_v38 }
 0x336   :  { %v1729_v28 = vmul.f32 %v1726_v10, %v5086_v44  ;;  %v1728_v53 = vmul.f32 %v1727_v37, %v5231_v13  ;;  %v1711_v10 = vmul.f32 %v1704_v30, %v5103_v20  ;;  %v1731_v44 = vmul.f32 %v1724_v52, %v5122_v23 }
 0x337   :  { %v1744_v49 = vsel %vm1290_vm4, %v1741_v45, %v1743_v2  ;;  %v1764_v45 = vsel %vm1315_vm5, %v1761_v26, %v1763_v16 }
 0x338   :  { %v1791_v11 = vpop.permute.xlu0 %1790  ;;  %v1737_v33 = vpop.permute.xlu1 %1736  ;;  %v1732_v5 = vadd.f32 %v1728_v53, %v1712_v54  ;;  %v1751_v54 = vmul.f32 %v1744_v49, %v5145_v15 }
 0x339   :  { %v1746_v55 = vsel %vm1290_vm4, %v1737_v33, %v1739_v34  ;;  %v1747_v42 = vsel %vm1290_vm4, %v1743_v2, %v1737_v33  ;;  %v1765_v33 = vsel %vm1315_vm5, %v1759_v60, %v1761_v26  ;;  %v1733_v34 = vadd.f32 %v1729_v28, %v1713_v29 }
 0x33a   :  { %v1749_v17 = vmul.f32 %v1746_v55, %v5095_v35  ;;  %v1748_v56 = vmul.f32 %v1747_v42, %v5251_v40  ;;  %v1750_v55 = vmul.f32 %v1745_v8, %v5155_v25  ;;  %v1734_v42 = vadd.f32 %v1730_v57, %v1714_v48 }
 0x33b   :  { %v1770_v29 = vmul.f32 %v1765_v33, %v5175_v41  ;;  %v1715_v8 = vadd.f32 %v1711_v10, %v4995_v31  ;;  %v1771_v57 = vmul.f32 %v1764_v45, %v5170_v3  ;;  %v1793_v10 = vsel %vm1352_vm6, %v1787_v39, %v5472_v4 }
 0x33c   :  { %v1807_v36 = vpop.permute.xlu0 %1806  ;;  %v1757_v37 = vpop.permute.xlu1 %1756  ;;  %v1753_v38 = vadd.f32 %v1749_v17, %v1733_v34  ;;  %v1752_v2 = vadd.f32 %v1748_v56, %v1732_v5  ;;  %v1754_v23 = vadd.f32 %v1750_v55, %v1734_v42  ;;  %v1777_v17 = vmul.f32 %v5400_v21, %v5165_v46 }
 0x33d   :  { %v1766_v30 = vsel %vm1315_vm5, %v1757_v37, %v1759_v60  ;;  %v1767_v52 = vsel %vm1315_vm5, %v1763_v16, %v1757_v37  ;;  %v1735_v53 = vadd.f32 %v1731_v44, %v1715_v8  ;;  %v1778_v26 = vmul.f32 %v5402_v7, %v5193_v9 }
 0x33e   :  { %v1768_v0 = vmul.f32 %v1767_v52, %v5282_v18  ;;  %v1769_v28 = vmul.f32 %v1766_v30, %v5129_v47  ;;  %v1774_v48 = vadd.f32 %v1770_v29, %v1754_v23  ;;  %v1792_v44 = vsel %vm1352_vm6, %v5472_v4, %v1791_v11 }
 0x33f   :  { %v1776_v23 = vmul.f32 %v5434_v62, %v5347_v1  ;;  %v1755_v56 = vadd.f32 %v1751_v54, %v1735_v53  ;;  %v1813_v37 = vsel %vm1377_vm7, %v1807_v36, %v5474_v63  ;;  %v1797_v55 = vmul.f32 %v1793_v10, %v5199_v58 }
 0x340   :  { %v1773_v25 = vadd.f32 %v1769_v28, %v1753_v38  ;;  %v1811_v60 = vpop.permute.xlu0 %1810  ;;  %v1785_v35 = vpop.permute.xlu1 %1784  ;;  %v1772_v34 = vadd.f32 %v1768_v0, %v1752_v2  ;;  %v1782_v30 = vadd.f32 %v1778_v26, %v1774_v48  ;;  %v1798_v52 = vmul.f32 %v1792_v44, %v5243_v24  ;;  %v6673_v2 = vld [vmem:[#allocation18_spill] sm:$0xff]  ;;  %v6675_v26 = vld [vmem:[#allocation20_spill] sm:$0xff] }
 0x341   :  { %v1794_v38 = vsel %vm1352_vm6, %v1785_v35, %v1787_v39  ;;  %v1779_v39 = vmul.f32 %v5408_v14, %v5215_v12  ;;  %v1775_v49 = vadd.f32 %v1771_v57, %v1755_v56  ;;  %v1812_v5 = vsel %vm1377_vm7, %v5474_v63, %v1811_v60  ;;  %v6674_v57 = vld [vmem:[#allocation19_spill] sm:$0xff] }
 0x342   :  { %v1781_v16 = vadd.f32 %v1777_v17, %v1773_v25  ;;  %v1780_v4 = vadd.f32 %v1776_v23, %v1772_v34  ;;  %v1795_v25 = vsel %vm1352_vm6, %v1791_v11, %v1785_v35  ;;  %v1796_v62 = vmul.f32 %v1794_v38, %v5364_v43  ;;  %v6672_v11 = vld [vmem:[#allocation17_spill] sm:$0xff] }
 0x343   :  { %v1817_v14 = vmul.f32 %v1813_v37, %v5222_v32  ;;  %v1799_v29 = vmul.f32 %v1795_v25, %v6672_v11  ;;  %v1818_v54 = vmul.f32 %v1812_v5, %v6673_v2  ;;  %v1802_v34 = vadd.f32 %v1798_v52, %v1782_v30  ;;  %v6677_v37 = vld [vmem:[#allocation22_spill] sm:$0xff] }
 0x344   :  { %v1827_v21 = vpop.permute.xlu0 %1826  ;;  %v1805_v33 = vpop.permute.xlu1 %1804  ;;  %v1801_v0 = vadd.f32 %v1797_v55, %v1781_v16  ;;  %v1783_v48 = vadd.f32 %v1779_v39, %v1775_v49 }
 0x345   :  { %v1814_v7 = vsel %vm1377_vm7, %v1805_v33, %v1807_v36  ;;  %v1815_v36 = vsel %vm1377_vm7, %v1811_v60, %v1805_v33  ;;  %v1833_v8 = vsel %vm1402_vm8, %v1827_v21, %v5476_v51  ;;  %v1800_v60 = vadd.f32 %v1796_v62, %v1780_v4  ;;  %v6678_v62 = vld [vmem:[#allocation26_spill] sm:$0xff] }
 0x346   :  { %v1816_v28 = vmul.f32 %v1814_v7, %v5374_v50  ;;  %v1819_v10 = vmul.f32 %v1815_v36, %v6674_v57  ;;  %v1821_v38 = vadd.f32 %v1817_v14, %v1801_v0  ;;  %v1837_v44 = vmul.f32 %v1833_v8, %v6675_v26  ;;  %v6679_v8 = vld [vmem:[#allocation23_spill] sm:$0xff] }
 0x347   :  { %v1803_v56 = vadd.f32 %v1799_v29, %v1783_v48  ;;  %v1822_v4 = vadd.f32 %v1818_v54, %v1802_v34 }
 0x348   :  { %v1831_v42 = vpop.permute.xlu0 %1830  ;;  %v1825_v35 = vpop.permute.xlu1 %1824  ;;  %v1820_v16 = vadd.f32 %v1816_v28, %v1800_v60  ;;  %v1841_v30 = vadd.f32 %v1837_v44, %v1821_v38  ;;  %v6681_v60 = vld [vmem:[#allocation25_spill] sm:$0xff] }
 0x349   :  { %v1832_v63 = vsel %vm1402_vm8, %v5476_v51, %v1831_v42  ;;  %v1834_v45 = vsel %vm1402_vm8, %v1825_v35, %v1827_v21  ;;  %v1835_v53 = vsel %vm1402_vm8, %v1831_v42, %v1825_v35  ;;  %v6676_v51 = vld [vmem:[#allocation21_spill] sm:$0xff]  ;;  %v1823_v49 = vadd.f32 %v1819_v10, %v1803_v56 }
 0x34a   :  { %v1836_v17 = vmul.f32 %v1834_v45, %v5383_v22  ;;  %v1838_v23 = vmul.f32 %v1832_v63, %v6676_v51  ;;  %v1839_v7 = vmul.f32 %v1835_v53, %v6677_v37  ;;  %v6680_v45 = vld [vmem:[#allocation24_spill] sm:$0xff] }
 0x34c   :  { %v1847_v33 = vpop.permute.xlu0 %1846  ;;  %v1845_v21 = vpop.permute.xlu1 %1844  ;;  %v1840_v25 = vadd.f32 %v1836_v17, %v1820_v16  ;;  %v1842_v52 = vadd.f32 %v1838_v23, %v1822_v4  ;;  %v1843_v36 = vadd.f32 %v1839_v7, %v1823_v49 }
 0x34d   :  { %v1854_v55 = vsel %vm1427_vm9, %v1845_v21, %v1847_v33 }
 0x34e   :  { %v1856_v39 = vmul.f32 %v1854_v55, %v6678_v62 }
 0x350   :  { %v1860_v5 = vadd.f32 %v1856_v39, %v1840_v25  ;;  %v1851_v14 = vpop.permute.xlu0 %1850  ;;  %v1849_v0 = vpop.permute.xlu1 %1848 }
 0x351   :  { %v1855_v28 = vsel %vm1427_vm9, %v1851_v14, %v1845_v21  ;;  %v1852_v42 = vsel %vm1427_vm9, %v1849_v0, %v1851_v14  ;;  %v1853_v35 = vsel %vm1427_vm9, %v1847_v33, %v1849_v0 }
 0x352   :  { %v1864_v29 = vrot.slane %v1860_v5, 4  ;;  %v1859_v63 = vmul.f32 %v1855_v28, %v6679_v8  ;;  %v1857_v54 = vmul.f32 %v1853_v35, %v6680_v45  ;;  %v1858_v53 = vmul.f32 %v1852_v42, %v6681_v60  ;;  %v6682_v60 = vld [vmem:[#allocation14_spill] sm:$0xff] }
 0x354   :  { %v1865_v17 = vmax.f32 %v1860_v5, %v1864_v29  ;;  %v1863_v34 = vadd.f32 %v1859_v63, %v1843_v36  ;;  %v1861_v48 = vadd.f32 %v1857_v54, %v1841_v30  ;;  %v1862_v10 = vadd.f32 %v1858_v53, %v1842_v52 }
 0x356   :  { %v1866_v38 = vrot.slane %v1865_v17, 2  ;;  %v1882_v44 = vrot.slane %v1863_v34, 4  ;;  %v1870_v16 = vrot.slane %v1861_v48, 4  ;;  %v1876_v23 = vrot.slane %v1862_v10, 4 }
 0x358   :  { %v1867_v21 = vmax.f32 %v1865_v17, %v1866_v38  ;;  %v1883_v56 = vmax.f32 %v1863_v34, %v1882_v44  ;;  %v1871_v7 = vmax.f32 %v1861_v48, %v1870_v16  ;;  %v1877_v55 = vmax.f32 %v1862_v10, %v1876_v23 }
 0x35a   :  { %v1868_v33 = vrot.slane %v1867_v21, 1  ;;  %v1884_v4 = vrot.slane %v1883_v56, 2  ;;  %v1872_v25 = vrot.slane %v1871_v7, 2  ;;  %v1878_v39 = vrot.slane %v1877_v55, 2 }
 0x35c   :  { %v5592_v49 = vmax.f32 %v1867_v21, %v1868_v33  ;;  %v1885_v14 = vmax.f32 %v1883_v56, %v1884_v4  ;;  %v1873_v0 = vmax.f32 %v1871_v7, %v1872_v25  ;;  %v1879_v5 = vmax.f32 %v1877_v55, %v1878_v39 }
 0x35e   :  { %v1874_v36 = vrot.slane %v1873_v0, 1  ;;  %v1880_v30 = vrot.slane %v1879_v5, 1  ;;  %1888 = vrot.lane.b32.xlu1 %v5592_v49, %s4212_s24  ;;  %v1886_v52 = vrot.slane %v1885_v14, 1 }
 0x360   :  { %v5596_v28 = vmax.f32 %v1873_v0, %v1874_v36  ;;  %v5598_v42 = vmax.f32 %v1879_v5, %v1880_v30  ;;  %v5604_v35 = vmax.f32 %v1885_v14, %v1886_v52 }
 0x362   :  { %1890 = vrot.lane.b32.xlu0 %v5596_v28, %s4212_s24  ;;  %1892 = vrot.lane.b32.xlu1 %v5598_v42, %s4212_s24 }
 0x366   :  { %1894 = vrot.lane.b32.xlu0 %v5604_v35, %s4212_s24  ;;  %1908 = vrot.lane.b32.xlu1 %v5592_v49, %s4211_s0 }
 0x36a   :  { %1910 = vrot.lane.b32.xlu0 %v5596_v28, %s4211_s0  ;;  %1912 = vrot.lane.b32.xlu1 %v5598_v42, %s4211_s0 }
 0x36e   :  { %1914 = vrot.lane.b32.xlu0 %v5604_v35, %s4211_s0  ;;  %1928 = vrot.lane.b32.xlu1 %v5592_v49, %s4213_s25 }
 0x372   :  { %1930 = vrot.lane.b32.xlu0 %v5596_v28, %s4213_s25  ;;  %1932 = vrot.lane.b32.xlu1 %v5598_v42, %s4213_s25 }
 0x376   :  { %1934 = vrot.lane.b32.xlu0 %v5604_v35, %s4213_s25  ;;  %1948 = vrot.lane.b32.xlu1 %v5592_v49, %s4214_s26 }
 0x37a   :  { %1950 = vrot.lane.b32.xlu0 %v5596_v28, %s4214_s26  ;;  %1952 = vrot.lane.b32.xlu1 %v5598_v42, %s4214_s26 }
 0x37e   :  { %1954 = vrot.lane.b32.xlu0 %v5604_v35, %s4214_s26  ;;  %1976 = vrot.lane.b32.xlu1 %v5592_v49, %s4215_s27 }
 0x382   :  { %1978 = vrot.lane.b32.xlu0 %v5596_v28, %s4215_s27  ;;  %1980 = vrot.lane.b32.xlu1 %v5598_v42, %s4215_s27 }
 0x386   :  { %1982 = vrot.lane.b32.xlu0 %v5604_v35, %s4215_s27  ;;  %1996 = vrot.lane.b32.xlu1 %v5592_v49, %s4216_s28 }
 0x38a   :  { %1998 = vrot.lane.b32.xlu0 %v5596_v28, %s4216_s28  ;;  %2000 = vrot.lane.b32.xlu1 %v5598_v42, %s4216_s28 }
 0x38e   :  { %2002 = vrot.lane.b32.xlu0 %v5604_v35, %s4216_s28  ;;  %2016 = vrot.lane.b32.xlu1 %v5592_v49, %s4217_s29 }
 0x392   :  { %2018 = vrot.lane.b32.xlu0 %v5596_v28, %s4217_s29  ;;  %2020 = vrot.lane.b32.xlu1 %v5598_v42, %s4217_s29 }
 0x396   :  { %2022 = vrot.lane.b32.xlu0 %v5604_v35, %s4217_s29  ;;  %2036 = vrot.lane.b32.xlu1 %v5592_v49, %s4218_s30 }
 0x39a   :  { %2038 = vrot.lane.b32.xlu0 %v5596_v28, %s4218_s30  ;;  %2040 = vrot.lane.b32.xlu1 %v5598_v42, %s4218_s30 }
 0x39e   :  { %2042 = vrot.lane.b32.xlu0 %v5604_v35, %s4218_s30 }
 0x3d0   :  { %v1889_v29 = vpop.permute.xlu1 %1888 }
 0x3d4   :  { %v1891_v63 = vpop.permute.xlu0 %1890  ;;  %v1893_v54 = vpop.permute.xlu1 %1892 }
 0x3d5   :  { %v1898_v4 = vsel %vm1244_vm2, %v1889_v29, %v1891_v63  ;;  %v1897_v5 = vsel %vm1244_vm2, %v1891_v63, %v1893_v54 }
 0x3d6   :  { %v1901_v0 = vmul.f32 %v1898_v4, %v5077_v6  ;;  %v1902_v45 = vmul.f32 %v1897_v5, %v6682_v60  ;;  %v6684_v5 = vld [vmem:[#allocation12_spill] sm:$0xff] }
 0x3d8   :  { %v1895_v53 = vpop.permute.xlu0 %1894  ;;  %v1909_v17 = vpop.permute.xlu1 %1908 }
 0x3d9   :  { %v1899_v25 = vsel %vm1244_vm2, %v1895_v53, %v1889_v29  ;;  %v1896_v30 = vsel %vm1244_vm2, %v1893_v54, %v1895_v53 }
 0x3da   :  { %v1900_v52 = vmul.f32 %v1899_v25, %v5208_v27  ;;  %v6683_v27 = vld [vmem:[#allocation9_spill] sm:$0xff] }
 0x3db   :  { %v1905_v53 = vadd.f32 %v1901_v0, %v6683_v27  ;;  %v6685_v0 = vld [vmem:[#allocation15_spill] sm:$0xff]  ;;  %v6686_v27 = vld [vmem:[#allocation13_spill] sm:$0xff] }
 0x3dc   :  { %v1911_v34 = vpop.permute.xlu0 %1910  ;;  %v1913_v48 = vpop.permute.xlu1 %1912 }
 0x3dd   :  { %v1918_v8 = vsel %vm1265_vm3, %v1909_v17, %v1911_v34  ;;  %v1917_v6 = vsel %vm1265_vm3, %v1911_v34, %v1913_v48  ;;  %v1904_v34 = vadd.f32 %v1900_v52, %v4988_v19 }
 0x3de   :  { %v1921_v37 = vmul.f32 %v1918_v8, %v6684_v5 }
 0x3e0   :  { %v1915_v10 = vpop.permute.xlu0 %1914  ;;  %v1929_v38 = vpop.permute.xlu1 %1928 }
 0x3e1   :  { %v1919_v36 = vsel %vm1265_vm3, %v1915_v10, %v1909_v17  ;;  %v1916_v63 = vsel %vm1265_vm3, %v1913_v48, %v1915_v10  ;;  %v1903_v17 = vmul.f32 %v1896_v30, %v5103_v20  ;;  %v1922_v10 = vmul.f32 %v1917_v6, %v5134_v59 }
 0x3e2   :  { %v1920_v4 = vmul.f32 %v1919_v36, %v5231_v13  ;;  %v1923_v36 = vmul.f32 %v1916_v63, %v6685_v0  ;;  %v6688_v63 = vld [vmem:[#allocation16_spill] sm:$0xff] }
 0x3e3   :  { %v1907_v6 = vadd.f32 %v1903_v17, %v4995_v31 }
 0x3e4   :  { %v1931_v44 = vpop.permute.xlu0 %1930  ;;  %v1933_v16 = vpop.permute.xlu1 %1932  ;;  %v1924_v30 = vadd.f32 %v1920_v4, %v1904_v34 }
 0x3e5   :  { %v1938_v25 = vsel %vm1290_vm4, %v1929_v38, %v1931_v44  ;;  %v1937_v13 = vsel %vm1290_vm4, %v1931_v44, %v1933_v16 }
 0x3e6   :  { %v1941_v52 = vmul.f32 %v1938_v25, %v6686_v27  ;;  %v1942_v0 = vmul.f32 %v1937_v13, %v6688_v63  ;;  %v1927_v25 = vadd.f32 %v1923_v36, %v1907_v6 }
 0x3e8   :  { %v1935_v23 = vpop.permute.xlu0 %1934  ;;  %v1949_v21 = vpop.permute.xlu1 %1948 }
 0x3e9   :  { %v1939_v29 = vsel %vm1290_vm4, %v1935_v23, %v1929_v38  ;;  %v1936_v20 = vsel %vm1290_vm4, %v1933_v16, %v1935_v23  ;;  %v1925_v23 = vadd.f32 %v1921_v37, %v1905_v53 }
 0x3ea   :  { %v1940_v48 = vmul.f32 %v1939_v29, %v5251_v40  ;;  %v6687_v29 = vld [vmem:[#allocation10_spill] sm:$0xff] }
 0x3eb   :  { %v1906_v59 = vadd.f32 %v1902_v45, %v6687_v29 }
 0x3ec   :  { %v1951_v56 = vpop.permute.xlu0 %1950  ;;  %v1953_v7 = vpop.permute.xlu1 %1952  ;;  %v1944_v4 = vadd.f32 %v1940_v48, %v1924_v30 }
 0x3ed   :  { %v1958_v38 = vsel %vm1315_vm5, %v1949_v21, %v1951_v56  ;;  %v1957_v8 = vsel %vm1315_vm5, %v1951_v56, %v1953_v7  ;;  %v1926_v56 = vadd.f32 %v1922_v10, %v1906_v59 }
 0x3ee   :  { %v1961_v27 = vmul.f32 %v1958_v38, %v5129_v47 }
 0x3ef   :  { %v1946_v13 = vadd.f32 %v1942_v0, %v1926_v56 }
 0x3f0   :  { %v1955_v55 = vpop.permute.xlu0 %1954  ;;  %v5664_v33 = vpop.permute.xlu1 %1976 }
 0x3f1   :  { %v1959_v60 = vsel %vm1315_vm5, %v1955_v55, %v1949_v21  ;;  %v1956_v16 = vsel %vm1315_vm5, %v1953_v7, %v1955_v55  ;;  %v1943_v21 = vmul.f32 %v1936_v20, %v5145_v15  ;;  %v1968_v7 = vmul.f32 %v5592_v49, %v5347_v1 }
 0x3f2   :  { %v1960_v44 = vmul.f32 %v1959_v60, %v5282_v18  ;;  %v1962_v18 = vmul.f32 %v1957_v8, %v5175_v41  ;;  %v1945_v60 = vadd.f32 %v1941_v52, %v1925_v23  ;;  %v1963_v45 = vmul.f32 %v1956_v16, %v5170_v3 }
 0x3f3   :  { %v1947_v37 = vadd.f32 %v1943_v21, %v1927_v25  ;;  %v1969_v3 = vmul.f32 %v5596_v28, %v5165_v46  ;;  %v6690_v25 = vld [vmem:[#allocation26_spill] sm:$0xff] }
 0x3f4   :  { %v1979_v39 = vpop.permute.xlu0 %1978  ;;  %v1981_v14 = vpop.permute.xlu1 %1980  ;;  %v1964_v34 = vadd.f32 %v1960_v44, %v1944_v4  ;;  %v1965_v55 = vadd.f32 %v1961_v27, %v1945_v60  ;;  %v1966_v41 = vadd.f32 %v1962_v18, %v1946_v13  ;;  %v6689_v27 = vld [vmem:[#allocation22_spill] sm:$0xff]  ;;  %v6691_v60 = vld [vmem:[#allocation24_spill] sm:$0xff] }
 0x3f5   :  { %v1986_v47 = vsel %vm1352_vm6, %v5664_v33, %v1979_v39  ;;  %v1985_v15 = vsel %vm1352_vm6, %v1979_v39, %v1981_v14  ;;  %v1967_v53 = vadd.f32 %v1963_v45, %v1947_v37 }
 0x3f6   :  { %v1972_v48 = vadd.f32 %v1968_v7, %v1964_v34  ;;  %v1988_v20 = vmul.f32 %v1986_v47, %v5364_v43  ;;  %v1989_v38 = vmul.f32 %v1985_v15, %v5199_v58  ;;  %v1973_v28 = vadd.f32 %v1969_v3, %v1965_v55 }
 0x3f8   :  { %v1983_v62 = vpop.permute.xlu0 %1982  ;;  %v5688_v54 = vpop.permute.xlu1 %1996 }
 0x3f9   :  { %v1984_v10 = vsel %vm1352_vm6, %v1981_v14, %v1983_v62  ;;  %v1987_v1 = vsel %vm1352_vm6, %v1983_v62, %v5664_v33  ;;  %v1971_v14 = vmul.f32 %v5604_v35, %v5215_v12  ;;  %v1970_v62 = vmul.f32 %v5598_v42, %v5193_v9 }
 0x3fa   :  { %v1990_v33 = vmul.f32 %v1984_v10, %v5243_v24  ;;  %v1991_v43 = vmul.f32 %v1987_v1, %v6672_v11  ;;  %v1992_v11 = vadd.f32 %v1988_v20, %v1972_v48  ;;  %v1993_v35 = vadd.f32 %v1989_v38, %v1973_v28  ;;  %v6693_v10 = vld [vmem:[#allocation23_spill] sm:$0xff] }
 0x3fb   :  { %v1974_v44 = vadd.f32 %v1970_v62, %v1966_v41 }
 0x3fc   :  { %v1999_v5 = vpop.permute.xlu0 %1998  ;;  %v2001_v40 = vpop.permute.xlu1 %2000 }
 0x3fd   :  { %v2006_v39 = vsel %vm1377_vm7, %v5688_v54, %v1999_v5  ;;  %v2005_v46 = vsel %vm1377_vm7, %v1999_v5, %v2001_v40  ;;  %v1975_v5 = vadd.f32 %v1971_v14, %v1967_v53  ;;  %v1994_v63 = vadd.f32 %v1990_v33, %v1974_v44  ;;  %v6692_v53 = vld [vmem:[#allocation25_spill] sm:$0xff] }
 0x3fe   :  { %v2008_v52 = vmul.f32 %v2006_v39, %v5374_v50  ;;  %v2009_v8 = vmul.f32 %v2005_v46, %v5222_v32 }
 0x3ff   :  { %v1995_v0 = vadd.f32 %v1991_v43, %v1975_v5 }
 0x400   :  { %v2003_v17 = vpop.permute.xlu0 %2002  ;;  %v2017_v31 = vpop.permute.xlu1 %2016  ;;  %v2012_v16 = vadd.f32 %v2008_v52, %v1992_v11  ;;  %v2013_v23 = vadd.f32 %v2009_v8, %v1993_v35 }
 0x401   :  { %v2004_v12 = vsel %vm1377_vm7, %v2001_v40, %v2003_v17  ;;  %v2007_v9 = vsel %vm1377_vm7, %v2003_v17, %v5688_v54 }
 0x402   :  { %v2010_v40 = vmul.f32 %v2004_v12, %v6673_v2  ;;  %v2011_v54 = vmul.f32 %v2007_v9, %v6674_v57 }
 0x404   :  { %v2019_v49 = vpop.permute.xlu0 %2018  ;;  %v2021_v36 = vpop.permute.xlu1 %2020  ;;  %v2014_v34 = vadd.f32 %v2010_v40, %v1994_v63  ;;  %v2015_v17 = vadd.f32 %v2011_v54, %v1995_v0 }
 0x405   :  { %v2026_v58 = vsel %vm1402_vm8, %v2017_v31, %v2019_v49  ;;  %v2025_v30 = vsel %vm1402_vm8, %v2019_v49, %v2021_v36 }
 0x406   :  { %v2028_v59 = vmul.f32 %v2026_v58, %v5383_v22  ;;  %v2029_v6 = vmul.f32 %v2025_v30, %v6675_v26 }
 0x408   :  { %v2023_v24 = vpop.permute.xlu0 %2022  ;;  %v2037_v42 = vpop.permute.xlu1 %2036  ;;  %v2032_v18 = vadd.f32 %v2028_v59, %v2012_v16  ;;  %v2033_v2 = vadd.f32 %v2029_v6, %v2013_v23  ;;  %v2443_v6 = vld [vmem:[%s6589_s6] sm:$0xff] }
 0x409   :  { %v2024_v32 = vsel %vm1402_vm8, %v2021_v36, %v2023_v24  ;;  %v2027_v50 = vsel %vm1402_vm8, %v2023_v24, %v2017_v31 }
 0x40a   :  { %v2030_v22 = vmul.f32 %v2024_v32, %v6676_v51  ;;  %v2031_v26 = vmul.f32 %v2027_v50, %v6689_v27 }
 0x40c   :  { %v2039_v21 = vpop.permute.xlu0 %2038  ;;  %v2041_v4 = vpop.permute.xlu1 %2040  ;;  %v2034_v51 = vadd.f32 %v2030_v22, %v2014_v34  ;;  %v2035_v55 = vadd.f32 %v2031_v26, %v2015_v17  ;;  %v5877_v17 = vld [vmem:[%s6587_s4 + $0x50] sm:$0xff] }
 0x40d   :  { %v2046_v56 = vsel %vm1427_vm9, %v2037_v42, %v2039_v21  ;;  %v2045_v31 = vsel %vm1427_vm9, %v2039_v21, %v2041_v4 }
 0x40e   :  { %v2048_v57 = vmul.f32 %v2046_v56, %v6690_v25  ;;  %v2049_v45 = vmul.f32 %v2045_v31, %v6691_v60  ;;  %v5862_v31 = vld [vmem:[%s6587_s4 + $0x10] sm:$0xff] }
 0x40f   :  { %v5870_v25 = vld [vmem:[%s6587_s4 + $0x30] sm:$0xff] }
 0x410   :  { %v2052_v13 = vadd.f32 %v2048_v57, %v2032_v18  ;;  %v2053_v7 = vadd.f32 %v2049_v45, %v2033_v2  ;;  %v2043_v37 = vpop.permute.xlu0 %2042 }
 0x411   :  { %v2044_v47 = vsel %vm1427_vm9, %v2041_v4, %v2043_v37  ;;  %v2047_v15 = vsel %vm1427_vm9, %v2043_v37, %v2037_v42 }
 0x412   :  { %v2056_v41 = vrot.slane %v2052_v13, 4  ;;  %v2062_v3 = vrot.slane %v2053_v7, 4  ;;  %v2050_v48 = vmul.f32 %v2044_v47, %v6692_v53  ;;  %v2051_v1 = vmul.f32 %v2047_v15, %v6693_v10  ;;  %v5885_v15 = vld [vmem:[%s6587_s4 + $0x70] sm:$0xff] }
 0x413   :  { %v5895_v10 = vld [vmem:[%s6587_s4 + $0x90] sm:$0xff] }
 0x414   :  { %v2057_v49 = vmax.f32 %v2052_v13, %v2056_v41  ;;  %v2063_v36 = vmax.f32 %v2053_v7, %v2062_v3  ;;  %v2054_v20 = vadd.f32 %v2050_v48, %v2034_v51  ;;  %v2055_v38 = vadd.f32 %v2051_v1, %v2035_v55 }
 0x416   :  { %v2058_v39 = vrot.slane %v2057_v49, 2  ;;  %v2064_v46 = vrot.slane %v2063_v36, 2  ;;  %v2068_v28 = vrot.slane %v2054_v20, 4  ;;  %v2074_v14 = vrot.slane %v2055_v38, 4 }
 0x418   :  { %v2059_v62 = vmax.f32 %v2057_v49, %v2058_v39  ;;  %v2065_v33 = vmax.f32 %v2063_v36, %v2064_v46  ;;  %v2069_v43 = vmax.f32 %v2054_v20, %v2068_v28  ;;  %v2075_v58 = vmax.f32 %v2055_v38, %v2074_v14  ;;  %v5908_v38 = vld [vmem:[%s6587_s4] sm:$0xff] }
 0x41a   :  { %v2060_v30 = vrot.slane %v2059_v62, 1  ;;  %v2066_v52 = vrot.slane %v2065_v33, 1  ;;  %v2070_v8 = vrot.slane %v2069_v43, 2  ;;  %v2076_v12 = vrot.slane %v2075_v58, 2 }
 0x41c   :  { %v5780_v9 = vmax.f32 %v2059_v62, %v2060_v30  ;;  %v5782_v24 = vmax.f32 %v2065_v33, %v2066_v52  ;;  %v2071_v42 = vmax.f32 %v2069_v43, %v2070_v8  ;;  %v2077_v11 = vmax.f32 %v2075_v58, %v2076_v12  ;;  %v5922_v33 = vld [vmem:[%s6587_s4 + $0x20] sm:$0xff] }
 0x41d   :  { %v5935_v12 = vld [vmem:[%s6587_s4 + $0x40] sm:$0xff] }
 0x41e   :  { %v2072_v35 = vrot.slane %v2071_v42, 1  ;;  %v2078_v44 = vrot.slane %v2077_v11, 1  ;;  %2082 = vrot.lane.b32.xlu0 %v5782_v24, %s4212_s24  ;;  %2080 = vrot.lane.b32.xlu1 %v5780_v9, %s4212_s24 }
 0x420   :  { %v5788_v5 = vmax.f32 %v2071_v42, %v2072_v35  ;;  %v5790_v59 = vmax.f32 %v2077_v11, %v2078_v44  ;;  %v5941_v44 = vld [vmem:[%s6587_s4 + $0x18] sm:$0xff] }
 0x422   :  { %2084 = vrot.lane.b32.xlu0 %v5788_v5, %s4212_s24  ;;  %2086 = vrot.lane.b32.xlu1 %v5790_v59, %s4212_s24  ;;  %v2162_v1 = vmul.f32 %v5895_v10, %v5788_v5 }
 0x426   :  { %2102 = vrot.lane.b32.xlu0 %v5782_v24, %s4211_s0  ;;  %2100 = vrot.lane.b32.xlu1 %v5780_v9, %s4211_s0 }
 0x42a   :  { %2104 = vrot.lane.b32.xlu0 %v5788_v5, %s4211_s0  ;;  %2106 = vrot.lane.b32.xlu1 %v5790_v59, %s4211_s0 }
 0x42e   :  { %2122 = vrot.lane.b32.xlu0 %v5782_v24, %s4213_s25  ;;  %2120 = vrot.lane.b32.xlu1 %v5780_v9, %s4213_s25 }
 0x432   :  { %2124 = vrot.lane.b32.xlu0 %v5788_v5, %s4213_s25  ;;  %2126 = vrot.lane.b32.xlu1 %v5790_v59, %s4213_s25 }
 0x436   :  { %2142 = vrot.lane.b32.xlu0 %v5782_v24, %s4214_s26  ;;  %2140 = vrot.lane.b32.xlu1 %v5780_v9, %s4214_s26 }
 0x43a   :  { %2144 = vrot.lane.b32.xlu0 %v5788_v5, %s4214_s26  ;;  %2146 = vrot.lane.b32.xlu1 %v5790_v59, %s4214_s26 }
 0x43e   :  { %2170 = vrot.lane.b32.xlu0 %v5782_v24, %s4215_s27  ;;  %2168 = vrot.lane.b32.xlu1 %v5780_v9, %s4215_s27 }
 0x442   :  { %2174 = vrot.lane.b32.xlu0 %v5790_v59, %s4215_s27  ;;  %2172 = vrot.lane.b32.xlu1 %v5788_v5, %s4215_s27 }
 0x446   :  { %2190 = vrot.lane.b32.xlu0 %v5782_v24, %s4216_s28  ;;  %2188 = vrot.lane.b32.xlu1 %v5780_v9, %s4216_s28 }
 0x44a   :  { %2194 = vrot.lane.b32.xlu0 %v5790_v59, %s4216_s28  ;;  %2192 = vrot.lane.b32.xlu1 %v5788_v5, %s4216_s28 }
 0x44e   :  { %2210 = vrot.lane.b32.xlu0 %v5782_v24, %s4217_s29  ;;  %2208 = vrot.lane.b32.xlu1 %v5780_v9, %s4217_s29 }
 0x452   :  { %2214 = vrot.lane.b32.xlu0 %v5790_v59, %s4217_s29  ;;  %2212 = vrot.lane.b32.xlu1 %v5788_v5, %s4217_s29 }
 0x456   :  { %2230 = vrot.lane.b32.xlu0 %v5782_v24, %s4218_s30  ;;  %2228 = vrot.lane.b32.xlu1 %v5780_v9, %s4218_s30 }
 0x45a   :  { %2234 = vrot.lane.b32.xlu0 %v5790_v59, %s4218_s30  ;;  %2232 = vrot.lane.b32.xlu1 %v5788_v5, %s4218_s30 }
 0x45e   :  { %2445 = vperm.xlu1 %4120, %v2443_v6  }
 0x490   :  { %v2083_v32 = vpop.permute.xlu0 %2082  ;;  %v2081_v50 = vpop.permute.xlu1 %2080 }
 0x491   :  { %v2090_v58 = vsel %vm1244_vm2, %v2081_v50, %v2083_v32 }
 0x494   :  { %v2085_v40 = vpop.permute.xlu0 %2084  ;;  %v2087_v54 = vpop.permute.xlu1 %2086 }
 0x495   :  { %v2089_v22 = vsel %vm1244_vm2, %v2083_v32, %v2085_v40  ;;  %v2091_v49 = vsel %vm1244_vm2, %v2087_v54, %v2081_v50  ;;  %v2088_v62 = vsel %vm1244_vm2, %v2085_v40, %v2087_v54  ;;  %v5949_v32 = vld [vmem:[%s6587_s4 + $0x8] sm:$0xff] }
 0x496   :  { %v2094_v18 = vmul.f32 %v5862_v31, %v2089_v22  ;;  %v2092_v39 = vmul.f32 %v5908_v38, %v2091_v49  ;;  %v2095_v5 = vmul.f32 %v5941_v44, %v2088_v62  ;;  %v2093_v50 = vmul.f32 %v5949_v32, %v2090_v58 }
 0x498   :  { %v2103_v63 = vpop.permute.xlu0 %2102  ;;  %v2101_v0 = vpop.permute.xlu1 %2100  ;;  %v2098_v34 = vadd.f32 %v2094_v18, %v6687_v29  ;;  %v2096_v52 = vadd.f32 %v2092_v39, %v4988_v19 }
 0x499   :  { %v2110_v6 = vsel %vm1265_vm3, %v2101_v0, %v2103_v63 }
 0x49c   :  { %v2105_v16 = vpop.permute.xlu0 %2104  ;;  %v2107_v23 = vpop.permute.xlu1 %2106 }
 0x49d   :  { %v2109_v56 = vsel %vm1265_vm3, %v2103_v63, %v2105_v16  ;;  %v2111_v20 = vsel %vm1265_vm3, %v2107_v23, %v2101_v0  ;;  %v2108_v8 = vsel %vm1265_vm3, %v2105_v16, %v2107_v23  ;;  %v5957_v16 = vld [vmem:[%s6587_s4 + $0x60] sm:$0xff]  ;;  %v5963_v63 = vld [vmem:[%s6587_s4 + $0x38] sm:$0xff] }
 0x49e   :  { %v2114_v57 = vmul.f32 %v5870_v25, %v2109_v56  ;;  %v2112_v43 = vmul.f32 %v5922_v33, %v2111_v20  ;;  %v2115_v0 = vmul.f32 %v5963_v63, %v2108_v8  ;;  %v6009_v20 = vld [vmem:[%s6587_s4 + $0x68] sm:$0xff] }
 0x4a0   :  { %v2123_v21 = vpop.permute.xlu0 %2122  ;;  %v2121_v4 = vpop.permute.xlu1 %2120  ;;  %v2118_v7 = vadd.f32 %v2114_v57, %v2098_v34  ;;  %v2116_v40 = vadd.f32 %v2112_v43, %v2096_v52  ;;  %v6694_v34 = vld [vmem:[#allocation11_spill] sm:$0xff] }
 0x4a1   :  { %v2130_v22 = vsel %vm1290_vm4, %v2121_v4, %v2123_v21 }
 0x4a4   :  { %v2125_v27 = vpop.permute.xlu0 %2124  ;;  %v2127_v26 = vpop.permute.xlu1 %2126 }
 0x4a5   :  { %v2129_v2 = vsel %vm1290_vm4, %v2123_v21, %v2125_v27  ;;  %v2131_v14 = vsel %vm1290_vm4, %v2127_v26, %v2121_v4  ;;  %v2128_v54 = vsel %vm1290_vm4, %v2125_v27, %v2127_v26  ;;  %v5971_v27 = vld [vmem:[%s6587_s4 + $0x28] sm:$0xff]  ;;  %v5984_v21 = vld [vmem:[%s6587_s4 + $0x58] sm:$0xff] }
 0x4a6   :  { %v2134_v13 = vmul.f32 %v5877_v17, %v2129_v2  ;;  %v2132_v42 = vmul.f32 %v5935_v12, %v2131_v14  ;;  %v2113_v26 = vmul.f32 %v5971_v27, %v2110_v6  ;;  %v2135_v4 = vmul.f32 %v5984_v21, %v2128_v54  ;;  %v6015_v14 = vld [vmem:[%s6587_s4 + $0x80] sm:$0xff] }
 0x4a7   :  { %v2160_v62 = vmul.f32 %v6015_v14, %v5780_v9 }
 0x4a8   :  { %v2143_v60 = vpop.permute.xlu0 %2142  ;;  %v2141_v45 = vpop.permute.xlu1 %2140  ;;  %v2138_v47 = vadd.f32 %v2134_v13, %v2118_v7  ;;  %v2136_v56 = vadd.f32 %v2132_v42, %v2116_v40  ;;  %v2099_v13 = vadd.f32 %v2095_v5, %v6694_v34  ;;  %v6024_v5 = vld [vmem:[%s6587_s4 + $0xa0] sm:$0xff] }
 0x4a9   :  { %v2150_v7 = vsel %vm1315_vm5, %v2141_v45, %v2143_v60 }
 0x4aa   :  { %v2153_v39 = vmul.f32 %v6009_v20, %v2150_v7 }
 0x4ac   :  { %v2145_v37 = vpop.permute.xlu0 %2144  ;;  %v2147_v51 = vpop.permute.xlu1 %2146 }
 0x4ad   :  { %v2149_v55 = vsel %vm1315_vm5, %v2143_v60, %v2145_v37  ;;  %v2151_v30 = vsel %vm1315_vm5, %v2147_v51, %v2141_v45  ;;  %v2148_v18 = vsel %vm1315_vm5, %v2145_v37, %v2147_v51  ;;  %v5993_v37 = vld [vmem:[%s6587_s4 + $0x48] sm:$0xff] }
 0x4ae   :  { %v2154_v41 = vmul.f32 %v5885_v15, %v2149_v55  ;;  %v2152_v23 = vmul.f32 %v5957_v16, %v2151_v30  ;;  %v6695_v55 = vld [vmem:[#allocation9_spill] sm:$0xff]  ;;  %v2133_v51 = vmul.f32 %v5993_v37, %v2130_v22 }
 0x4b0   :  { %v2158_v3 = vadd.f32 %v2154_v41, %v2138_v47  ;;  %v5888_v53 = vpop.permute.xlu0 %2170  ;;  %v5890_v48 = vpop.permute.xlu1 %2168  ;;  %v2097_v47 = vadd.f32 %v2093_v50, %v6695_v55  ;;  %v2156_v41 = vadd.f32 %v2152_v23, %v2136_v56 }
 0x4b1   :  { %v2178_v60 = vsel %vm1352_vm6, %v5890_v48, %v5888_v53 }
 0x4b2   :  { %v5901_v36 = vadd.f32 %v2162_v1, %v2158_v3  ;;  %v2119_v3 = vadd.f32 %v2115_v0, %v2099_v13  ;;  %v5999_v1 = vld [vmem:[%s6587_s4 + $0x78] sm:$0xff]  ;;  %v2117_v45 = vadd.f32 %v2113_v26, %v2097_v47  ;;  %v2164_v42 = vadd.f32 %v2160_v62, %v2156_v41  ;;  %v6040_v0 = vld [vmem:[%s6587_s4 + $0xc0] sm:$0xff] }
 0x4b3   :  { %v2155_v49 = vmul.f32 %v5999_v1, %v2148_v18  ;;  %v2180_v6 = vmul.f32 %v6024_v5, %v2178_v60  ;;  %v6056_v13 = vld [vmem:[%s6587_s4 + $0xb8] sm:$0xff] }
 0x4b4   :  { %v5911_v46 = vpop.permute.xlu0 %2174  ;;  %v5913_v28 = vpop.permute.xlu1 %2172  ;;  %v2139_v30 = vadd.f32 %v2135_v4, %v2119_v3  ;;  %v2137_v8 = vadd.f32 %v2133_v51, %v2117_v45  ;;  %6697 = vst [vmem:[#allocation18_spill] sm:$0xff] %v6056_v13  ;;  %v6072_v51 = vld [vmem:[%s6587_s4 + $0xa8] sm:$0xff]  ;;  %v6078_v3 = vld [vmem:[%s6587_s4 + $0xe0] sm:$0xff] }
 0x4b5   :  { %v2179_v9 = vsel %vm1352_vm6, %v5911_v46, %v5890_v48  ;;  %v2177_v40 = vsel %vm1352_vm6, %v5888_v53, %v5913_v28  ;;  %v6049_v53 = vld [vmem:[%s6587_s4 + $0x98] sm:$0xff] }
 0x4b6   :  { %v2159_v50 = vadd.f32 %v2155_v49, %v2139_v30  ;;  %v2157_v23 = vadd.f32 %v2153_v39, %v2137_v8  ;;  %6696 = vst [vmem:[#allocation17_spill] sm:$0xff] %v6049_v53  ;;  %v2163_v18 = vmul.f32 %v6049_v53, %v5790_v59  ;;  %v2183_v4 = vmul.f32 %v6056_v13, %v2179_v9 }
 0x4b7   :  { %v2184_v59 = vadd.f32 %v2180_v6, %v2164_v42  ;;  %v2181_v41 = vmul.f32 %v6072_v51, %v2177_v40  ;;  %v2176_v9 = vsel %vm1352_vm6, %v5913_v28, %v5911_v46  ;;  %v6118_v46 = vld [vmem:[%s6587_s4 + $0x100] sm:$0xff] }
 0x4b8   :  { %v2191_v11 = vpop.permute.xlu0 %2190  ;;  %v2189_v35 = vpop.permute.xlu1 %2188  ;;  %v2167_v60 = vadd.f32 %v2163_v18, %v2159_v50 }
 0x4b9   :  { %v2198_v52 = vsel %vm1377_vm7, %v2189_v35, %v2191_v11 }
 0x4ba   :  { %v2200_v22 = vmul.f32 %v6040_v0, %v2198_v52  ;;  %v6094_v52 = vld [vmem:[%s6587_s4 + $0xc8] sm:$0xff]  ;;  %v2187_v6 = vadd.f32 %v2183_v4, %v2167_v60 }
 0x4bc   :  { %v5976_v2 = vpop.permute.xlu0 %2194  ;;  %v5978_v57 = vpop.permute.xlu1 %2192  ;;  %v2204_v30 = vadd.f32 %v2200_v22, %v2184_v59  ;;  %v6112_v22 = vld [vmem:[%s6587_s4 + $0xe8] sm:$0xff] }
 0x4bd   :  { %v2199_v48 = vsel %vm1377_vm7, %v5976_v2, %v2189_v35  ;;  %v6062_v35 = vld [vmem:[%s6587_s4 + $0x88] sm:$0xff]  ;;  %v2197_v47 = vsel %vm1377_vm7, %v2191_v11, %v5978_v57  ;;  %v6086_v11 = vld [vmem:[%s6587_s4 + $0xd8] sm:$0xff]  ;;  %v2196_v4 = vsel %vm1377_vm7, %v5978_v57, %v5976_v2 }
 0x4be   :  { %v2161_v7 = vmul.f32 %v6062_v35, %v5782_v24  ;;  %6698 = vst [vmem:[#allocation19_spill] sm:$0xff] %v6086_v11  ;;  %v2203_v45 = vmul.f32 %v6086_v11, %v2199_v48  ;;  %v6138_v57 = vld [vmem:[%s6587_s4 + $0x118] sm:$0xff] }
 0x4bf   :  { %6701 = vst [vmem:[#allocation14_spill] sm:$0xff] %v6138_v57 }
 0x4c0   :  { %v2211_v43 = vpop.permute.xlu0 %2210  ;;  %v2209_v58 = vpop.permute.xlu1 %2208  ;;  %v2165_v62 = vadd.f32 %v2161_v7, %v2157_v23  ;;  %v2207_v18 = vadd.f32 %v2203_v45, %v2187_v6 }
 0x4c1   :  { %v2218_v54 = vsel %vm1402_vm8, %v2209_v58, %v2211_v43 }
 0x4c2   :  { %v2220_v49 = vmul.f32 %v6078_v3, %v2218_v54  ;;  %v2185_v54 = vadd.f32 %v2181_v41, %v2165_v62 }
 0x4c4   :  { %v2215_v26 = vpop.permute.xlu0 %2214  ;;  %v2213_v56 = vpop.permute.xlu1 %2212  ;;  %v2224_v23 = vadd.f32 %v2220_v49, %v2204_v30  ;;  %v6128_v49 = vld [vmem:[%s6587_s4 + $0xb0] sm:$0xff] }
 0x4c5   :  { %v2219_v24 = vsel %vm1402_vm8, %v2215_v26, %v2209_v58  ;;  %v2217_v39 = vsel %vm1402_vm8, %v2211_v43, %v2213_v56  ;;  %v2201_v58 = vmul.f32 %v6094_v52, %v2197_v47  ;;  %v6104_v43 = vld [vmem:[%s6587_s4 + $0xf8] sm:$0xff]  ;;  %6700 = vst [vmem:[#allocation21_spill] sm:$0xff] %v6128_v49 }
 0x4c6   :  { %6699 = vst [vmem:[#allocation20_spill] sm:$0xff] %v6104_v43  ;;  %v2223_v50 = vmul.f32 %v6104_v43, %v2219_v24  ;;  %v2221_v48 = vmul.f32 %v6112_v22, %v2217_v39  ;;  %v2182_v24 = vmul.f32 %v6128_v49, %v2176_v9  ;;  %v2216_v9 = vsel %vm1402_vm8, %v2213_v56, %v2215_v26 }
 0x4c7   :  { %v2205_v7 = vadd.f32 %v2201_v58, %v2185_v54  ;;  %v6144_v58 = vld [vmem:[%s6587_s4 + $0x108] sm:$0xff] }
 0x4c8   :  { %v2231_v8 = vpop.permute.xlu0 %2230  ;;  %v2229_v42 = vpop.permute.xlu1 %2228  ;;  %v2227_v60 = vadd.f32 %v2223_v50, %v2207_v18 }
 0x4c9   :  { %v2238_v40 = vsel %vm1427_vm9, %v2229_v42, %v2231_v8  ;;  %v2225_v62 = vadd.f32 %v2221_v48, %v2205_v7 }
 0x4ca   :  { %v2240_v28 = vmul.f32 %v6118_v46, %v2238_v40 }
 0x4cc   :  { %v2244_v47 = vadd.f32 %v2240_v28, %v2224_v23  ;;  %v2235_v59 = vpop.permute.xlu0 %2234  ;;  %v2233_v41 = vpop.permute.xlu1 %2232  ;;  %v2186_v23 = vadd.f32 %v2182_v24, %v5901_v36  ;;  %v6161_v28 = vld [vmem:[%s6587_s4 + $0xf0] sm:$0xff] }
 0x4cd   :  { %v2239_v45 = vsel %vm1427_vm9, %v2235_v59, %v2229_v42  ;;  %v2237_v39 = vsel %vm1427_vm9, %v2231_v8, %v2233_v41  ;;  %v6150_v8 = vld [vmem:[%s6587_s4 + $0xd0] sm:$0xff]  ;;  %v2236_v48 = vsel %vm1427_vm9, %v2233_v41, %v2235_v59  ;;  %6703 = vst [vmem:[#allocation15_spill] sm:$0xff] %v6161_v28  ;;  %v2222_v18 = vmul.f32 %v6161_v28, %v2216_v9 }
 0x4ce   :  { %v2248_v2 = vrot.slane %v2244_v47, 4  ;;  %v2243_v30 = vmul.f32 %v6138_v57, %v2239_v45  ;;  %v2241_v6 = vmul.f32 %v6144_v58, %v2237_v39  ;;  %6702 = vst [vmem:[#allocation12_spill] sm:$0xff] %v6150_v8  ;;  %v2202_v42 = vmul.f32 %v6150_v8, %v2196_v4  ;;  %v6167_v36 = vld [vmem:[%s6587_s4 + $0x110] sm:$0xff] }
 0x4cf   :  { %6704 = vst [vmem:[#allocation13_spill] sm:$0xff] %v6167_v36 }
 0x4d0   :  { %v2249_v50 = vmax.f32 %v2244_v47, %v2248_v2  ;;  %v2247_v40 = vadd.f32 %v2243_v30, %v2227_v60  ;;  %v2245_v54 = vadd.f32 %v2241_v6, %v2225_v62  ;;  %v2206_v39 = vadd.f32 %v2202_v42, %v2186_v23 }
 0x4d1   :  { %v2242_v47 = vmul.f32 %v6167_v36, %v2236_v48 }
 0x4d2   :  { %v2250_v7 = vrot.slane %v2249_v50, 2  ;;  %v2266_v4 = vrot.slane %v2247_v40, 4  ;;  %v2254_v45 = vrot.slane %v2245_v54, 4  ;;  %v2226_v41 = vadd.f32 %v2222_v18, %v2206_v39 }
 0x4d4   :  { %v2251_v26 = vmax.f32 %v2249_v50, %v2250_v7  ;;  %v2267_v56 = vmax.f32 %v2247_v40, %v2266_v4  ;;  %v2255_v59 = vmax.f32 %v2245_v54, %v2254_v45  ;;  %v2246_v6 = vadd.f32 %v2242_v47, %v2226_v41 }
 0x4d5   :  { %v6175_v40 = vadd.s32 128, %v4722_v61  ;;  %v6706_v7 = vmov 0.0  }
 0x4d6   :  { %v2252_v24 = vrot.slane %v2251_v26, 1  ;;  %v2268_v60 = vrot.slane %v2267_v56, 2  ;;  %v2256_v62 = vrot.slane %v2255_v59, 2  ;;  %v2260_v48 = vrot.slane %v2246_v6, 4  ;;  %3925 = vmatprep.mubr.msk.f32.mxu1 %vm4220_vm14, %v6706_v7 }
 0x4d8   :  { %v6170_v2 = vmax.f32 %v2251_v26, %v2252_v24  ;;  %v2269_v30 = vmax.f32 %v2267_v56, %v2268_v60  ;;  %v2257_v9 = vmax.f32 %v2255_v59, %v2256_v62  ;;  %v2261_v45 = vmax.f32 %v2246_v6, %v2260_v48 }
 0x4da   :  { %v2270_v42 = vrot.slane %v2269_v30, 1  ;;  %v2258_v50 = vrot.slane %v2257_v9, 1  ;;  %2272 = vrot.lane.b32.xlu1 %v6170_v2, %s4212_s24  ;;  %v2262_v56 = vrot.slane %v2261_v45, 2 }
 0x4dc   :  { %v6177_v23 = vmax.f32 %v2269_v30, %v2270_v42  ;;  %v6179_v54 = vmax.f32 %v2257_v9, %v2258_v50  ;;  %v2263_v41 = vmax.f32 %v2261_v45, %v2262_v56 }
 0x4dd   :  { %v6181_v18 = vpop.permute.xlu1 %2445 }
 0x4de   :  { %6705 = vst [vmem:[#allocation10_spill] sm:$0xff] %v6177_v23  ;;  %2274 = vrot.lane.b32.xlu0 %v6179_v54, %s4212_s24  ;;  %2278 = vrot.lane.b32.xlu1 %v6177_v23, %s4212_s24  ;;  %vm2448_vm10 = vcmp.eq.s32.totalorder %v6175_v40, %v6181_v18  ;;  %v2264_v24 = vrot.slane %v2263_v41, 1  ;;  %vm2447_vm11 = vcmp.eq.s32.totalorder %v4722_v61, %v6181_v18 }
 0x4df   :  { %v3896_v4 = vsel %vm2448_vm10, 1.0, %v6706_v7 }
 0x4e0   :  { %v6193_v39 = vsub.f32 %v3896_v4, %v3896_v4  ;;  %v6215_v60 = vmax.f32 %v2263_v41, %v2264_v24 }
 0x4e2   :  { %6707 = vst [vmem:[#allocation16_spill] sm:$0xff] %v6193_v39  ;;  %2292 = vrot.lane.b32.xlu0 %v6170_v2, %s4211_s0  ;;  %2294 = vrot.lane.b32.xlu1 %v6179_v54, %s4211_s0  ;;  %v6633_v26 = vand.u32 4294901760, %v6193_v39 }
 0x4e4   :  { %v2528_v47 = vsub.f32 %v6193_v39, %v6633_v26 }
 0x4e6   :  { %2298 = vrot.lane.b32.xlu0 %v6177_v23, %s4211_s0  ;;  %2312 = vrot.lane.b32.xlu1 %v6170_v2, %s4213_s25  ;;  %v2529_v59 = vand.u32 4294901760, %v2528_v47 }
 0x4e8   :  { %2530 = vmatprep.mubr.f32.mxu0 %v2529_v59 }
 0x4ea   :  { %2314 = vrot.lane.b32.xlu0 %v6179_v54, %s4213_s25  ;;  %2318 = vrot.lane.b32.xlu1 %v6177_v23, %s4213_s25 }
 0x4ee   :  { %2332 = vrot.lane.b32.xlu0 %v6170_v2, %s4214_s26  ;;  %2334 = vrot.lane.b32.xlu1 %v6179_v54, %s4214_s26 }
 0x4f2   :  { %2338 = vrot.lane.b32.xlu0 %v6177_v23, %s4214_s26  ;;  %2364 = vrot.lane.b32.xlu1 %v6215_v60, %s4215_s27 }
 0x4f6   :  { %2362 = vrot.lane.b32.xlu0 %v6179_v54, %s4215_s27  ;;  %2382 = vrot.lane.b32.xlu1 %v6179_v54, %s4216_s28 }
 0x4fa   :  { %2360 = vrot.lane.b32.xlu0 %v6170_v2, %s4215_s27  ;;  %2380 = vrot.lane.b32.xlu1 %v6170_v2, %s4216_s28 }
 0x4fe   :  { %2384 = vrot.lane.b32.xlu0 %v6215_v60, %s4216_s28  ;;  %2404 = vrot.lane.b32.xlu1 %v6215_v60, %s4217_s29 }
 0x502   :  { %2402 = vrot.lane.b32.xlu0 %v6179_v54, %s4217_s29  ;;  %2422 = vrot.lane.b32.xlu1 %v6179_v54, %s4218_s30 }
 0x506   :  { %2400 = vrot.lane.b32.xlu0 %v6170_v2, %s4217_s29  ;;  %2420 = vrot.lane.b32.xlu1 %v6170_v2, %s4218_s30 }
 0x50a   :  { %2424 = vrot.lane.b32.xlu0 %v6215_v60, %s4218_s30  ;;  %2296 = vrot.lane.b32.xlu1 %v6215_v60, %s4211_s0 }
 0x50e   :  { %2276 = vrot.lane.b32.xlu0 %v6215_v60, %s4212_s24  ;;  %2336 = vrot.lane.b32.xlu1 %v6215_v60, %s4214_s26 }
 0x512   :  { %2316 = vrot.lane.b32.xlu0 %v6215_v60, %s4213_s25  ;;  %2386 = vrot.lane.b32.xlu1 %v6177_v23, %s4216_s28 }
 0x516   :  { %2366 = vrot.lane.b32.xlu0 %v6177_v23, %s4215_s27  ;;  %2426 = vrot.lane.b32.xlu1 %v6177_v23, %s4218_s30 }
 0x51a   :  { %2406 = vrot.lane.b32.xlu0 %v6177_v23, %s4217_s29 }
 0x54c   :  { %v2273_v62 = vpop.permute.xlu1 %2272 }
 0x550   :  { %v6259_v30 = vpop.permute.xlu0 %2274  ;;  %v6261_v6 = vpop.permute.xlu1 %2278 }
 0x551   :  { %v2283_v59 = vsel %vm1244_vm2, %v6261_v6, %v2273_v62  ;;  %v2282_v28 = vsel %vm1244_vm2, %v2273_v62, %v6259_v30 }
 0x552   :  { %v2284_v36 = vmul.f32 %v5908_v38, %v2283_v59  ;;  %v2285_v59 = vmul.f32 %v5949_v32, %v2282_v28 }
 0x554   :  { %v2293_v9 = vpop.permute.xlu0 %2292  ;;  %v6263_v42 = vpop.permute.xlu1 %2294  ;;  %v2288_v62 = vadd.f32 %v2284_v36, %v4988_v19  ;;  %v2289_v19 = vadd.f32 %v2285_v59, %v6695_v55  ;;  %v2352_v55 = vmul.f32 %v6015_v14, %v6170_v2 }
 0x555   :  { %v2302_v11 = vsel %vm1265_vm3, %v2293_v9, %v6263_v42 }
 0x558   :  { %v6265_v50 = vpop.permute.xlu0 %2298  ;;  %v2313_v48 = vpop.permute.xlu1 %2312 }
 0x559   :  { %v2303_v26 = vsel %vm1265_vm3, %v6265_v50, %v2293_v9 }
 0x55a   :  { %v2304_v8 = vmul.f32 %v5922_v33, %v2303_v26  ;;  %v2305_v26 = vmul.f32 %v5971_v27, %v2302_v11 }
 0x55c   :  { %v6267_v4 = vpop.permute.xlu0 %2314  ;;  %v6269_v45 = vpop.permute.xlu1 %2318  ;;  %v2308_v13 = vadd.f32 %v2304_v8, %v2288_v62  ;;  %v2309_v11 = vadd.f32 %v2305_v26, %v2289_v19 }
 0x55d   :  { %v2323_v57 = vsel %vm1290_vm4, %v6269_v45, %v2313_v48  ;;  %v2322_v33 = vsel %vm1290_vm4, %v2313_v48, %v6267_v4 }
 0x55e   :  { %v2324_v39 = vmul.f32 %v5935_v12, %v2323_v57  ;;  %v2325_v12 = vmul.f32 %v5993_v37, %v2322_v33 }
 0x560   :  { %v2333_v56 = vpop.permute.xlu0 %2332  ;;  %v6271_v47 = vpop.permute.xlu1 %2334  ;;  %v2328_v57 = vadd.f32 %v2324_v39, %v2308_v13  ;;  %v2329_v48 = vadd.f32 %v2325_v12, %v2309_v11 }
 0x561   :  { %v2342_v32 = vsel %vm1315_vm5, %v2333_v56, %v6271_v47 }
 0x564   :  { %v6276_v41 = vpop.permute.xlu0 %2338  ;;  %v6278_v24 = vpop.permute.xlu1 %2364 }
 0x565   :  { %v2343_v38 = vsel %vm1315_vm5, %v6276_v41, %v2333_v56 }
 0x566   :  { %v2344_v53 = vmul.f32 %v5957_v16, %v2343_v38  ;;  %v2345_v16 = vmul.f32 %v6009_v20, %v2342_v32  ;;  %v3895_v20 = vsel %vm2447_vm11, 1.0, %v6706_v7 }
 0x567   :  { %v6343_v62 = vsub.f32 %v3895_v20, %v3895_v20 }
 0x568   :  { %v2363_v43 = vpop.permute.xlu0 %2362  ;;  %v2383_v49 = vpop.permute.xlu1 %2382  ;;  %v2348_v8 = vadd.f32 %v2344_v53, %v2328_v57  ;;  %v2349_v53 = vadd.f32 %v2345_v16, %v2329_v48 }
 0x569   :  { %v2369_v13 = vsel %vm1352_vm6, %v2363_v43, %v6278_v24 }
 0x56a   :  { %v2356_v39 = vadd.f32 %v2352_v55, %v2348_v8 }
 0x56c   :  { %v6305_v9 = vpop.permute.xlu0 %2360  ;;  %v6307_v23 = vpop.permute.xlu1 %2380 }
 0x56d   :  { %v2370_v27 = vsel %vm1352_vm6, %v6305_v9, %v2363_v43  ;;  %v2390_v59 = vsel %vm1377_vm7, %v6307_v23, %v2383_v49  ;;  %v2373_v43 = vmul.f32 %v6072_v51, %v2369_v13 }
 0x56e   :  { %v2372_v37 = vmul.f32 %v6024_v5, %v2370_v27  ;;  %v2353_v5 = vmul.f32 %v6062_v35, %v6179_v54  ;;  %v2392_v32 = vmul.f32 %v6040_v0, %v2390_v59 }
 0x570   :  { %v6318_v28 = vpop.permute.xlu0 %2384  ;;  %v6320_v36 = vpop.permute.xlu1 %2404  ;;  %v2376_v2 = vadd.f32 %v2372_v37, %v2356_v39  ;;  %v2357_v26 = vadd.f32 %v2353_v5, %v2349_v53 }
 0x571   :  { %v2389_v14 = vsel %vm1377_vm7, %v2383_v49, %v6318_v28 }
 0x572   :  { %v2393_v19 = vmul.f32 %v6094_v52, %v2389_v14  ;;  %v2377_v54 = vadd.f32 %v2373_v43, %v2357_v26  ;;  %v2396_v57 = vadd.f32 %v2392_v32, %v2376_v2  ;;  %v2533_v52 = vand.u32 4294901760, %v6343_v62 }
 0x574   :  { %v2403_v56 = vpop.permute.xlu0 %2402  ;;  %v2423_v38 = vpop.permute.xlu1 %2422  ;;  %v2397_v11 = vadd.f32 %v2393_v19, %v2377_v54 }
 0x575   :  { %v2409_v33 = vsel %vm1402_vm8, %v2403_v56, %v6320_v36 }
 0x576   :  { %v2413_v27 = vmul.f32 %v6112_v22, %v2409_v33 }
 0x578   :  { %v6350_v12 = vpop.permute.xlu0 %2400  ;;  %v6352_v49 = vpop.permute.xlu1 %2420  ;;  %v2417_v13 = vadd.f32 %v2413_v27, %v2397_v11  ;;  %v6708_v11 = vld [vmem:[#allocation10_spill] sm:$0xff] }
 0x579   :  { %v2410_v35 = vsel %vm1402_vm8, %v6350_v12, %v2403_v56  ;;  %v2430_v51 = vsel %vm1427_vm9, %v6352_v49, %v2423_v38 }
 0x57a   :  { %v2412_v0 = vmul.f32 %v6078_v3, %v2410_v35  ;;  %v2432_v8 = vmul.f32 %v6118_v46, %v2430_v51  ;;  %v2534_v3 = vsub.f32 %v6343_v62, %v2533_v52 }
 0x57c   :  { %v2416_v16 = vadd.f32 %v2412_v0, %v2396_v57  ;;  %v6364_v48 = vpop.permute.xlu0 %2424  ;;  %v2297_v55 = vpop.permute.xlu1 %2296  ;;  %v2535_v26 = vand.u32 4294901760, %v2534_v3  ;;  %v4219_v0 = vmov 1.0   ;;  %v6710_v3 = vld [vmem:[#allocation18_spill] sm:$0xff] }
 0x57d   :  { %v2429_v37 = vsel %vm1427_vm9, %v2423_v38, %v6364_v48  ;;  %v2300_v46 = vsel %vm1265_vm3, %v2297_v55, %v6265_v50  ;;  %v2301_v56 = vsel %vm1265_vm3, %v6263_v42, %v2297_v55 }
 0x57e   :  { %v2436_v20 = vadd.f32 %v2432_v8, %v2416_v16  ;;  %v2433_v53 = vmul.f32 %v6144_v58, %v2429_v37  ;;  %v2306_v42 = vmul.f32 %v5870_v25, %v2301_v56  ;;  %v2307_v33 = vmul.f32 %v5963_v63, %v2300_v46  ;;  %v6709_v16 = vld [vmem:[#allocation17_spill] sm:$0xff] }
 0x57f   :  { %v2355_v8 = vmul.f32 %v6709_v16, %v6708_v11 }
 0x580   :  { %v6373_v22 = vand.u32 4294901760, %v2436_v20  ;;  %v2437_v39 = vadd.f32 %v2433_v53, %v2417_v13  ;;  %v2277_v38 = vpop.permute.xlu0 %2276  ;;  %v2337_v14 = vpop.permute.xlu1 %2336 }
 0x581   :  { %v2280_v58 = vsel %vm1244_vm2, %v2277_v38, %v6261_v6  ;;  %v2281_v59 = vsel %vm1244_vm2, %v6259_v30, %v2277_v38  ;;  %v2340_v19 = vsel %vm1315_vm5, %v2337_v14, %v6276_v41 }
 0x582   :  { %v6388_v5 = vsub.f32 %v2436_v20, %v6373_v22  ;;  %v6390_v43 = vand.u32 4294901760, %v2437_v39  ;;  %v2286_v50 = vmul.f32 %v5862_v31, %v2281_v59  ;;  %v2287_v2 = vmul.f32 %v5941_v44, %v2280_v58  ;;  %v6712_v58 = vld [vmem:[#allocation19_spill] sm:$0xff] }
 0x583   :  { %v2341_v31 = vsel %vm1315_vm5, %v6271_v47, %v2337_v14 }
 0x584   :  { %v6397_v6 = vsub.f32 %v2437_v39, %v6390_v43  ;;  %v2290_v30 = vadd.f32 %v2286_v50, %v6687_v29  ;;  %v2291_v32 = vadd.f32 %v2287_v2, %v6694_v34  ;;  %v2317_v35 = vpop.permute.xlu0 %2316  ;;  %2460 = vmatprep.subr.mxu0 %v6390_v43  ;;  %v2549_v44 = vand.u32 4294901760, %v6388_v5  ;;  %v2387_v53 = vpop.permute.xlu1 %2386 }
 0x585   :  { %v2320_v25 = vsel %vm1290_vm4, %v2317_v35, %v6269_v45  ;;  %v2321_v29 = vsel %vm1290_vm4, %v6267_v4, %v2317_v35  ;;  %2462 = vmatpush1.xpose.msra.mxu0 %v6373_v22  ;;  %v2346_v54 = vmul.f32 %v5885_v15, %v2341_v31  ;;  %v2347_v45 = vmul.f32 %v5999_v1, %v2340_v19  ;;  %v6715_v35 = vld [vmem:[#allocation12_spill] sm:$0xff] }
 0x586   :  { %v2310_v63 = vadd.f32 %v2306_v42, %v2290_v30  ;;  %v2311_v34 = vadd.f32 %v2307_v33, %v2291_v32  ;;  %v2326_v41 = vmul.f32 %v5877_v17, %v2321_v29  ;;  %v2327_v51 = vmul.f32 %v5984_v21, %v2320_v25  ;;  %v6713_v42 = vld [vmem:[#allocation21_spill] sm:$0xff] }
 0x587   :  { %v2543_v47 = vand.u32 4294901760, %v6397_v6  ;;  %v2354_v4 = vmul.f32 %v5895_v10, %v6215_v60  ;;  %v2550_v15 = vsub.f32 %v6388_v5, %v2549_v44  ;;  %v2391_v46 = vsel %vm1377_vm7, %v2387_v53, %v6307_v23 }
 0x588   :  { %v2330_v57 = vadd.f32 %v2326_v41, %v2310_v63  ;;  %v2331_v27 = vadd.f32 %v2327_v51, %v2311_v34  ;;  %2536 = vmatmul.mubr.f32.vlgmr.msra.gmra.mrb[2].mxu0 %v2535_v26  ;;  %v2367_v1 = vpop.permute.xlu0 %2366  ;;  %v2395_v59 = vmul.f32 %v6712_v58, %v2391_v46  ;;  %v2427_v50 = vpop.permute.xlu1 %2426  ;;  %v2388_v26 = vsel %vm1377_vm7, %v6318_v28, %v2387_v53  ;;  %v6717_v28 = vld [vmem:[#allocation14_spill] sm:$0xff]  ;;  %v6718_v41 = vld [vmem:[#allocation15_spill] sm:$0xff] }
 0x589   :  { %3899 = vmatprep.mubr.msk.f32.mxu0 %vm2448_vm10, %v4219_v0  ;;  %v2544_v55 = vsub.f32 %v6397_v6, %v2543_v47  ;;  %v2371_v13 = vsel %vm1352_vm6, %v2367_v1, %v6305_v9  ;;  %v2551_v20 = vand.u32 4294901760, %v2550_v15  ;;  %v6711_v9 = vld [vmem:[#allocation16_spill] sm:$0xff]  ;;  %v2368_v14 = vsel %vm1352_vm6, %v6278_v24, %v2367_v1 }
 0x58a   :  { %v2350_v17 = vadd.f32 %v2346_v54, %v2330_v57  ;;  %v2351_v21 = vadd.f32 %v2347_v45, %v2331_v27  ;;  %v2375_v39 = vmul.f32 %v6710_v3, %v2371_v13  ;;  %v2374_v33 = vmul.f32 %v6713_v42, %v2368_v14 }
 0x58b   :  { %v2545_v60 = vand.u32 4294901760, %v2544_v55  ;;  %v2431_v24 = vsel %vm1427_vm9, %v2427_v50, %v6352_v49  ;;  %v2394_v31 = vmul.f32 %v6715_v35, %v2388_v26  ;;  %v6716_v25 = vand.u32 4294901760, %v6711_v9 }
 0x58c   :  { %v2358_v37 = vadd.f32 %v2354_v4, %v2350_v17  ;;  %v2359_v10 = vadd.f32 %v2355_v8, %v2351_v21  ;;  %v2407_v38 = vpop.permute.xlu0 %2406  ;;  %v2435_v29 = vmul.f32 %v6717_v28, %v2431_v24  ;;  %v2428_v54 = vsel %vm1427_vm9, %v6364_v48, %v2427_v50 }
 0x58d   :  { %2546 = vmatprep.subr.mxu0 %v2545_v60  ;;  %v2411_v23 = vsel %vm1402_vm8, %v2407_v38, %v6350_v12  ;;  %v6465_v12 = vadd.s32 384, %v4722_v61  ;;  %v2408_v63 = vsel %vm1402_vm8, %v6320_v36, %v2407_v38  ;;  %v2441_v57 = vadd.s32 256, %v4722_v61  ;;  %v3403_v61 = vld [vmem:[%s6588_s5] sm:$0xff]  ;;  %s4221_s5 = smov [#allocation3]  }
 0x58e   :  { %2552 = vmatpush1.xpose.msra.mxu0 %v2551_v20  ;;  %v2379_v56 = vadd.f32 %v2375_v39, %v2359_v10  ;;  %v2378_v32 = vadd.f32 %v2374_v33, %v2358_v37  ;;  %v2414_v51 = vmul.f32 %v6718_v41, %v2408_v63  ;;  %v3409_v13 = vand.u32 4294901760, %v3403_v61  ;;  %s3873_s24 = sshll.u32 %s4221_s5, 4  ;;  %s3874_s24 = int_to_ptr.vmem [resolvable:$true] %s3873_s24 }
 0x58f   :  { %2625 = vmatprep.subr.mxu0 %v6397_v6  ;;  %v6714_v6 = vld [vmem:[#allocation20_spill] sm:$0xff]  ;;  %vm2450_vm12 = vcmp.eq.s32.totalorder %v6465_v12, %v6181_v18  ;;  %vm2449_vm13 = vcmp.eq.s32.totalorder %v2441_v57, %v6181_v18  ;;  %s4161_s25 = scalar_lea.vmem %s3874_s24, 128  ;;  %p4166_p1 = scmp.lt.s32.totalorder %s3874_s24, %s3874_s24 }
 0x590   :  { %v2399_v2 = vadd.f32 %v2395_v59, %v2379_v56  ;;  %v2415_v30 = vmul.f32 %v6714_v6, %v2411_v23  ;;  %v2398_v49 = vadd.f32 %v2394_v31, %v2378_v32  ;;  %v3898_v36 = vsel %vm2450_vm12, 1.0, %v6706_v7  ;;  %3924 = vmatpush3.msra.mxu1 %v3409_v13  ;;  %p4162_p0 = scmp.ne.s32.totalorder %s3874_s24, %s4161_s25  ;;  %p4167_p2 = scmp.lt.s32.totalorder %s4161_s25, %s4161_s25 }
 0x591   :  { %3900 = vmatmul.mubr.msk.f32.vlgmr.msra.gmra.mrb[2].mxu0 %vm2447_vm11, %v4219_v0  ;;  %v3897_v17 = vsel %vm2449_vm13, 1.0, %v6706_v7  ;;  %3928 = vmatprep.subr.mxu1 %v6706_v7  ;;  %v3486_v20 = vsub.f32 %v3403_v61, %v3409_v13 }
 0x592   :  { %2628 = vmatpush1.xpose.msra.mxu0 %v6388_v5  ;;  %2693 = vmatprep.mubr.f32.mxu0 %v6711_v9  ;;  %v2419_v19 = vadd.f32 %v2415_v30, %v2399_v2  ;;  %v2418_v45 = vadd.f32 %v2414_v51, %v2398_v49  ;;  %p4168_p3 = por %p4167_p2, %p4166_p1 }
 0x593   :  { %2702 = vmatprep.subr.mxu0 %v6390_v43  ;;  %v3487_v18 = vand.u32 4294901760, %v3486_v20 }
 0x594   :  { %v2439_v34 = vadd.f32 %v2435_v29, %v2419_v19  ;;  %p4169_p4 = pnand %p4168_p3, %p4162_p0 }
 0x595   :  { %v3488_v56 = vsub.f32 %v3486_v20, %v3487_v18 }
 0x596   :  { %v2931_v27 = vand.u32 4294901760, %v2439_v34 }
 0x597   :  { %v3489_v58 = vand.u32 4294901760, %v3488_v56 }
 0x598   :  { %v3014_v48 = vsub.f32 %v2439_v34, %v2931_v27 }
 0x599   :  { %2696 = vmatmul.mubr.f32.vlgmr.msra.gmra.mrb[2].mxu0 %v6343_v62 }
 0x59a   :  { %2704 = vmatpush1.xpose.msra.mxu0 %v6373_v22  ;;  %2770 = vmatprep.mubr.f32.mxu0 %v6716_v25  ;;  %v3015_v5 = vand.u32 4294901760, %v3014_v48 }
 0x59b   :  { %2782 = vmatprep.subr.mxu0 %v2543_v47  ;;  %v6719_v47 = vld [vmem:[#allocation13_spill] sm:$0xff] }
 0x59c   :  { %v2434_v4 = vmul.f32 %v6719_v47, %v2428_v54  ;;  %v3016_v8 = vsub.f32 %v3014_v48, %v3015_v5 }
 0x59e   :  { %v2438_v62 = vadd.f32 %v2434_v4, %v2418_v45  ;;  %v3017_v37 = vand.u32 4294901760, %v3016_v8 }
 0x5a0   :  { %v2933_v21 = vand.u32 4294901760, %v2438_v62 }
 0x5a1   :  { %2774 = vmatmul.mubr.f32.vlgmr.msra.gmra.mrb[2].mxu0 %v2533_v52  ;;  %v2998_v52 = vsub.f32 %v3898_v36, %v3898_v36 }
 0x5a2   :  { %2786 = vmatpush1.xpose.msra.mxu0 %v2549_v44  ;;  %3901 = vmatprep.mubr.msk.f32.mxu0 %vm2448_vm10, %v4219_v0  ;;  %v3020_v16 = vsub.f32 %v2438_v62, %v2933_v21 }
 0x5a3   :  { %2858 = vmatprep.subr.mxu0 %v6390_v43  ;;  %v2999_v11 = vand.u32 4294901760, %v2998_v52  ;;  %v3004_v43 = vsub.f32 %v3897_v17, %v3897_v17 }
 0x5a4   :  { %v3021_v55 = vand.u32 4294901760, %v3020_v16 }
 0x5a5   :  { %v3000_v44 = vsub.f32 %v2998_v52, %v2999_v11  ;;  %v3005_v15 = vand.u32 4294901760, %v3004_v43 }
 0x5a6   :  { %v3022_v40 = vsub.f32 %v3020_v16, %v3021_v55 }
 0x5a7   :  { %v3001_v1 = vand.u32 4294901760, %v3000_v44 }
 0x5a8   :  { %v3023_v60 = vand.u32 4294901760, %v3022_v40 }
 0x5a9   :  { %3902 = vmatmul.mubr.msk.f32.vlgmr.msra.gmra.mrb[2].mxu0 %vm2447_vm11, %v4219_v0 }
 0x5aa   :  { %2860 = vmatpush1.xpose.msra.mxu0 %v6373_v22  ;;  %3903 = vmatprep.mubr.msk.f32.mxu0 %vm2448_vm10, %v4219_v0  ;;  %v3006_v22 = vsub.f32 %v3004_v43, %v3005_v15 }
 0x5ab   :  { %2932 = vmatprep.subr.mxu0 %v2931_v27 }
 0x5ac   :  { %v3007_v10 = vand.u32 4294901760, %v3006_v22 }
 0x5b1   :  { %3904 = vmatmul.mubr.msk.f32.vlgmr.msra.gmra.mrb[2].mxu0 %vm2447_vm11, %v4219_v0 }
 0x5b2   :  { %2934 = vmatpush1.xpose.msra.mxu0 %v2933_v21  ;;  %3002 = vmatprep.mubr.f32.mxu0 %v3001_v1 }
 0x5b3   :  { %3018 = vmatprep.subr.mxu0 %v3017_v37 }
 0x5b9   :  { %3008 = vmatmul.mubr.f32.vlgmr.msra.gmra.mrb[2].mxu0 %v3007_v10 }
 0x5ba   :  { %3024 = vmatpush1.xpose.msra.mxu0 %v3023_v60  ;;  %3905 = vmatprep.mubr.msk.f32.mxu0 %vm2450_vm12, %v4219_v0 }
 0x5bb   :  { %3097 = vmatprep.subr.mxu0 %v3014_v48 }
 0x5c1   :  { %3906 = vmatmul.mubr.msk.f32.vlgmr.msra.gmra.mrb[2].mxu0 %vm2449_vm13, %v4219_v0 }
 0x5c2   :  { %3100 = vmatpush1.xpose.msra.mxu0 %v3020_v16  ;;  %3165 = vmatprep.mubr.f32.mxu0 %v2998_v52 }
 0x5c3   :  { %3174 = vmatprep.subr.mxu0 %v2931_v27 }
 0x5c9   :  { %3168 = vmatmul.mubr.f32.vlgmr.msra.gmra.mrb[2].mxu0 %v3004_v43 }
 0x5ca   :  { %3176 = vmatpush1.xpose.msra.mxu0 %v2933_v21  ;;  %3242 = vmatprep.mubr.f32.mxu0 %v2999_v11 }
 0x5cb   :  { %3254 = vmatprep.subr.mxu0 %v3015_v5 }
 0x5d1   :  { %3246 = vmatmul.mubr.f32.vlgmr.msra.gmra.mrb[2].mxu0 %v3005_v15 }
 0x5d2   :  { %3258 = vmatpush1.xpose.msra.mxu0 %v3021_v55  ;;  %3907 = vmatprep.mubr.msk.f32.mxu0 %vm2450_vm12, %v4219_v0 }
 0x5d3   :  { %3330 = vmatprep.subr.mxu0 %v2931_v27 }
 0x5d9   :  { %3908 = vmatmul.mubr.msk.f32.vlgmr.msra.gmra.mrb[2].mxu0 %vm2449_vm13, %v4219_v0 }
 0x5da   :  { %3332 = vmatpush1.xpose.msra.mxu0 %v2933_v21  ;;  %3909 = vmatprep.mubr.msk.f32.mxu0 %vm2450_vm12, %v4219_v0 }
 0x5e1   :  { %3910 = vmatmul.mubr.msk.f32.vlgmr.msra.gmra.mrb[2].mxu0 %vm2449_vm13, %v4219_v0 }
 0x6b4   :  { %v3399_v53 = vpop.f32.mrb[2].mxu0 }
 0x6b5   :  { %v3406_v3 = vsel %vm3404_vm15, %v3399_v53, 0  ;;  %v3401_v39 = vpop.f32.mrb[3].mxu0 }
 0x6b6   :  { %v3474_v0 = vand.u32 4294901760, %v3406_v3 }
 0x6b8   :  { %v3475_v46 = vsub.f32 %v3406_v3, %v3474_v0 }
 0x6ba   :  { %v3476_v38 = vand.u32 4294901760, %v3475_v46 }
 0x6bc   :  { %v3477_v9 = vsub.f32 %v3475_v46, %v3476_v38 }
 0x6be   :  { %v3478_v59 = vand.u32 4294901760, %v3477_v9 }
 0x6c0   :  { %3926 = vmatmul.mubr.f32.vlgmr.msra.gmra.mrb[4].mxu1 %v3478_v59 }
 0x6c1   :  { %3929 = vmatpush3.msra.mxu1 %v3489_v58  ;;  %3930 = vmatprep.mubr.msk.f32.mxu1 %vm4220_vm14, %v6706_v7 }
 0x6c2   :  { %3933 = vmatprep.subr.mxu1 %v6706_v7 }
 0x6c8   :  { %3931 = vmatmul.mubr.f32.vlgmr.msra.gmra.mrb[4].mxu1 %v3474_v0 }
 0x6c9   :  { %3934 = vmatpush3.msra.mxu1 %v3486_v20  ;;  %3935 = vmatprep.mubr.msk.f32.mxu1 %vm4220_vm14, %v6706_v7 }
 0x6ca   :  { %3938 = vmatprep.subr.mxu1 %v6706_v7 }
 0x6d0   :  { %3936 = vmatmul.mubr.f32.vlgmr.msra.gmra.mrb[4].mxu1 %v3475_v46 }
 0x6d1   :  { %3939 = vmatpush3.msra.mxu1 %v3409_v13  ;;  %3940 = vmatprep.mubr.msk.f32.mxu1 %vm4220_vm14, %v6706_v7 }
 0x6d2   :  { %3943 = vmatprep.subr.mxu1 %v6706_v7 }
 0x6d8   :  { %3941 = vmatmul.mubr.f32.vlgmr.msra.gmra.mrb[4].mxu1 %v3476_v38 }
 0x6d9   :  { %3944 = vmatpush3.msra.mxu1 %v3487_v18  ;;  %3945 = vmatprep.mubr.msk.f32.mxu1 %vm4220_vm14, %v6706_v7 }
 0x6da   :  { %3948 = vmatprep.subr.mxu1 %v6706_v7 }
 0x6e0   :  { %3946 = vmatmul.mubr.f32.vlgmr.msra.gmra.mrb[4].mxu1 %v3474_v0 }
 0x6e1   :  { %3949 = vmatpush3.msra.mxu1 %v3409_v13  ;;  %3950 = vmatprep.mubr.msk.f32.mxu1 %vm4220_vm14, %v6706_v7 }
 0x6e8   :  { %3951 = vmatmul.mubr.f32.vlgmr.msra.gmra.mrb[4].mxu1 %v3474_v0 }
 0x7bb   :  { %v3850_v14 = vpop.f32.mrb[4].mxu1 }
 0x7bc   :  { %3854 = vst.msk [vmem:[#allocation3] sm:$0xff] %vm3404_vm15, %v3850_v14  ;;  %v3952_v23 = vpop.f32.mrb[5].mxu1  ;;  %v3855_v50 = vsel %vm3404_vm15, %v3850_v14, -inf }
 0x7bd   :  { %3856 = vmax.xlane.f32.xlu0 %v3855_v50 }
 0x84a   :  { %v3857_v2 = vpop.xlane.xlu0 %3856 }
 0x84b   :  { %v3858_v42 = vsub.f32 %v3850_v14, %v3857_v2 }
 0x84d   :  { %v3859_v33 = vmul.f32 1.442695, %v3858_v42 }
 0x84f   :  { %4121 = vpow2.f32 %v3859_v33 }
 0x859   :  { %v4122_v26 = vpop.eup %4121 }
 0x85a   :  { %v3861_v6 = vsel %vm3404_vm15, %v4122_v26, 0.0 }
 0x85b   :  { %3862 = vadd.xlane.f32.xlu1 %v3861_v6 }
 0x85c   :  { %4172 = shalt.err (!%p4169_p4)
}
 0x85d   :  { %s4173_s28 = scalar_lea.hbm %s6590_s7, 128 }
 0x85e   :  { %p4174_p5 = scmp.ne.s32.totalorder %s6590_s7, %s4173_s28  ;;  %p4177_p6 = scmp.lt.u32.totalorder %s4173_s28, %s6590_s7 }
 0x860   :  { %p4179_p7 = pnand %p4177_p6, %p4174_p5 }
 0x862   :  { %4182 = shalt.err (!%p4179_p7)
}
 0x863   :  { %3876 = dma.vmem_to_hbm [thread:$0]  %s3874_s24, 128, %s6590_s7, [#allocation4]  }
 0x864   :  { %s4222_s6 = smov [#allocation5]  }
 0x865   :  { %s3883_s13 = sshll.u32 %s4222_s6, 4  ;;  %s3884_s13 = int_to_ptr.vmem [resolvable:$true] %s3883_s13 }
 0x866   :  { %s4183_s14 = scalar_lea.vmem %s3884_s13, 128  ;;  %p4188_p9 = scmp.lt.s32.totalorder %s3884_s13, %s3884_s13 }
 0x867   :  { %p4184_p8 = scmp.ne.s32.totalorder %s3884_s13, %s4183_s14  ;;  %p4189_p10 = scmp.lt.s32.totalorder %s4183_s14, %s4183_s14 }
 0x869   :  { %p4190_p11 = por %p4189_p10, %p4188_p9 }
 0x86b   :  { %p4191_p12 = pnand %p4190_p11, %p4184_p8 }
 0x8e8   :  { %v3863_v7 = vpop.xlane.xlu1 %3862 }
 0x8e9   :  { %4123 = vrcp.f32 %v3863_v7 }
 0x8f3   :  { %v4124_v30 = vpop.eup %4123 }
 0x8f4   :  { %v3865_v32 = vmul.f32 %v4124_v30, %v4122_v26 }
 0x8f6   :  { %3866 = vst.msk [vmem:[#allocation5] sm:$0xff] %vm3404_vm15, %v3865_v32 }
 0x8f7   :  { %4194 = shalt.err (!%p4191_p12)
}
 0x8f8   :  { %s4195_s7 = scalar_lea.hbm %s6591_s8, 128 }
 0x8f9   :  { %p4196_p13 = scmp.ne.s32.totalorder %s6591_s8, %s4195_s7  ;;  %p4199_p0 = scmp.lt.u32.totalorder %s4195_s7, %s6591_s8 }
 0x8fb   :  { %p4201_p1 = pnand %p4199_p0, %p4196_p13 }
 0x8fd   :  { %4204 = shalt.err (!%p4201_p1)
}
 0x8fe   :  { %3886 = dma.vmem_to_hbm [thread:$0]  %s3884_s13, 128, %s6591_s8, [#allocation6]  }
 0x8ff   :  { %4205 = dma.done.wait [#allocation4], 128  }
 0x900   :  { %4206 = vsyncadd [#allocation4], 4294967168 }
 0x901   :  { %4207 = dma.done.wait [#allocation6], 128  }
 0x902   :  { %4208 = vsyncadd [#allocation6], 4294967168 }
 0x903   :  { %3893 = vsyncpa [#allocation4], 1 }
 0x904   :  { %3894 = vsyncpa [#allocation6], 1 }

</bundles_post_ra>
